<compile_context>
chip_gen: v7x
topology: tpu7x:2x2x1
jax: 0.10.0
libtpu: 0.0.40
codegen_flags: <defaults>
</compile_context>

<pallas_src>
import functools

import jax
import jax.numpy as jnp
from jax.experimental import pallas as pl
from jax.experimental.pallas import tpu as pltpu

NUM_FEATURES = 128            # Q_network.num_features
ARCH = (500, 400, 300)        # Q_network.architecture

# Lane-friendly padded layer widths (zero-padded => numerically exact).
H1_PAD, H2_PAD, H3_PAD = 512, 512, 384
OUT_PAD = 128                 # per-Q-network padded output width


def _critic_kernel(
    particles_ref,            # (TB*Np, D)        f32
    fa_ref,                   # (TB, F+A)         f32
    pool_ref,                 # (TB, TB*Np)       f32  masked mean-pool matrix
    wc1_ref, bc1_ref,         # (D, 512) f32, (1, 512) f32         [Q1 | Q2]
    wc2_ref, bc2_ref,         # (2, 256, 128) bf16, (2, 1, 128) f32
    wl1p_ref, bl1_ref,        # (2, 128, 512) bf16, (2, 1, 512) f32
    wl1fa_ref,                # (F+A, 1024) f32                    [Q1 | Q2]
    wl2_ref, bl2_ref,         # (2, 512, 512) bf16, (2, 1, 512) f32
    wl3_ref, bl3_ref,         # (2, 512, 384) bf16, (2, 1, 384) f32
    wl4_ref, bl4_ref,         # (2, 384, 128) bf16, (2, 1, 128) f32
    out_ref):                 # (TB, 2*128)       f32              [Q1 | Q2]
  nf2 = wc2_ref.shape[1]                  # 256
  h1w = wl1p_ref.shape[-1]                # 512 (padded linear-1 width)
  out_w = wl4_ref.shape[-1]               # 128 (padded per-network output)

  def mm(x, w):
    # Cast the activation to the weight's storage dtype at the MXU input,
    # always accumulating in f32 (bf16 MXU rate where the weight is bf16).
    return jnp.dot(x.astype(w.dtype), w, preferred_element_type=jnp.float32)

  p = particles_ref[...]                  # (TB*Np, D) f32
  fa = fa_ref[...]                        # (TB, F+A)  f32
  pool = pool_ref[...]                    # (TB, TB*Np) f32

  # Shared-input layers fused across both heads (concatenated on lanes):
  #   conv1 on the particles and the features/action slice of linear-1.
  hc = jnp.maximum(
      jnp.dot(p, wc1_ref[...], preferred_element_type=jnp.float32)
      + bc1_ref[...], 0.0).astype(jnp.bfloat16)            # (TB*Np, 512)
  fa_l1 = jnp.dot(fa, wl1fa_ref[...],
                  preferred_element_type=jnp.float32)      # (TB, 1024)

  for qi in range(2):                     # Q1 then Q2, fused in one launch
    # conv2 (per-particle 1x1 linear) + ReLU.
    h = jnp.maximum(mm(hc[:, qi * nf2:(qi + 1) * nf2], wc2_ref[qi])
                    + bc2_ref[qi], 0.0)                    # (TB*Np, 128)
    # Masked mean over particles as one MXU matmul (mask and 1/N are baked
    # into `pool`); the ReLU after the mean is a no-op (pooled >= 0).
    pooled = jnp.dot(pool, h, preferred_element_type=jnp.float32)  # (TB, 128)

    # cat([pooled, features, action]) @ W1 as a split matmul (no in-kernel
    # concat on a non-128-aligned lane boundary).
    q = mm(pooled, wl1p_ref[qi]) + fa_l1[:, qi * h1w:(qi + 1) * h1w] \
        + bl1_ref[qi]
    q = jnp.maximum(q, 0.0)
    q = jnp.maximum(mm(q, wl2_ref[qi]) + bl2_ref[qi], 0.0)
    q = jnp.maximum(mm(q, wl3_ref[qi]) + bl3_ref[qi], 0.0)
    q = mm(q, wl4_ref[qi]) + bl4_ref[qi]                   # (TB, 128)
    out_ref[:, qi * out_w:(qi + 1) * out_w] = q.astype(out_ref.dtype)


def make_q_params(key, d_particle, feat_dim, act_dim):
  """Deterministic fan-in-uniform init (same shapes as the torch module)."""
  nf, nf2 = NUM_FEATURES, 2 * NUM_FEATURES
  in0 = nf + feat_dim + act_dim
  ks = jax.random.split(key, 14)

  def u(k, shape, fan_in):
    s = 1.0 / jnp.sqrt(jnp.float32(fan_in))
    return jax.random.uniform(k, shape, jnp.float32, -s, s)

  return dict(
      wc1=u(ks[0], (d_particle, nf2), d_particle),
      bc1=u(ks[1], (1, nf2), d_particle),
      wc2=u(ks[2], (nf2, nf), nf2),
      bc2=u(ks[3], (1, nf), nf2),
      wl1p=u(ks[4], (nf, ARCH[0]), in0),
      wl1fa=u(ks[5], (feat_dim + act_dim, ARCH[0]), in0),
      bl1=u(ks[6], (1, ARCH[0]), in0),
      wl2=u(ks[7], (ARCH[0], ARCH[1]), ARCH[0]),
      bl2=u(ks[8], (1, ARCH[1]), ARCH[0]),
      wl3=u(ks[9], (ARCH[1], ARCH[2]), ARCH[1]),
      bl3=u(ks[10], (1, ARCH[2]), ARCH[1]),
      wl4=u(ks[11], (ARCH[2], act_dim), ARCH[2]),
      bl4=u(ks[12], (1, act_dim), ARCH[2]),
  )


def prepare_fused_params(params_q1, params_q2, big_weight_dtype=jnp.bfloat16):
  """Stack / lane-concatenate Q1+Q2 params, zero-pad to lane-friendly widths,
  and cast the large (aligned-contraction) weights to bf16. Do this once."""

  def pad2(w, rows, cols):
    return jnp.pad(w, ((0, rows - w.shape[0]), (0, cols - w.shape[1])))

  def stack(name, pad_to=None, dtype=None):
    a, b = params_q1[name], params_q2[name]
    if pad_to is not None:
      a, b = pad2(a, *pad_to), pad2(b, *pad_to)
    out = jnp.stack([a, b], axis=0)
    return out.astype(dtype) if dtype is not None else out

  def concat_lanes(name, pad_to=None):
    a, b = params_q1[name], params_q2[name]
    if pad_to is not None:
      a, b = pad2(a, *pad_to), pad2(b, *pad_to)
    return jnp.concatenate([a, b], axis=1)

  nf = NUM_FEATURES
  fa_dim = params_q1["wl1fa"].shape[0]
  wdt = big_weight_dtype
  return dict(
      # Shared-input layers, both heads on the lane axis (keep f32: tiny K).
      wc1=concat_lanes("wc1"),                           # (D, 512)
      bc1=concat_lanes("bc1"),                           # (1, 512)
      wl1fa=concat_lanes("wl1fa", pad_to=(fa_dim, H1_PAD)),   # (F+A, 1024)
      # Per-head layers, stacked on a leading axis of 2.
      wc2=stack("wc2", dtype=wdt), bc2=stack("bc2"),
      wl1p=stack("wl1p", pad_to=(nf, H1_PAD), dtype=wdt),
      bl1=stack("bl1", pad_to=(1, H1_PAD)),
      wl2=stack("wl2", pad_to=(H1_PAD, H2_PAD), dtype=wdt),
      bl2=stack("bl2", pad_to=(1, H2_PAD)),
      wl3=stack("wl3", pad_to=(H2_PAD, H3_PAD), dtype=wdt),
      bl3=stack("bl3", pad_to=(1, H3_PAD)),
      wl4=stack("wl4", pad_to=(H3_PAD, OUT_PAD), dtype=wdt),
      bl4=stack("bl4", pad_to=(1, OUT_PAD)),
  )


@functools.partial(jax.jit, static_argnames=("block_b",))
def critic_forward_fused(fused, state_features, state_particles, action,
                         block_b=128):
  """Critic.forward (CDQ=True) with fused Q1+Q2: returns (Q1, Q2)."""
  B, N, D = state_particles.shape
  act_dim = action.shape[1]
  fa_dim = state_features.shape[1] + act_dim

  tb_req = max(8, ((int(block_b) + 7) // 8) * 8)    # requested tile, mult of 8
  b_ceil8 = ((B + 7) // 8) * 8
  tb = min(tb_req, b_ceil8)                         # don't over-pad tiny batches
  n_pad = ((N + 7) // 8) * 8                        # particle rows, mult of 8
  b_pad = ((B + tb - 1) // tb) * tb

  particles = jnp.pad(state_particles,
                      ((0, b_pad - B), (0, n_pad - N), (0, 0)))
  particles2d = particles.reshape(b_pad * n_pad, D)
  fa = jnp.pad(jnp.concatenate([state_features, action], axis=1),
               ((0, b_pad - B), (0, 0)))

  # Masked mean-pool matrix: pooled = pool @ conv_out. pool[b, b*n_pad+j] = 1/N
  # for j < N else 0 -> padding mask and the 1/N average done by the MXU.
  col = jnp.arange(tb * n_pad, dtype=jnp.int32)
  row = jnp.arange(tb, dtype=jnp.int32)
  pool = jnp.where((col[None, :] // n_pad == row[:, None])
                   & (col[None, :] % n_pad < N),
                   jnp.float32(1.0 / N), jnp.float32(0.0))

  args = (particles2d, fa, pool,
          fused["wc1"], fused["bc1"], fused["wc2"], fused["bc2"],
          fused["wl1p"], fused["bl1"], fused["wl1fa"],
          fused["wl2"], fused["bl2"], fused["wl3"], fused["bl3"],
          fused["wl4"], fused["bl4"])

  # Weights (and the pool matrix): full-array blocks with a constant index_map
  # -> VMEM-resident, DMA'd once (block index never changes along the grid).
  weight_specs = [
      pl.BlockSpec(a.shape, lambda i, _nd=a.ndim: (0,) * _nd) for a in args[3:]
  ]
  in_specs = [
      pl.BlockSpec((tb * n_pad, D), lambda i: (i, 0)),
      pl.BlockSpec((tb, fa_dim), lambda i: (i, 0)),
      pl.BlockSpec((tb, tb * n_pad), lambda i: (0, 0)),
  ] + weight_specs
  out_specs = pl.BlockSpec((tb, 2 * OUT_PAD), lambda i: (i, 0))

  # Advisory cost estimate (two Q heads, shared-input layers counted once).
  nf, nf2 = NUM_FEATURES, 2 * NUM_FEATURES
  M = b_pad * n_pad
  flops = 2 * M * D * (2 * nf2)                           # fused conv1
  flops += 2 * 2 * M * nf2 * nf                           # conv2 (x2 heads)
  flops += 2 * 2 * b_pad * (tb * n_pad) * nf              # pool matmul (x2)
  flops += 2 * b_pad * fa_dim * (2 * H1_PAD)              # fused fa @ wl1fa
  flops += 2 * 2 * b_pad * (nf * H1_PAD + H1_PAD * H2_PAD
                            + H2_PAD * H3_PAD + H3_PAD * OUT_PAD)
  bytes_accessed = sum(int(a.size) * a.dtype.itemsize for a in args)
  bytes_accessed += b_pad * 2 * OUT_PAD * 4

  out = pl.pallas_call(
      _critic_kernel,
      out_shape=jax.ShapeDtypeStruct((b_pad, 2 * OUT_PAD), jnp.float32),
      grid=(b_pad // tb,),
      in_specs=in_specs,
      out_specs=out_specs,
      compiler_params=pltpu.CompilerParams(
          dimension_semantics=("parallel",)),
      cost_estimate=pl.CostEstimate(
          flops=flops, transcendentals=0, bytes_accessed=bytes_accessed),
  )(*args)
  return out[:B, :act_dim], out[:B, OUT_PAD:OUT_PAD + act_dim]


def critic_forward(params_q1, params_q2, state_features, state_particles,
                   action, *, block_b=128, big_weight_dtype=jnp.bfloat16):
  """Convenience wrapper: prepares fused params then runs the fused kernel."""
  fused = prepare_fused_params(params_q1, params_q2,
                               big_weight_dtype=big_weight_dtype)
  return critic_forward_fused(fused, state_features, state_particles, action,
                              block_b=block_b)


def _q_network_ref(params, state_features, state_particles, action,
                   big_weight_dtype=jnp.bfloat16):
  """Pure-JAX reference of Q_network.forward with the kernel's precision
  policy (bf16 inputs on the large matmuls, f32 accumulation)."""
  B, N, D = state_particles.shape

  def mm(x, w, dt):
    return jnp.dot(x.astype(dt), w.astype(dt),
                   preferred_element_type=jnp.float32)

  wd = big_weight_dtype
  h = jnp.maximum(mm(state_particles.reshape(B * N, D), params["wc1"],
                     jnp.float32) + params["bc1"], 0.0)
  h = jnp.maximum(mm(h, params["wc2"], wd) + params["bc2"], 0.0)
  pooled = jnp.maximum(jnp.mean(h.reshape(B, N, NUM_FEATURES), axis=1), 0.0)
  fa = jnp.concatenate([state_features, action], axis=1)
  q = jnp.maximum(mm(pooled, params["wl1p"], wd)
                  + mm(fa, params["wl1fa"], jnp.float32) + params["bl1"], 0.0)
  q = jnp.maximum(mm(q, params["wl2"], wd) + params["bl2"], 0.0)
  q = jnp.maximum(mm(q, params["wl3"], wd) + params["bl3"], 0.0)
  return mm(q, params["wl4"], wd) + params["bl4"]


if __name__ == "__main__":
  # Small shapes implied by the module:
  #   obs_space[0].shape = (feat_dim,)        -> state_features (B, feat_dim)
  #   obs_space[1].shape = (N_particles, D)   -> state_particles (B, N, D)
  #   action_space.shape = (act_dim,)         -> action (B, act_dim)
  # B=12 / block_b=8 exercises the batch grid (grid=(2,)) with row padding,
  # and N=6 exercises the particle padding/masking path (padded to 8).
  B, N, D = 12, 6, 4
  feat_dim, act_dim = 6, 3

  key = jax.random.PRNGKey(0)
  k_in, k_q1, k_q2 = jax.random.split(key, 3)
  k_feat, k_part, k_act = jax.random.split(k_in, 3)

  state_features = jax.random.normal(k_feat, (B, feat_dim), jnp.float32)
  state_particles = jax.random.normal(k_part, (B, N, D), jnp.float32)
  action = jax.random.normal(k_act, (B, act_dim), jnp.float32)

  params_q1 = make_q_params(k_q1, D, feat_dim, act_dim)
  params_q2 = make_q_params(k_q2, D, feat_dim, act_dim)

  fused = prepare_fused_params(params_q1, params_q2)
  q1, q2 = jax.block_until_ready(
      critic_forward_fused(fused, state_features, state_particles, action,
                           block_b=8))

  r1 = _q_network_ref(params_q1, state_features, state_particles, action)
  r2 = _q_network_ref(params_q2, state_features, state_particles, action)
  assert q1.shape == (B, act_dim) and q2.shape == (B, act_dim)
  assert jnp.allclose(q1, r1, atol=2e-2, rtol=2e-2), \
      float(jnp.max(jnp.abs(q1 - r1)))
  assert jnp.allclose(q2, r2, atol=2e-2, rtol=2e-2), \
      float(jnp.max(jnp.abs(q2 - r2)))

  print("KERNEL_OK")
</pallas_src>

<mosaic_0001>
module attributes {stable_mosaic.version = 11 : i64} {
  func.func @_critic_kernel(%arg0: i32, %arg1: memref<64x4xf32, #tpu.memory_space<vmem>>, %arg2: memref<8x9xf32, #tpu.memory_space<vmem>>, %arg3: memref<8x64xf32, #tpu.memory_space<vmem>>, %arg4: memref<4x512xf32, #tpu.memory_space<vmem>>, %arg5: memref<1x512xf32, #tpu.memory_space<vmem>>, %arg6: memref<2x256x128xbf16, #tpu.memory_space<vmem>>, %arg7: memref<2x1x128xf32, #tpu.memory_space<vmem>>, %arg8: memref<2x128x512xbf16, #tpu.memory_space<vmem>>, %arg9: memref<2x1x512xf32, #tpu.memory_space<vmem>>, %arg10: memref<9x1024xf32, #tpu.memory_space<vmem>>, %arg11: memref<2x512x512xbf16, #tpu.memory_space<vmem>>, %arg12: memref<2x1x512xf32, #tpu.memory_space<vmem>>, %arg13: memref<2x512x384xbf16, #tpu.memory_space<vmem>>, %arg14: memref<2x1x384xf32, #tpu.memory_space<vmem>>, %arg15: memref<2x384x128xbf16, #tpu.memory_space<vmem>>, %arg16: memref<2x1x128xf32, #tpu.memory_space<vmem>>, %arg17: memref<8x256xf32, #tpu.memory_space<vmem>>) attributes {dimension_semantics = [#tpu.dimension_semantics<parallel>], iteration_bounds = array<i64: 2>, scalar_prefetch = 0 : i64, scratch_operands = 0 : i64, tpu.core_type = #tpu.core_type<tc>, window_params = [{transform_indices = @transform_0, window_bounds = array<i64: 64, 4>}, {transform_indices = @transform_1, window_bounds = array<i64: 8, 9>}, {pipeline_mode = #tpu.pipeline_mode<synchronous>, transform_indices = @transform_2, window_bounds = array<i64: 8, 64>}, {pipeline_mode = #tpu.pipeline_mode<synchronous>, transform_indices = @transform_3, window_bounds = array<i64: 4, 512>}, {pipeline_mode = #tpu.pipeline_mode<synchronous>, transform_indices = @transform_4, window_bounds = array<i64: 1, 512>}, {pipeline_mode = #tpu.pipeline_mode<synchronous>, transform_indices = @transform_5, window_bounds = array<i64: 2, 256, 128>}, {pipeline_mode = #tpu.pipeline_mode<synchronous>, transform_indices = @transform_6, window_bounds = array<i64: 2, 1, 128>}, {pipeline_mode = #tpu.pipeline_mode<synchronous>, transform_indices = @transform_7, window_bounds = array<i64: 2, 128, 512>}, {pipeline_mode = #tpu.pipeline_mode<synchronous>, transform_indices = @transform_8, window_bounds = array<i64: 2, 1, 512>}, {pipeline_mode = #tpu.pipeline_mode<synchronous>, transform_indices = @transform_9, window_bounds = array<i64: 9, 1024>}, {pipeline_mode = #tpu.pipeline_mode<synchronous>, transform_indices = @transform_10, window_bounds = array<i64: 2, 512, 512>}, {pipeline_mode = #tpu.pipeline_mode<synchronous>, transform_indices = @transform_11, window_bounds = array<i64: 2, 1, 512>}, {pipeline_mode = #tpu.pipeline_mode<synchronous>, transform_indices = @transform_12, window_bounds = array<i64: 2, 512, 384>}, {pipeline_mode = #tpu.pipeline_mode<synchronous>, transform_indices = @transform_13, window_bounds = array<i64: 2, 1, 384>}, {pipeline_mode = #tpu.pipeline_mode<synchronous>, transform_indices = @transform_14, window_bounds = array<i64: 2, 384, 128>}, {pipeline_mode = #tpu.pipeline_mode<synchronous>, transform_indices = @transform_15, window_bounds = array<i64: 2, 1, 128>}, {transform_indices = @transform_16, window_bounds = array<i64: 8, 256>}]} {
    %c0 = arith.constant 0 : index
    %c0_0 = arith.constant 0 : index
    %0 = vector.load %arg1[%c0, %c0_0] : memref<64x4xf32, #tpu.memory_space<vmem>>, vector<64x4xf32>
    %c0_1 = arith.constant 0 : index
    %c0_2 = arith.constant 0 : index
    %1 = vector.load %arg2[%c0_1, %c0_2] : memref<8x9xf32, #tpu.memory_space<vmem>>, vector<8x9xf32>
    %c0_3 = arith.constant 0 : index
    %c0_4 = arith.constant 0 : index
    %2 = vector.load %arg3[%c0_3, %c0_4] : memref<8x64xf32, #tpu.memory_space<vmem>>, vector<8x64xf32>
    %c0_5 = arith.constant 0 : index
    %c0_6 = arith.constant 0 : index
    %3 = vector.load %arg4[%c0_5, %c0_6] : memref<4x512xf32, #tpu.memory_space<vmem>>, vector<4x512xf32>
    %cst = arith.constant dense<0.000000e+00> : vector<64x512xf32>
    %4 = tpu.matmul %0, %3, %cst {dimension_numbers = #tpu.dot_dimension_numbers<[1], [0], [0], [1], [0, 0, 1, 1], [], []>} : vector<64x4xf32>, vector<4x512xf32>, vector<64x512xf32> -> vector<64x512xf32>
    %c0_7 = arith.constant 0 : index
    %c0_8 = arith.constant 0 : index
    %5 = vector.load %arg5[%c0_7, %c0_8] : memref<1x512xf32, #tpu.memory_space<vmem>>, vector<1x512xf32>
    %6 = vector.broadcast %5 : vector<1x512xf32> to vector<64x512xf32>
    %7 = arith.addf %4, %6 : vector<64x512xf32>
    %cst_9 = arith.constant 0.000000e+00 : f32
    %8 = vector.broadcast %cst_9 : f32 to vector<64x512xf32>
    %9 = arith.maximumf %7, %8 : vector<64x512xf32>
    %10 = arith.truncf %9 : vector<64x512xf32> to vector<64x512xbf16>
    %c0_10 = arith.constant 0 : index
    %c0_11 = arith.constant 0 : index
    %11 = vector.load %arg10[%c0_10, %c0_11] : memref<9x1024xf32, #tpu.memory_space<vmem>>, vector<9x1024xf32>
    %cst_12 = arith.constant dense<0.000000e+00> : vector<8x1024xf32>
    %12 = tpu.matmul %1, %11, %cst_12 {dimension_numbers = #tpu.dot_dimension_numbers<[1], [0], [0], [1], [0, 0, 1, 1], [], []>} : vector<8x9xf32>, vector<9x1024xf32>, vector<8x1024xf32> -> vector<8x1024xf32>
    %13 = vector.extract_strided_slice %10 {offsets = [0, 0], sizes = [64, 256], strides = [1, 1]} : vector<64x512xbf16> to vector<64x256xbf16>
    %c0_13 = arith.constant 0 : index
    %c0_14 = arith.constant 0 : index
    %c0_15 = arith.constant 0 : index
    %14 = vector.load %arg6[%c0_13, %c0_14, %c0_15] : memref<2x256x128xbf16, #tpu.memory_space<vmem>>, vector<1x256x128xbf16>
    %15 = vector.shape_cast %14 : vector<1x256x128xbf16> to vector<256x128xbf16>
    %cst_16 = arith.constant dense<0.000000e+00> : vector<64x128xf32>
    %16 = tpu.matmul %13, %15, %cst_16 {dimension_numbers = #tpu.dot_dimension_numbers<[1], [0], [0], [1], [0, 0, 1, 1], [], []>} : vector<64x256xbf16>, vector<256x128xbf16>, vector<64x128xf32> -> vector<64x128xf32>
    %c0_17 = arith.constant 0 : index
    %c0_18 = arith.constant 0 : index
    %c0_19 = arith.constant 0 : index
    %17 = vector.load %arg7[%c0_17, %c0_18, %c0_19] : memref<2x1x128xf32, #tpu.memory_space<vmem>>, vector<1x1x128xf32>
    %18 = vector.shape_cast %17 : vector<1x1x128xf32> to vector<1x128xf32>
    %19 = vector.broadcast %18 : vector<1x128xf32> to vector<64x128xf32>
    %20 = arith.addf %16, %19 : vector<64x128xf32>
    %cst_20 = arith.constant 0.000000e+00 : f32
    %21 = vector.broadcast %cst_20 : f32 to vector<64x128xf32>
    %22 = arith.maximumf %20, %21 : vector<64x128xf32>
    %cst_21 = arith.constant dense<0.000000e+00> : vector<8x128xf32>
    %23 = tpu.matmul %2, %22, %cst_21 {dimension_numbers = #tpu.dot_dimension_numbers<[1], [0], [0], [1], [0, 0, 1, 1], [], []>} : vector<8x64xf32>, vector<64x128xf32>, vector<8x128xf32> -> vector<8x128xf32>
    %c0_22 = arith.constant 0 : index
    %c0_23 = arith.constant 0 : index
    %c0_24 = arith.constant 0 : index
    %24 = vector.load %arg8[%c0_22, %c0_23, %c0_24] : memref<2x128x512xbf16, #tpu.memory_space<vmem>>, vector<1x128x512xbf16>
    %25 = vector.shape_cast %24 : vector<1x128x512xbf16> to vector<128x512xbf16>
    %26 = arith.truncf %23 : vector<8x128xf32> to vector<8x128xbf16>
    %cst_25 = arith.constant dense<0.000000e+00> : vector<8x512xf32>
    %27 = tpu.matmul %26, %25, %cst_25 {dimension_numbers = #tpu.dot_dimension_numbers<[1], [0], [0], [1], [0, 0, 1, 1], [], []>} : vector<8x128xbf16>, vector<128x512xbf16>, vector<8x512xf32> -> vector<8x512xf32>
    %28 = vector.extract_strided_slice %12 {offsets = [0, 0], sizes = [8, 512], strides = [1, 1]} : vector<8x1024xf32> to vector<8x512xf32>
    %29 = arith.addf %27, %28 : vector<8x512xf32>
    %c0_26 = arith.constant 0 : index
    %c0_27 = arith.constant 0 : index
    %c0_28 = arith.constant 0 : index
    %30 = vector.load %arg9[%c0_26, %c0_27, %c0_28] : memref<2x1x512xf32, #tpu.memory_space<vmem>>, vector<1x1x512xf32>
    %31 = vector.shape_cast %30 : vector<1x1x512xf32> to vector<1x512xf32>
    %32 = vector.broadcast %31 : vector<1x512xf32> to vector<8x512xf32>
    %33 = arith.addf %29, %32 : vector<8x512xf32>
    %cst_29 = arith.constant 0.000000e+00 : f32
    %34 = vector.broadcast %cst_29 : f32 to vector<8x512xf32>
    %35 = arith.maximumf %33, %34 : vector<8x512xf32>
    %c0_30 = arith.constant 0 : index
    %c0_31 = arith.constant 0 : index
    %c0_32 = arith.constant 0 : index
    %36 = vector.load %arg11[%c0_30, %c0_31, %c0_32] : memref<2x512x512xbf16, #tpu.memory_space<vmem>>, vector<1x512x512xbf16>
    %37 = vector.shape_cast %36 : vector<1x512x512xbf16> to vector<512x512xbf16>
    %38 = arith.truncf %35 : vector<8x512xf32> to vector<8x512xbf16>
    %cst_33 = arith.constant dense<0.000000e+00> : vector<8x512xf32>
    %39 = tpu.matmul %38, %37, %cst_33 {dimension_numbers = #tpu.dot_dimension_numbers<[1], [0], [0], [1], [0, 0, 1, 1], [], []>} : vector<8x512xbf16>, vector<512x512xbf16>, vector<8x512xf32> -> vector<8x512xf32>
    %c0_34 = arith.constant 0 : index
    %c0_35 = arith.constant 0 : index
    %c0_36 = arith.constant 0 : index
    %40 = vector.load %arg12[%c0_34, %c0_35, %c0_36] : memref<2x1x512xf32, #tpu.memory_space<vmem>>, vector<1x1x512xf32>
    %41 = vector.shape_cast %40 : vector<1x1x512xf32> to vector<1x512xf32>
    %42 = vector.broadcast %41 : vector<1x512xf32> to vector<8x512xf32>
    %43 = arith.addf %39, %42 : vector<8x512xf32>
    %cst_37 = arith.constant 0.000000e+00 : f32
    %44 = vector.broadcast %cst_37 : f32 to vector<8x512xf32>
    %45 = arith.maximumf %43, %44 : vector<8x512xf32>
    %c0_38 = arith.constant 0 : index
    %c0_39 = arith.constant 0 : index
    %c0_40 = arith.constant 0 : index
    %46 = vector.load %arg13[%c0_38, %c0_39, %c0_40] : memref<2x512x384xbf16, #tpu.memory_space<vmem>>, vector<1x512x384xbf16>
    %47 = vector.shape_cast %46 : vector<1x512x384xbf16> to vector<512x384xbf16>
    %48 = arith.truncf %45 : vector<8x512xf32> to vector<8x512xbf16>
    %cst_41 = arith.constant dense<0.000000e+00> : vector<8x384xf32>
    %49 = tpu.matmul %48, %47, %cst_41 {dimension_numbers = #tpu.dot_dimension_numbers<[1], [0], [0], [1], [0, 0, 1, 1], [], []>} : vector<8x512xbf16>, vector<512x384xbf16>, vector<8x384xf32> -> vector<8x384xf32>
    %c0_42 = arith.constant 0 : index
    %c0_43 = arith.constant 0 : index
    %c0_44 = arith.constant 0 : index
    %50 = vector.load %arg14[%c0_42, %c0_43, %c0_44] : memref<2x1x384xf32, #tpu.memory_space<vmem>>, vector<1x1x384xf32>
    %51 = vector.shape_cast %50 : vector<1x1x384xf32> to vector<1x384xf32>
    %52 = vector.broadcast %51 : vector<1x384xf32> to vector<8x384xf32>
    %53 = arith.addf %49, %52 : vector<8x384xf32>
    %cst_45 = arith.constant 0.000000e+00 : f32
    %54 = vector.broadcast %cst_45 : f32 to vector<8x384xf32>
    %55 = arith.maximumf %53, %54 : vector<8x384xf32>
    %c0_46 = arith.constant 0 : index
    %c0_47 = arith.constant 0 : index
    %c0_48 = arith.constant 0 : index
    %56 = vector.load %arg15[%c0_46, %c0_47, %c0_48] : memref<2x384x128xbf16, #tpu.memory_space<vmem>>, vector<1x384x128xbf16>
    %57 = vector.shape_cast %56 : vector<1x384x128xbf16> to vector<384x128xbf16>
    %58 = arith.truncf %55 : vector<8x384xf32> to vector<8x384xbf16>
    %cst_49 = arith.constant dense<0.000000e+00> : vector<8x128xf32>
    %59 = tpu.matmul %58, %57, %cst_49 {dimension_numbers = #tpu.dot_dimension_numbers<[1], [0], [0], [1], [0, 0, 1, 1], [], []>} : vector<8x384xbf16>, vector<384x128xbf16>, vector<8x128xf32> -> vector<8x128xf32>
    %c0_50 = arith.constant 0 : index
    %c0_51 = arith.constant 0 : index
    %c0_52 = arith.constant 0 : index
    %60 = vector.load %arg16[%c0_50, %c0_51, %c0_52] : memref<2x1x128xf32, #tpu.memory_space<vmem>>, vector<1x1x128xf32>
    %61 = vector.shape_cast %60 : vector<1x1x128xf32> to vector<1x128xf32>
    %62 = vector.broadcast %61 : vector<1x128xf32> to vector<8x128xf32>
    %63 = arith.addf %59, %62 : vector<8x128xf32>
    %c0_53 = arith.constant 0 : index
    %c0_54 = arith.constant 0 : index
    %64 = vector.load %arg17[%c0_53, %c0_54] : memref<8x256xf32, #tpu.memory_space<vmem>>, vector<8x128xf32>
    tpu.vector_store %arg17[%c0_53, %c0_54], %63 {strides = array<i32>} : memref<8x256xf32, #tpu.memory_space<vmem>>, vector<8x128xf32>,
    %65 = vector.extract_strided_slice %10 {offsets = [0, 256], sizes = [64, 256], strides = [1, 1]} : vector<64x512xbf16> to vector<64x256xbf16>
    %c1 = arith.constant 1 : index
    %c0_55 = arith.constant 0 : index
    %c0_56 = arith.constant 0 : index
    %66 = vector.load %arg6[%c1, %c0_55, %c0_56] : memref<2x256x128xbf16, #tpu.memory_space<vmem>>, vector<1x256x128xbf16>
    %67 = vector.shape_cast %66 : vector<1x256x128xbf16> to vector<256x128xbf16>
    %cst_57 = arith.constant dense<0.000000e+00> : vector<64x128xf32>
    %68 = tpu.matmul %65, %67, %cst_57 {dimension_numbers = #tpu.dot_dimension_numbers<[1], [0], [0], [1], [0, 0, 1, 1], [], []>} : vector<64x256xbf16>, vector<256x128xbf16>, vector<64x128xf32> -> vector<64x128xf32>
    %c1_58 = arith.constant 1 : index
    %c0_59 = arith.constant 0 : index
    %c0_60 = arith.constant 0 : index
    %69 = vector.load %arg7[%c1_58, %c0_59, %c0_60] : memref<2x1x128xf32, #tpu.memory_space<vmem>>, vector<1x1x128xf32>
    %70 = vector.shape_cast %69 : vector<1x1x128xf32> to vector<1x128xf32>
    %71 = vector.broadcast %70 : vector<1x128xf32> to vector<64x128xf32>
    %72 = arith.addf %68, %71 : vector<64x128xf32>
    %cst_61 = arith.constant 0.000000e+00 : f32
    %73 = vector.broadcast %cst_61 : f32 to vector<64x128xf32>
    %74 = arith.maximumf %72, %73 : vector<64x128xf32>
    %cst_62 = arith.constant dense<0.000000e+00> : vector<8x128xf32>
    %75 = tpu.matmul %2, %74, %cst_62 {dimension_numbers = #tpu.dot_dimension_numbers<[1], [0], [0], [1], [0, 0, 1, 1], [], []>} : vector<8x64xf32>, vector<64x128xf32>, vector<8x128xf32> -> vector<8x128xf32>
    %c1_63 = arith.constant 1 : index
    %c0_64 = arith.constant 0 : index
    %c0_65 = arith.constant 0 : index
    %76 = vector.load %arg8[%c1_63, %c0_64, %c0_65] : memref<2x128x512xbf16, #tpu.memory_space<vmem>>, vector<1x128x512xbf16>
    %77 = vector.shape_cast %76 : vector<1x128x512xbf16> to vector<128x512xbf16>
    %78 = arith.truncf %75 : vector<8x128xf32> to vector<8x128xbf16>
    %cst_66 = arith.constant dense<0.000000e+00> : vector<8x512xf32>
    %79 = tpu.matmul %78, %77, %cst_66 {dimension_numbers = #tpu.dot_dimension_numbers<[1], [0], [0], [1], [0, 0, 1, 1], [], []>} : vector<8x128xbf16>, vector<128x512xbf16>, vector<8x512xf32> -> vector<8x512xf32>
    %80 = vector.extract_strided_slice %12 {offsets = [0, 512], sizes = [8, 512], strides = [1, 1]} : vector<8x1024xf32> to vector<8x512xf32>
    %81 = arith.addf %79, %80 : vector<8x512xf32>
    %c1_67 = arith.constant 1 : index
    %c0_68 = arith.constant 0 : index
    %c0_69 = arith.constant 0 : index
    %82 = vector.load %arg9[%c1_67, %c0_68, %c0_69] : memref<2x1x512xf32, #tpu.memory_space<vmem>>, vector<1x1x512xf32>
    %83 = vector.shape_cast %82 : vector<1x1x512xf32> to vector<1x512xf32>
    %84 = vector.broadcast %83 : vector<1x512xf32> to vector<8x512xf32>
    %85 = arith.addf %81, %84 : vector<8x512xf32>
    %cst_70 = arith.constant 0.000000e+00 : f32
    %86 = vector.broadcast %cst_70 : f32 to vector<8x512xf32>
    %87 = arith.maximumf %85, %86 : vector<8x512xf32>
    %c1_71 = arith.constant 1 : index
    %c0_72 = arith.constant 0 : index
    %c0_73 = arith.constant 0 : index
    %88 = vector.load %arg11[%c1_71, %c0_72, %c0_73] : memref<2x512x512xbf16, #tpu.memory_space<vmem>>, vector<1x512x512xbf16>
    %89 = vector.shape_cast %88 : vector<1x512x512xbf16> to vector<512x512xbf16>
    %90 = arith.truncf %87 : vector<8x512xf32> to vector<8x512xbf16>
    %cst_74 = arith.constant dense<0.000000e+00> : vector<8x512xf32>
    %91 = tpu.matmul %90, %89, %cst_74 {dimension_numbers = #tpu.dot_dimension_numbers<[1], [0], [0], [1], [0, 0, 1, 1], [], []>} : vector<8x512xbf16>, vector<512x512xbf16>, vector<8x512xf32> -> vector<8x512xf32>
    %c1_75 = arith.constant 1 : index
    %c0_76 = arith.constant 0 : index
    %c0_77 = arith.constant 0 : index
    %92 = vector.load %arg12[%c1_75, %c0_76, %c0_77] : memref<2x1x512xf32, #tpu.memory_space<vmem>>, vector<1x1x512xf32>
    %93 = vector.shape_cast %92 : vector<1x1x512xf32> to vector<1x512xf32>
    %94 = vector.broadcast %93 : vector<1x512xf32> to vector<8x512xf32>
    %95 = arith.addf %91, %94 : vector<8x512xf32>
    %cst_78 = arith.constant 0.000000e+00 : f32
    %96 = vector.broadcast %cst_78 : f32 to vector<8x512xf32>
    %97 = arith.maximumf %95, %96 : vector<8x512xf32>
    %c1_79 = arith.constant 1 : index
    %c0_80 = arith.constant 0 : index
    %c0_81 = arith.constant 0 : index
    %98 = vector.load %arg13[%c1_79, %c0_80, %c0_81] : memref<2x512x384xbf16, #tpu.memory_space<vmem>>, vector<1x512x384xbf16>
    %99 = vector.shape_cast %98 : vector<1x512x384xbf16> to vector<512x384xbf16>
    %100 = arith.truncf %97 : vector<8x512xf32> to vector<8x512xbf16>
    %cst_82 = arith.constant dense<0.000000e+00> : vector<8x384xf32>
    %101 = tpu.matmul %100, %99, %cst_82 {dimension_numbers = #tpu.dot_dimension_numbers<[1], [0], [0], [1], [0, 0, 1, 1], [], []>} : vector<8x512xbf16>, vector<512x384xbf16>, vector<8x384xf32> -> vector<8x384xf32>
    %c1_83 = arith.constant 1 : index
    %c0_84 = arith.constant 0 : index
    %c0_85 = arith.constant 0 : index
    %102 = vector.load %arg14[%c1_83, %c0_84, %c0_85] : memref<2x1x384xf32, #tpu.memory_space<vmem>>, vector<1x1x384xf32>
    %103 = vector.shape_cast %102 : vector<1x1x384xf32> to vector<1x384xf32>
    %104 = vector.broadcast %103 : vector<1x384xf32> to vector<8x384xf32>
    %105 = arith.addf %101, %104 : vector<8x384xf32>
    %cst_86 = arith.constant 0.000000e+00 : f32
    %106 = vector.broadcast %cst_86 : f32 to vector<8x384xf32>
    %107 = arith.maximumf %105, %106 : vector<8x384xf32>
    %c1_87 = arith.constant 1 : index
    %c0_88 = arith.constant 0 : index
    %c0_89 = arith.constant 0 : index
    %108 = vector.load %arg15[%c1_87, %c0_88, %c0_89] : memref<2x384x128xbf16, #tpu.memory_space<vmem>>, vector<1x384x128xbf16>
    %109 = vector.shape_cast %108 : vector<1x384x128xbf16> to vector<384x128xbf16>
    %110 = arith.truncf %107 : vector<8x384xf32> to vector<8x384xbf16>
    %cst_90 = arith.constant dense<0.000000e+00> : vector<8x128xf32>
    %111 = tpu.matmul %110, %109, %cst_90 {dimension_numbers = #tpu.dot_dimension_numbers<[1], [0], [0], [1], [0, 0, 1, 1], [], []>} : vector<8x384xbf16>, vector<384x128xbf16>, vector<8x128xf32> -> vector<8x128xf32>
    %c1_91 = arith.constant 1 : index
    %c0_92 = arith.constant 0 : index
    %c0_93 = arith.constant 0 : index
    %112 = vector.load %arg16[%c1_91, %c0_92, %c0_93] : memref<2x1x128xf32, #tpu.memory_space<vmem>>, vector<1x1x128xf32>
    %113 = vector.shape_cast %112 : vector<1x1x128xf32> to vector<1x128xf32>
    %114 = vector.broadcast %113 : vector<1x128xf32> to vector<8x128xf32>
    %115 = arith.addf %111, %114 : vector<8x128xf32>
    %c0_94 = arith.constant 0 : index
    %c128 = arith.constant 128 : index
    %116 = vector.load %arg17[%c0_94, %c128] : memref<8x256xf32, #tpu.memory_space<vmem>>, vector<8x128xf32>
    tpu.vector_store %arg17[%c0_94, %c128], %115 {strides = array<i32>} : memref<8x256xf32, #tpu.memory_space<vmem>>, vector<8x128xf32>,
    return
  }
  func.func @transform_0(%arg0: i32) -> (i32, i32) {
    %c0_i32 = arith.constant 0 : i32
    %c0_i32_0 = arith.constant 0 : i32
    return %arg0, %c0_i32 : i32, i32
  }
  func.func @transform_1(%arg0: i32) -> (i32, i32) {
    %c0_i32 = arith.constant 0 : i32
    %c0_i32_0 = arith.constant 0 : i32
    return %arg0, %c0_i32 : i32, i32
  }
  func.func @transform_2(%arg0: i32) -> (i32, i32) {
    %c0_i32 = arith.constant 0 : i32
    %c0_i32_0 = arith.constant 0 : i32
    %c0_i32_1 = arith.constant 0 : i32
    return %c0_i32, %c0_i32_0 : i32, i32
  }
  func.func @transform_3(%arg0: i32) -> (i32, i32) {
    %c0_i32 = arith.constant 0 : i32
    %c0_i32_0 = arith.constant 0 : i32
    %c0_i32_1 = arith.constant 0 : i32
    return %c0_i32, %c0_i32_0 : i32, i32
  }
  func.func @transform_4(%arg0: i32) -> (i32, i32) {
    %c0_i32 = arith.constant 0 : i32
    %c0_i32_0 = arith.constant 0 : i32
    %c0_i32_1 = arith.constant 0 : i32
    return %c0_i32, %c0_i32_0 : i32, i32
  }
  func.func @transform_5(%arg0: i32) -> (i32, i32, i32) {
    %c0_i32 = arith.constant 0 : i32
    %c0_i32_0 = arith.constant 0 : i32
    %c0_i32_1 = arith.constant 0 : i32
    %c0_i32_2 = arith.constant 0 : i32
    return %c0_i32, %c0_i32_0, %c0_i32_1 : i32, i32, i32
  }
  func.func @transform_6(%arg0: i32) -> (i32, i32, i32) {
    %c0_i32 = arith.constant 0 : i32
    %c0_i32_0 = arith.constant 0 : i32
    %c0_i32_1 = arith.constant 0 : i32
    %c0_i32_2 = arith.constant 0 : i32
    return %c0_i32, %c0_i32_0, %c0_i32_1 : i32, i32, i32
  }
  func.func @transform_7(%arg0: i32) -> (i32, i32, i32) {
    %c0_i32 = arith.constant 0 : i32
    %c0_i32_0 = arith.constant 0 : i32
    %c0_i32_1 = arith.constant 0 : i32
    %c0_i32_2 = arith.constant 0 : i32
    return %c0_i32, %c0_i32_0, %c0_i32_1 : i32, i32, i32
  }
  func.func @transform_8(%arg0: i32) -> (i32, i32, i32) {
    %c0_i32 = arith.constant 0 : i32
    %c0_i32_0 = arith.constant 0 : i32
    %c0_i32_1 = arith.constant 0 : i32
    %c0_i32_2 = arith.constant 0 : i32
    return %c0_i32, %c0_i32_0, %c0_i32_1 : i32, i32, i32
  }
  func.func @transform_9(%arg0: i32) -> (i32, i32) {
    %c0_i32 = arith.constant 0 : i32
    %c0_i32_0 = arith.constant 0 : i32
    %c0_i32_1 = arith.constant 0 : i32
    return %c0_i32, %c0_i32_0 : i32, i32
  }
  func.func @transform_10(%arg0: i32) -> (i32, i32, i32) {
    %c0_i32 = arith.constant 0 : i32
    %c0_i32_0 = arith.constant 0 : i32
    %c0_i32_1 = arith.constant 0 : i32
    %c0_i32_2 = arith.constant 0 : i32
    return %c0_i32, %c0_i32_0, %c0_i32_1 : i32, i32, i32
  }
  func.func @transform_11(%arg0: i32) -> (i32, i32, i32) {
    %c0_i32 = arith.constant 0 : i32
    %c0_i32_0 = arith.constant 0 : i32
    %c0_i32_1 = arith.constant 0 : i32
    %c0_i32_2 = arith.constant 0 : i32
    return %c0_i32, %c0_i32_0, %c0_i32_1 : i32, i32, i32
  }
  func.func @transform_12(%arg0: i32) -> (i32, i32, i32) {
    %c0_i32 = arith.constant 0 : i32
    %c0_i32_0 = arith.constant 0 : i32
    %c0_i32_1 = arith.constant 0 : i32
    %c0_i32_2 = arith.constant 0 : i32
    return %c0_i32, %c0_i32_0, %c0_i32_1 : i32, i32, i32
  }
  func.func @transform_13(%arg0: i32) -> (i32, i32, i32) {
    %c0_i32 = arith.constant 0 : i32
    %c0_i32_0 = arith.constant 0 : i32
    %c0_i32_1 = arith.constant 0 : i32
    %c0_i32_2 = arith.constant 0 : i32
    return %c0_i32, %c0_i32_0, %c0_i32_1 : i32, i32, i32
  }
  func.func @transform_14(%arg0: i32) -> (i32, i32, i32) {
    %c0_i32 = arith.constant 0 : i32
    %c0_i32_0 = arith.constant 0 : i32
    %c0_i32_1 = arith.constant 0 : i32
    %c0_i32_2 = arith.constant 0 : i32
    return %c0_i32, %c0_i32_0, %c0_i32_1 : i32, i32, i32
  }
  func.func @transform_15(%arg0: i32) -> (i32, i32, i32) {
    %c0_i32 = arith.constant 0 : i32
    %c0_i32_0 = arith.constant 0 : i32
    %c0_i32_1 = arith.constant 0 : i32
    %c0_i32_2 = arith.constant 0 : i32
    return %c0_i32, %c0_i32_0, %c0_i32_1 : i32, i32, i32
  }
  func.func @transform_16(%arg0: i32) -> (i32, i32) {
    %c0_i32 = arith.constant 0 : i32
    %c0_i32_0 = arith.constant 0 : i32
    return %arg0, %c0_i32 : i32, i32
  }
}

</mosaic_0001>

<bundles_post_ra>
// kernel: critic_forward_fused.1
= control target key start
LH: loop header
LB: loop body
LE: loop exit
PB: predicated region body
PF: predicated region fallthrough
CT: control target
= control target key end

     0   :  { %s9655_s0 = inlined_call_operand.vmem [shape: f32[128,4], index: 0, kind: input, shape index: {}]   ;;  %s9656_s1 = inlined_call_operand.vmem [shape: f32[16,9], index: 1, kind: input, shape index: {}]   ;;  %s9657_s2 = inlined_call_operand.vmem [shape: f32[8,64], index: 2, kind: input, shape index: {}]   ;;  %s9658_s3 = inlined_call_operand.vmem [shape: f32[4,512], index: 3, kind: input, shape index: {}]   ;;  %s9659_s4 = inlined_call_operand.vmem [shape: f32[1,512], index: 4, kind: input, shape index: {}]   ;;  %s9660_s5 = inlined_call_operand.hbm [shape: bf16[2,256,128], index: 5, kind: input, shape index: {}]   ;;  %s9661_s6 = inlined_call_operand.vmem [shape: f32[2,1,128], index: 6, kind: input, shape index: {}]   ;;  %s9662_s7 = inlined_call_operand.hbm [shape: bf16[2,128,512], index: 7, kind: input, shape index: {}]   ;;  %s9663_s8 = inlined_call_operand.vmem [shape: f32[2,1,512], index: 8, kind: input, shape index: {}]   ;;  %s9664_s9 = inlined_call_operand.hbm [shape: f32[9,1024], index: 9, kind: input, shape index: {}]   ;;  %s9665_s10 = inlined_call_operand.hbm [shape: bf16[2,512,512], index: 10, kind: input, shape index: {}]   ;;  %s9666_s11 = inlined_call_operand.vmem [shape: f32[2,1,512], index: 11, kind: input, shape index: {}]   ;;  %s9667_s12 = inlined_call_operand.hbm [shape: bf16[2,512,384], index: 12, kind: input, shape index: {}]   ;;  %s9668_s13 = inlined_call_operand.vmem [shape: f32[2,1,384], index: 13, kind: input, shape index: {}]   ;;  %s9669_s14 = inlined_call_operand.vmem [shape: bf16[2,384,128], index: 14, kind: input, shape index: {}]   ;;  %s9670_s15 = inlined_call_operand.vmem [shape: f32[2,1,128], index: 15, kind: input, shape index: {}]   ;;  %s9671_s16 = inlined_call_operand.vmem [shape: f32[16,256], index: 16, kind: output, shape index: {}]  }
   0x1   :  { %9677 = sst [smem:[#allocation14_spill]] %s9655_s0 }
   0x2   :  { %9678 = sst [smem:[#allocation15_spill]] %s9662_s7 }
   0x3   :  { %9679 = sst [smem:[#allocation16_spill]] %s9665_s10 }
   0x4   :  { %9680 = sst [smem:[#allocation17_spill]] %s9668_s13 }
   0x5   :  { %9681 = sst [smem:[#allocation18_spill]] %s9670_s15 }
   0x6   :  { %9682 = sst [smem:[#allocation19_spill]] %s9671_s16 }
   0x7   :  { %21 = vsyncpa [#allocation3], 0 }
   0x8   :  { %22 = vsyncpa [#allocation5], 0 }
   0x9   :  { %23 = vsyncpa [#allocation8], 0  ;;  %s8998_s21 = smov 0  }
   0xa LB: > { %9683 = sst [smem:[#allocation13_spill]] %s8894_s21  ;;  %s8896_s22 = smov [#allocation4]   ;;  %s8894_s21 = sphi %s8998_s21, %s29_s21  }
   0xb   : > { %s443_s23 = sshll.u32 %s8896_s22, 4  ;;  %s9004_s24 = sadd.s32 4294967295, %s8894_s21   ;;  %s9009_s23 = int_to_ptr.vmem [resolvable:$true] %s443_s23 }
   0xc   : > { %p6731_p0 = scmp.ge.s32.totalorder %s8894_s21, 1  ;;  %p406_p1 = scmp.lt.s32.totalorder %s8894_s21, 3 }
   0xd   : > { %p9675_p2 = scmp.eq.s32.totalorder %s9004_s24, 0  ;;  %s8897_s26 = smov [#allocation7]  }
   0xe   : > { %p9011_p3 = pnand %p6731_p0, %p406_p1  ;;  %s472_s27 = sshll.u32 %s8897_s26, 4  ;;  %s9017_s27 = int_to_ptr.vmem [resolvable:$true] %s472_s27 }
   0xf   : > { %s8898_s29 = smov [#allocation2]   ;;  %s9686_s7 = sld [smem:[#allocation15_spill]] }
  0x10   : > { %s9684_s25 = scalar_select %p9011_p3, 1, 0 }
  0x11   : > { %p7865_p4 = pneg %p9011_p3  ;;  %s427_s30 = sshll.u32 %s8898_s29, 4  ;;  %s9025_s30 = int_to_ptr.vmem [resolvable:$true] %s427_s30 }
  0x13   : > { %p9021_p5 = pnand %p9675_p2, %p7865_p4 }
  0x15   : > { %s8736_s18 = scalar_lea.hbm %s9686_s7, 8192  ;;  %p9035_p7 = pneg %p9021_p5 }
  0x16   : > { %p8737_p6 = scmp.ne.s32.totalorder %s9686_s7, %s8736_s18  ;;  %p8743_p10 = scmp.lt.u32.totalorder %s8736_s18, %s9686_s7 }
  0x18   : > { %p8739_p8 = pnand %p9035_p7, %p8737_p6 }
  0x1a   : > { %p8740_p9 = pneg %p8739_p8 }
  0x1c   : > { %p8745_p11 = pnand %p8743_p10, %p8740_p9 }
  0x1e   : > { %8748 = shalt.err (!%p8745_p11)
}
  0x1f   : > { %s8749_s0 = scalar_lea.vmem %s9009_s23, 8192  ;;  %p8757_p1 = scmp.lt.s32.totalorder %s9009_s23, %s9009_s23 }
  0x20   : > { %p8750_p12 = scmp.ne.s32.totalorder %s9009_s23, %s8749_s0  ;;  %p8758_p4 = scmp.lt.s32.totalorder %s8749_s0, %s8749_s0 }
  0x22   : > { %p8752_p13 = pnand %p8750_p12, %p9035_p7  ;;  %p8759_p6 = por %p8758_p4, %p8757_p1 }
  0x24   : > { %p8753_p0 = pneg %p8752_p13 }
  0x26   : > { %p8760_p8 = pnand %p8759_p6, %p8753_p0 }
  0x28   : > { %8763 = shalt.err (!%p8760_p8)
}
  0x29   : > { %s8899_s17 = smov 256   ;;  %s8900_s18 = smov 16  }
  0x2a   : > { %7871 = dma.hbm_to_vmem [thread:$0]  (!%p9021_p5), %s9686_s7, 8192, %s9009_s23, [#allocation5], %s8899_s17, %s8899_s17, %s8900_s18  }
  0x2b   : > { %s9688_s10 = sld [smem:[#allocation16_spill]] }
  0x31   : > { %s8764_s21 = scalar_lea.hbm %s9688_s10, 32768 }
  0x32   : > { %p8765_p9 = scmp.ne.s32.totalorder %s9688_s10, %s8764_s21  ;;  %p8771_p12 = scmp.lt.u32.totalorder %s8764_s21, %s9688_s10 }
  0x34   : > { %p8767_p10 = pnand %p8765_p9, %p9035_p7 }
  0x36   : > { %p8768_p11 = pneg %p8767_p10 }
  0x38   : > { %p8773_p13 = pnand %p8771_p12, %p8768_p11 }
  0x3a   : > { %8776 = shalt.err (!%p8773_p13)
}
  0x3b   : > { %s8777_s23 = scalar_lea.vmem %s9017_s27, 32768  ;;  %p8785_p6 = scmp.lt.s32.totalorder %s9017_s27, %s9017_s27 }
  0x3c   : > { %p8778_p0 = scmp.ne.s32.totalorder %s9017_s27, %s8777_s23  ;;  %p8786_p8 = scmp.lt.s32.totalorder %s8777_s23, %s8777_s23 }
  0x3e   : > { %p8780_p1 = pnand %p8778_p0, %p9035_p7  ;;  %p8787_p9 = por %p8786_p8, %p8785_p6 }
  0x40   : > { %p8781_p4 = pneg %p8780_p1 }
  0x42   : > { %p8788_p10 = pnand %p8787_p9, %p8781_p4 }
  0x44   : > { %8791 = shalt.err (!%p8788_p10)
}
  0x45   : > { %7877 = dma.hbm_to_vmem [thread:$0]  (!%p9021_p5), %s9688_s10, 32768, %s9017_s27, [#allocation8], %s8899_s17, %s8899_s17, %s8900_s18  }
  0x46   : > { %s8792_s19 = scalar_lea.hbm %s9660_s5, 4096 }
  0x47   : > { %p8793_p11 = scmp.ne.s32.totalorder %s9660_s5, %s8792_s19  ;;  %p8799_p0 = scmp.lt.u32.totalorder %s8792_s19, %s9660_s5 }
  0x49   : > { %p8795_p12 = pnand %p8793_p11, %p9035_p7 }
  0x4b   : > { %p8796_p13 = pneg %p8795_p12 }
  0x4d   : > { %p8801_p1 = pnand %p8799_p0, %p8796_p13 }
  0x4f   : > { %8804 = shalt.err (!%p8801_p1)
}
  0x50   : > { %s8805_s27 = scalar_lea.vmem %s9025_s30, 4096  ;;  %p8813_p9 = scmp.lt.s32.totalorder %s9025_s30, %s9025_s30 }
  0x51   : > { %p8806_p4 = scmp.ne.s32.totalorder %s9025_s30, %s8805_s27  ;;  %p8814_p10 = scmp.lt.s32.totalorder %s8805_s27, %s8805_s27 }
  0x53   : > { %p8808_p6 = pnand %p8806_p4, %p9035_p7  ;;  %p8815_p11 = por %p8814_p10, %p8813_p9 }
  0x55   : > { %p8809_p8 = pneg %p8808_p6 }
  0x57   : > { %p8816_p12 = pnand %p8815_p11, %p8809_p8 }
  0x59   : > { %8819 = shalt.err (!%p8816_p12)
}
  0x5a   : > { %s8901_s17 = smov 64   ;;  %s8902_s18 = smov 4  }
  0x5b   : > { %7868 = dma.hbm_to_vmem [thread:$0]  (!%p9021_p5), %s9660_s5, 4096, %s9025_s30, [#allocation3], %s8901_s17, %s8901_s17, %s8902_s18  }
  0x5c   : > { %s8903_s15 = smov [#allocation6]   ;;  %s8904_s21 = smov [#allocation9]  }
  0x5d   : > { %s459_s16 = sshll.u32 %s8903_s15, 4  ;;  %s488_s19 = sshll.u32 %s8904_s21, 4  ;;  %s460_s16 = int_to_ptr.vmem [resolvable:$true] %s459_s16  ;;  %s489_s19 = int_to_ptr.vmem [resolvable:$true] %s488_s19 }
  0x5e   : > { %s8820_s29 = scalar_lea.hbm %s9664_s9, 2048 }
  0x5f   : > { %p8821_p13 = scmp.ne.s32.totalorder %s9664_s9, %s8820_s29  ;;  %p8827_p4 = scmp.lt.u32.totalorder %s8820_s29, %s9664_s9 }
  0x61   : > { %p8823_p0 = pnand %p8821_p13, %p9035_p7 }
  0x63   : > { %p8824_p1 = pneg %p8823_p0 }
  0x65   : > { %p8829_p6 = pnand %p8827_p4, %p8824_p1 }
  0x67   : > { %8832 = shalt.err (!%p8829_p6)
}
  0x68   : > { %s8833_s30 = scalar_lea.vmem %s460_s16, 2048  ;;  %p8841_p11 = scmp.lt.s32.totalorder %s460_s16, %s460_s16 }
  0x69   : > { %p8834_p8 = scmp.ne.s32.totalorder %s460_s16, %s8833_s30  ;;  %p8842_p12 = scmp.lt.s32.totalorder %s8833_s30, %s8833_s30 }
  0x6b   : > { %p8836_p9 = pnand %p8834_p8, %p9035_p7  ;;  %p8843_p2 = por %p8842_p12, %p8841_p11 }
  0x6d   : > { %p8837_p10 = pneg %p8836_p9 }
  0x6f   : > { %p8844_p3 = pnand %p8843_p2, %p8837_p10 }
  0x71   : > { %8847 = shalt.err (!%p8844_p3)
}
  0x72   : > { %s8905_s18 = smov 1024   ;;  %s8848_s15 = scalar_lea.hbm %s9667_s12, 24576 }
  0x73   : > { %7874 = dma.hbm_to_vmem [thread:$0]  (!%p9021_p5), %s9664_s9, 2048, %s460_s16, [#allocation5], %s8905_s18, %s8905_s18, %s8901_s17  }
  0x74   : > { %p8849_p13 = scmp.ne.s32.totalorder %s9667_s12, %s8848_s15  ;;  %p8855_p0 = scmp.lt.u32.totalorder %s8848_s15, %s9667_s12 }
  0x76   : > { %p8851_p2 = pnand %p8849_p13, %p9035_p7 }
  0x78   : > { %p8852_p3 = pneg %p8851_p2 }
  0x7a   : > { %p8857_p1 = pnand %p8855_p0, %p8852_p3 }
  0x7c   : > { %8860 = shalt.err (!%p8857_p1)
}
  0x7d   : > { %s8861_s0 = scalar_lea.vmem %s489_s19, 24576  ;;  %p8869_p9 = scmp.lt.s32.totalorder %s489_s19, %s489_s19 }
  0x7e   : > { %p8862_p4 = scmp.ne.s32.totalorder %s489_s19, %s8861_s0  ;;  %p8870_p10 = scmp.lt.s32.totalorder %s8861_s0, %s8861_s0 }
  0x80   : > { %p8864_p6 = pnand %p8862_p4, %p9035_p7  ;;  %p8871_p11 = por %p8870_p10, %p8869_p9 }
  0x82   : > { %p8865_p8 = pneg %p8864_p6 }
  0x84   : > { %p8872_p12 = pnand %p8871_p11, %p8865_p8 }
  0x86   : > { %8875 = shalt.err (!%p8872_p12)
}
  0x87   : > { %s8906_s17 = smov 192   ;;  %s8907_s16 = smov 12  }
  0x88   : > { %7880 = dma.hbm_to_vmem [thread:$0]  (!%p9021_p5), %s9667_s12, 24576, %s489_s19, [#allocation8], %s8906_s17, %s8906_s17, %s8907_s16  }
  0x89   : > { %p9689_p13 = scmp.ne.s32.totalorder %s9684_s25, 0 }
  0x8a   : > { %p9690_p2 = scmp.eq.s32.totalorder (!%p9689_p13), %s9004_s24, 0 }
  0x8b   : > { %529 = sbr.rel (%p9689_p13) target bundleno = 2953 (0xb89), region = 84 }
  0x92   : > { %8881 = dma.done.wait (%p9690_p2), [#allocation3], 4096   ;;  %p9691_p7 = pmov %p9690_p2 }
  0x93   : > { %p9692_p3 = pmov %p9690_p2 }
  0x94   : > { %8883 = vsyncadd (%p9691_p7), [#allocation3], 4294963200 }
  0x95   : > { %8885 = dma.done.wait (%p9692_p3), [#allocation5], 10240   ;;  %p9693_p0 = pmov %p9690_p2 }
  0x97   : > { %8887 = vsyncadd (%p9693_p0), [#allocation5], 4294957056  ;;  %p9694_p1 = pmov %p9693_p0 }
  0x98   : > { %p9695_p5 = pmov %p9693_p0 }
  0x99   : > { %8889 = dma.done.wait (%p9694_p1), [#allocation8], 57344  }
  0x9a   : > { %8891 = vsyncadd (%p9695_p5), [#allocation8], 4294909952  ;;  %s6744_s25 = sshll.u32 %s9004_s24, 3  ;;  %v8908_v0 = vmov 0.0   ;;  %s9696_s18 = sld [smem:[#allocation14_spill]]  ;;  %vm981_vm0 = vcmask 1040384   ;;  %v629_v49 = vlaneseq }
  0x9b   : > { %751 = vmatprep.mubr.f32.mxu0 %v8908_v0  ;;  %p600_p4 = scmp.lt.s32.totalorder %s6744_s25, 15  ;;  %864 = vmatprep.mubr.f32.mxu1 %v8908_v0  ;;  %v625_v1 = vld [vmem:[%s9658_s3] sm:$0xff]  ;;  %vm678_vm1 = vcmask 1043456   ;;  %vm653_vm2 = vcmask 31744   ;;  %vm8909_vm3 = vmmov 1   ;;  %v962_v5 = vld [vmem:[#allocation6 + $0x8] sm:$0xff] }
  0x9c   : > { %v651_v2 = vcombine.high %v625_v1, %v625_v1  ;;  %vm9166_vm4 = vmpackc.low %vm981_vm0, %vm8909_vm3  ;;  %v970_v6 = vld [vmem:[#allocation6 + $0x48] sm:$0x1]  ;;  %v961_v7 = vld [vmem:[#allocation6] sm:$0xff]  ;;  %p605_p6 = scmp.lt.s32.totalorder %s9004_s24, 1  ;;  %vm977_vm5 = vcmask 72704   ;;  %v9279_v50 = vshrl.u32 %v629_v49, 7 }
  0x9d   : > { %s9704_s25 = smov (!%p600_p4, %s6744_s25), 15  ;;  %v7761_v8 = vpack.c.bf16 %v970_v6, %v962_v5  ;;  %v969_v9 = vld [vmem:[#allocation6 + $0x40] sm:$0x1]  ;;  %v966_v10 = vld [vmem:[#allocation6 + $0x28] sm:$0xff]  ;;  %v7921_v29 = vld [vmem:[#allocation2 + $0x50] sm:$0xff]   ;;  %vm8911_vm6 = vmmov 0  }
  0x9e   : > { %s6745_s28 = sshll.u32 %s9704_s25, 3  ;;  %6749 = vmatprep.subr.msk.mxu0 %vm678_vm1, %v651_v2  ;;  %v7764_v11 = vpack.c.bf16 %v969_v9, %v961_v7  ;;  %v974_v12 = vld [vmem:[#allocation6 + $0x68] sm:$0x1]  ;;  %s9706_s24 = smov (!%p605_p6, %s9004_s24), 1  ;;  %v965_v21 = vld [vmem:[#allocation6 + $0x20] sm:$0xff]  ;;  %v7922_v30 = vld [vmem:[#allocation2 + $0x10] sm:$0xff]  }
  0x9f   : > { %6750 = vmatpush1.msk.msra.mxu0 %vm678_vm1, %v625_v1  ;;  %v7773_v14 = vpack.c.bf16 %v974_v12, %v966_v10  ;;  %s6746_s10 = sshll.u32 %s9706_s24, 3  ;;  %v973_v22 = vld [vmem:[#allocation6 + $0x60] sm:$0x1]  ;;  %v7919_v27 = vld [vmem:[#allocation2 + $0x48] sm:$0xff]   ;;  %v7923_v31 = vld [vmem:[#allocation2 + $0x58] sm:$0xff]   ;;  %v9287_v52 = vsub.s32 0, %v9279_v50 }
  0xa0   : > { %s9158_s23 = scalar_lea.vmem %s9696_s18, %s6745_s28  ;;  %7763 = vmatprep.subr.msk.bf16.mxu0 %vm9166_vm4, %v7761_v8  ;;  %s9227_s20 = scalar_lea.vmem %s9656_s1, %s6746_s10  ;;  %v7917_v24 = vld [vmem:[#allocation2 + $0x40] sm:$0xff]   ;;  %v7776_v25 = vpack.c.bf16 %v973_v22, %v965_v21  ;;  %v7920_v28 = vld [vmem:[#allocation2 + $0x8] sm:$0xff]   ;;  %v7924_v32 = vld [vmem:[#allocation2 + $0x18] sm:$0xff]   ;;  %v9290_v53 = vsub.s32 1, %v9279_v50  ;;  %vm1498_vm7 = vcmask 523264  }
  0xa1   : > { %v9164_v3 = vld [vmem:[%s9158_s23] sm:$0xff]  ;;  %v9176_v13 = vld [vmem:[%s9158_s23 + $0x8] sm:$0xff]  ;;  %v9188_v15 = vld [vmem:[%s9158_s23 + $0x10] sm:$0xff]  ;;  %s9699_s28 = sld [smem:[#allocation17_spill]]  ;;  %s9700_s13 = sld [smem:[#allocation18_spill]] }
  0xa2   : > { %6751 = vmatmul.mubr.msk.f32.vlgmr.msra.gmra.mrb[0].mxu0 %vm653_vm2, %v9164_v3  ;;  %v9194_v16 = vld [vmem:[%s9158_s23 + $0x18] sm:$0xff]  ;;  %v9197_v17 = vld [vmem:[%s9158_s23 + $0x20] sm:$0xff]  ;;  %v9204_v18 = vld [vmem:[%s9158_s23 + $0x28] sm:$0xff]  ;;  %s7434_s7 = sshll.u32 %s9706_s24, 4  ;;  %s9701_s21 = sld [smem:[#allocation19_spill]] }
  0xa3   : > { %757 = vmatprep.mubr.f32.mxu0 %v8908_v0  ;;  %7766 = vmatpush1.bf16.msk.msra.mxu0 %vm9166_vm4, %v7764_v11  ;;  %v9213_v19 = vld [vmem:[%s9158_s23 + $0x30] sm:$0xff]  ;;  %v9220_v20 = vld [vmem:[%s9158_s23 + $0x38] sm:$0xff]  ;;  %v9231_v23 = vld [vmem:[%s9227_s20] sm:$0xff] }
  0xa4   : > { %7775 = vmatprep.subr.msk.bf16.mxu0 %vm9166_vm4, %v7773_v14  ;;  %v7918_v26 = vld [vmem:[#allocation2] sm:$0xff]   ;;  %v7927_v35 = vld [vmem:[#allocation2 + $0x68] sm:$0xff]   ;;  %v7929_v37 = vld [vmem:[#allocation2 + $0x70] sm:$0xff]  }
  0xa5   : > { %v7925_v33 = vld [vmem:[#allocation2 + $0x60] sm:$0xff]   ;;  %v7928_v36 = vld [vmem:[#allocation2 + $0x28] sm:$0xff]   ;;  %v7930_v38 = vld [vmem:[#allocation2 + $0x30] sm:$0xff]  }
  0xa6   : > { %6752 = vmatmul.mubr.msk.f32.gmra.mrb[2].mxu0 %vm653_vm2, %v9176_v13  ;;  %v7926_v34 = vld [vmem:[#allocation2 + $0x20] sm:$0xff]   ;;  %v7931_v39 = vld [vmem:[#allocation2 + $0x78] sm:$0xff]   ;;  %v626_v41 = vld [vmem:[%s9658_s3 + $0x8] sm:$0xff] }
  0xa7   : > { %763 = vmatprep.mubr.f32.mxu0 %v8908_v0  ;;  %v7932_v40 = vld [vmem:[#allocation2 + $0x38] sm:$0xff]   ;;  %v652_v44 = vcombine.high %v626_v41, %v626_v41  ;;  %v963_v46 = vld [vmem:[#allocation6 + $0x10] sm:$0xff]  ;;  %v9284_v51 = vld [vmem:[%s9659_s4] sm:$0xf] }
  0xa8   : > { %v964_v42 = vld [vmem:[#allocation6 + $0x18] sm:$0xff]  ;;  %v971_v47 = vld [vmem:[#allocation6 + $0x50] sm:$0x1]  ;;  %v632_v54 = vrot.slane %v9284_v51, %v9287_v52  ;;  %v636_v55 = vrot.slane %v9284_v51, %v9290_v53 }
  0xa9   : > { %v972_v43 = vld [vmem:[#allocation6 + $0x58] sm:$0x1]  ;;  %v7770_v48 = vpack.c.bf16 %v971_v47, %v963_v46  ;;  %6759 = vmatprep.subr.msk.mxu1 %vm678_vm1, %v652_v44 }
  0xaa   : > { %6753 = vmatmul.mubr.msk.f32.gmra.mrb[4].mxu0 %vm653_vm2, %v9188_v15  ;;  %v7767_v45 = vpack.c.bf16 %v972_v43, %v964_v42  ;;  %6760 = vmatpush1.msk.msra.mxu1 %vm678_vm1, %v626_v41  ;;  %v7937_v4 = vld [vmem:[#allocation4 + $0x8] ss:$16 sps:$4 sm:$0xff]  }
  0xab   : > { %769 = vmatprep.mubr.f32.mxu0 %v8908_v0  ;;  %6761 = vmatmul.mubr.msk.f32.vlgmr.msra.gmra.mrb[0].mxu1 %vm653_vm2, %v9164_v3 }
  0xac   : > { %7769 = vmatprep.subr.msk.bf16.mxu1 %vm9166_vm4, %v7767_v45  ;;  %870 = vmatprep.mubr.f32.mxu1 %v8908_v0 }
  0xad   : > { %7772 = vmatpush1.bf16.msk.msra.mxu1 %vm9166_vm4, %v7770_v48 }
  0xae   : > { %6754 = vmatmul.mubr.msk.f32.gmra.mrb[6].mxu0 %vm653_vm2, %v9194_v16 }
  0xaf   : > { %775 = vmatprep.mubr.f32.mxu0 %v8908_v0  ;;  %6762 = vmatmul.mubr.msk.f32.gmra.mrb[2].mxu1 %vm653_vm2, %v9176_v13 }
  0xb0   : > { %876 = vmatprep.mubr.f32.mxu1 %v8908_v0 }
  0xb2   : > { %6755 = vmatmul.mubr.msk.f32.gmra.mrb[8].mxu0 %vm653_vm2, %v9197_v17 }
  0xb3   : > { %781 = vmatprep.mubr.f32.mxu0 %v8908_v0  ;;  %6763 = vmatmul.mubr.msk.f32.gmra.mrb[4].mxu1 %vm653_vm2, %v9188_v15 }
  0xb4   : > { %882 = vmatprep.mubr.f32.mxu1 %v8908_v0 }
  0xb6   : > { %6756 = vmatmul.mubr.msk.f32.gmra.mrb[10].mxu0 %vm653_vm2, %v9204_v18 }
  0xb7   : > { %787 = vmatprep.mubr.f32.mxu0 %v8908_v0  ;;  %6764 = vmatmul.mubr.msk.f32.gmra.mrb[6].mxu1 %vm653_vm2, %v9194_v16 }
  0xb8   : > { %888 = vmatprep.mubr.f32.mxu1 %v8908_v0 }
  0xba   : > { %6757 = vmatmul.mubr.msk.f32.gmra.mrb[12].mxu0 %vm653_vm2, %v9213_v19 }
  0xbb   : > { %793 = vmatprep.mubr.f32.mxu0 %v8908_v0  ;;  %6765 = vmatmul.mubr.msk.f32.gmra.mrb[8].mxu1 %vm653_vm2, %v9197_v17 }
  0xbc   : > { %894 = vmatprep.mubr.f32.mxu1 %v8908_v0 }
  0xbe   : > { %6758 = vmatmul.mubr.msk.f32.gmra.mrb[14].mxu0 %vm653_vm2, %v9220_v20 }
  0xbf   : > { %1070 = vmatprep.mubr.f32.mxu0 %v8908_v0  ;;  %6766 = vmatmul.mubr.msk.f32.gmra.mrb[10].mxu1 %vm653_vm2, %v9204_v18 }
  0xc0   : > { %900 = vmatprep.mubr.f32.mxu1 %v8908_v0 }
  0xc2   : > { %6771 = vmatmul.mubr.msk.f32.vlgmr.msra.gmra.mrb[16].mxu0 %vm977_vm5, %v9231_v23 }
  0xc3   : > { %7778 = vmatpush1.bf16.msk.msra.mxu0 %vm9166_vm4, %v7776_v25  ;;  %1212 = vmatprep.mubr.f32.mxu0 %v8908_v0 }
  0xc4   : > { %7435 = vmatprep.subr.bf16.mxu0 %v7917_v24  ;;  %6767 = vmatmul.mubr.msk.f32.gmra.mrb[12].mxu1 %vm653_vm2, %v9213_v19 }
  0xc5   : > { %906 = vmatprep.mubr.f32.mxu1 %v8908_v0 }
  0xc6   : > { %6777 = vmatmul.mubr.msk.f32.vlgmr.msra.gmra.mrb[18].mxu0 %vm977_vm5, %v9231_v23 }
  0xc7   : > { %7436 = vmatpush3.bf16.msra.mxu0 %v7918_v26 }
  0xc8   : > { %7437 = vmatprep.subr.bf16.mxu0 %v7919_v27  ;;  %6768 = vmatmul.mubr.msk.f32.gmra.mrb[14].mxu1 %vm653_vm2, %v9220_v20 }
  0xc9   : > { %1141 = vmatprep.mubr.f32.mxu1 %v8908_v0 }
  0xcb   : > { %7438 = vmatpush3.bf16.msra.mxu0 %v7920_v28 }
  0xcc   : > { %7439 = vmatprep.subr.bf16.mxu0 %v7921_v29  ;;  %6774 = vmatmul.mubr.msk.f32.vlgmr.msra.gmra.mrb[16].mxu1 %vm977_vm5, %v9231_v23 }
  0xcd   : > { %1283 = vmatprep.mubr.f32.mxu1 %v8908_v0 }
  0xcf   : > { %7440 = vmatpush3.bf16.msra.mxu0 %v7922_v30 }
  0xd0   : > { %7441 = vmatprep.subr.bf16.mxu0 %v7923_v31 }
  0xd3   : > { %7442 = vmatpush3.bf16.msra.mxu0 %v7924_v32 }
  0xd4   : > { %7443 = vmatprep.subr.bf16.mxu0 %v7925_v33 }
  0xd7   : > { %7444 = vmatpush3.bf16.msra.mxu0 %v7926_v34 }
  0xd8   : > { %7445 = vmatprep.subr.bf16.mxu0 %v7927_v35 }
  0xdb   : > { %7446 = vmatpush3.bf16.msra.mxu0 %v7928_v36 }
  0xdc   : > { %7447 = vmatprep.subr.bf16.mxu0 %v7929_v37 }
  0xdf   : > { %7448 = vmatpush3.bf16.msra.mxu0 %v7930_v38 }
  0xe0   : > { %7449 = vmatprep.subr.bf16.mxu0 %v7931_v39 }
  0xe3   : > { %7450 = vmatpush3.bf16.msra.mxu0 %v7932_v40 }
 0x175   : > { %v753_v56 = vpop.f32.mrb[0].mxu0 }
 0x176   : > { %v754_v57 = vadd.f32 %v753_v56, %v632_v54  ;;  %v755_v58 = vpop.f32.mrb[1].mxu0 }
 0x177   : > { %v756_v59 = vadd.f32 %v755_v58, %v636_v55 }
 0x178   : > { %v913_v60 = vmax.f32 %v754_v57, 0.0 }
 0x179   : > { %v759_v61 = vpop.f32.mrb[2].mxu0  ;;  %v914_v1 = vmax.f32 %v756_v59, 0.0 }
 0x17a   : > { %v760_v62 = vadd.f32 %v759_v61, %v632_v54  ;;  %v761_v63 = vpop.f32.mrb[3].mxu0 }
 0x17b   : > { %v762_v2 = vadd.f32 %v761_v63, %v636_v55 }
 0x17c   : > { %v917_v3 = vmax.f32 %v760_v62, 0.0  ;;  %v975_v62 = vld [vmem:[#allocation6 + $0x70] sm:$0x1] }
 0x17d   : > { %v918_v5 = vmax.f32 %v762_v2, 0.0  ;;  %v765_v6 = vpop.f32.mrb[4].mxu0  ;;  %v8734_v2 = vld [vmem:[%s9227_s20] sm:$0xff]  ;;  %s9527_s20 = scalar_lea.vmem %s9701_s21, %s7434_s7 }
 0x17e   : > { %v945_v7 = vpack.c.bf16 %v917_v3, %v913_v60  ;;  %v766_v8 = vadd.f32 %v765_v6, %v632_v54  ;;  %v767_v9 = vpop.f32.mrb[5].mxu0  ;;  %v976_v60 = vld [vmem:[#allocation6 + $0x78] sm:$0x1]  ;;  %v9314_v3 = vsub.s32 2, %v9279_v50  ;;  %v9317_v6 = vsub.s32 3, %v9279_v50 }
 0x17f   : > { %v946_v10 = vpack.c.bf16 %v918_v5, %v914_v1  ;;  %v768_v11 = vadd.f32 %v767_v9, %v636_v55  ;;  %v8910_v1 = vmov 0.0|0.0   ;;  %v866_v5 = vpop.f32.mrb[0].mxu1 }
 0x180   : > { %v921_v12 = vmax.f32 %v766_v8, 0.0  ;;  %v9321_v8 = vrot.slane %v9284_v51, %v9314_v3  ;;  %v9325_v9 = vrot.slane %v9284_v51, %v9317_v6  ;;  %v7943_v51 = vld [vmem:[#allocation4 + $0x28] ss:$16 sps:$4 sm:$0xff]  }
 0x181   : > { %v922_v13 = vmax.f32 %v768_v11, 0.0  ;;  %v771_v14 = vpop.f32.mrb[6].mxu0  ;;  %1457 = vmatprep.mubr.bf16.mxu0 %v946_v10  ;;  %v7939_v11 = vld [vmem:[#allocation4 + $0xc] ss:$16 sps:$4 sm:$0xff]  }
 0x182   : > { %v772_v15 = vadd.f32 %v771_v14, %v632_v54  ;;  %v773_v16 = vpop.f32.mrb[7].mxu0  ;;  %1458 = vmatmul.mubr.bf16.vlgmr.msra.gmra.mrb[20].mxu0 %v945_v7  ;;  %v868_v7 = vpop.f32.mrb[1].mxu1  ;;  %1806 = vmatprep.subr.bf16.mxu0 %v7939_v11 }
 0x183   : > { %v774_v17 = vadd.f32 %v773_v16, %v636_v55  ;;  %v872_v10 = vpop.f32.mrb[2].mxu1  ;;  %v869_v14 = vadd.f32 %v868_v7, %v9325_v9  ;;  %1807 = vmatpush1.bf16.msra.mxu0 %v7937_v4 }
 0x184   : > { %v925_v18 = vmax.f32 %v772_v15, 0.0  ;;  %v873_v50 = vadd.f32 %v872_v10, %v9321_v8 }
 0x185   : > { %v926_v19 = vmax.f32 %v774_v17, 0.0  ;;  %v777_v20 = vpop.f32.mrb[8].mxu0  ;;  %v7945_v17 = vld [vmem:[#allocation4 + $0x2c] ss:$16 sps:$4 sm:$0xff]  }
 0x186   : > { %v949_v21 = vpack.c.bf16 %v925_v18, %v921_v12  ;;  %v779_v22 = vpop.f32.mrb[9].mxu0  ;;  %v778_v24 = vadd.f32 %v777_v20, %v632_v54  ;;  %v874_v12 = vpop.f32.mrb[3].mxu1  ;;  %1808 = vmatprep.subr.bf16.mxu0 %v7945_v17 }
 0x187   : > { %v950_v23 = vpack.c.bf16 %v926_v19, %v922_v13  ;;  %v780_v25 = vadd.f32 %v779_v22, %v636_v55  ;;  %v867_v13 = vadd.f32 %v866_v5, %v9321_v8  ;;  %v875_v15 = vadd.f32 %v874_v12, %v9325_v9  ;;  %v878_v16 = vpop.f32.mrb[4].mxu1  ;;  %1809 = vmatpush1.bf16.msra.mxu0 %v7943_v51  ;;  %v7961_v51 = vld [vmem:[#allocation4 + $0x88] ss:$16 sps:$4 sm:$0xff]  }
 0x188   : > { %v929_v30 = vmax.f32 %v778_v24, 0.0  ;;  %v879_v18 = vadd.f32 %v878_v16, %v9321_v8  ;;  %v880_v19 = vpop.f32.mrb[5].mxu1  ;;  %v919_v22 = vmax.f32 %v873_v50, 0.0 }
 0x189   : > { %v783_v26 = vpop.f32.mrb[10].mxu0  ;;  %1465 = vmatprep.mubr.bf16.mxu0 %v950_v23  ;;  %v930_v32 = vmax.f32 %v780_v25, 0.0  ;;  %v915_v20 = vmax.f32 %v867_v13, 0.0  ;;  %v920_v23 = vmax.f32 %v875_v15, 0.0 }
 0x18a   : > { %v784_v27 = vadd.f32 %v783_v26, %v632_v54  ;;  %v785_v28 = vpop.f32.mrb[11].mxu0  ;;  %1466 = vmatmul.mubr.bf16.gmra.mrb[24].mxu0 %v949_v21  ;;  %v916_v21 = vmax.f32 %v869_v14, 0.0  ;;  %v884_v24 = vpop.f32.mrb[6].mxu1  ;;  %v923_v25 = vmax.f32 %v879_v18, 0.0  ;;  %v881_v26 = vadd.f32 %v880_v19, %v9325_v9 }
 0x18b   : > { %v786_v29 = vadd.f32 %v785_v28, %v636_v55  ;;  %v886_v28 = vpop.f32.mrb[7].mxu1 }
 0x18c   : > { %v933_v31 = vmax.f32 %v784_v27, 0.0  ;;  %v885_v27 = vadd.f32 %v884_v24, %v9321_v8  ;;  %v7979_v24 = vld [vmem:[#allocation4 + $0xe8] ss:$16 sps:$4 sm:$0xff]  }
 0x18d   : > { %v934_v33 = vmax.f32 %v786_v29, 0.0  ;;  %v789_v34 = vpop.f32.mrb[12].mxu0  ;;  %v7951_v29 = vld [vmem:[#allocation4 + $0x4c] ss:$16 sps:$4 sm:$0xff]  }
 0x18e   : > { %v953_v35 = vpack.c.bf16 %v933_v31, %v929_v30  ;;  %v790_v36 = vadd.f32 %v789_v34, %v632_v54  ;;  %v791_v37 = vpop.f32.mrb[13].mxu0  ;;  %v9334_v30 = vpack.c.bf16 %v919_v22, %v915_v20  ;;  %v9336_v31 = vpack.c.bf16 %v920_v23, %v916_v21  ;;  %1810 = vmatprep.subr.bf16.mxu0 %v7951_v29  ;;  %v7963_v20 = vld [vmem:[#allocation4 + $0x8c] ss:$16 sps:$4 sm:$0xff]  }
 0x18f   : > { %v954_v38 = vpack.c.bf16 %v934_v33, %v930_v32  ;;  %v792_v39 = vadd.f32 %v791_v37, %v636_v55  ;;  %v887_v32 = vadd.f32 %v886_v28, %v9325_v9  ;;  %v890_v33 = vpop.f32.mrb[8].mxu1  ;;  %v924_v34 = vmax.f32 %v881_v26, 0.0  ;;  %v7969_v21 = vld [vmem:[#allocation4 + $0xac] ss:$16 sps:$4 sm:$0xff]   ;;  %v6781_v26 = vld [vmem:[%s9661_s6] ss:$0 sm:$0xff] }
 0x190   : > { %v937_v41 = vmax.f32 %v790_v36, 0.0  ;;  %v891_v36 = vadd.f32 %v890_v33, %v9321_v8  ;;  %v892_v37 = vpop.f32.mrb[9].mxu1  ;;  %v7975_v22 = vld [vmem:[#allocation4 + $0xcc] ss:$16 sps:$4 sm:$0xff]  }
 0x191   : > { %v795_v40 = vpop.f32.mrb[14].mxu0  ;;  %1473 = vmatprep.mubr.bf16.mxu0 %v954_v38  ;;  %v938_v45 = vmax.f32 %v792_v39, 0.0  ;;  %v7949_v38 = vld [vmem:[#allocation4 + $0x48] ss:$16 sps:$4 sm:$0xff]   ;;  %v928_v39 = vmax.f32 %v887_v32, 0.0 }
 0x192   : > { %v796_v42 = vadd.f32 %v795_v40, %v632_v54  ;;  %v797_v43 = vpop.f32.mrb[15].mxu0  ;;  %1474 = vmatmul.mubr.bf16.gmra.mrb[28].mxu0 %v953_v35  ;;  %v968_v54 = vld [vmem:[#allocation6 + $0x38] sm:$0xff]  ;;  %v927_v35 = vmax.f32 %v885_v27, 0.0  ;;  %v893_v40 = vadd.f32 %v892_v37, %v9325_v9 }
 0x193   : > { %v798_v44 = vadd.f32 %v797_v43, %v636_v55  ;;  %v7779_v61 = vpack.c.bf16 %v976_v60, %v968_v54  ;;  %v967_v55 = vld [vmem:[#allocation6 + $0x30] sm:$0xff]  ;;  %v931_v43 = vmax.f32 %v891_v36, 0.0  ;;  %1811 = vmatpush1.bf16.msra.mxu0 %v7949_v38  ;;  %v7955_v60 = vld [vmem:[#allocation4 + $0x68] ss:$16 sps:$4 sm:$0xff]   ;;  %v7981_v23 = vld [vmem:[#allocation4 + $0xec] ss:$16 sps:$4 sm:$0xff]  }
 0x194   : > { %v941_v46 = vmax.f32 %v796_v42, 0.0  ;;  %v7782_v63 = vpack.c.bf16 %v975_v62, %v967_v55  ;;  %v9341_v42 = vpack.c.bf16 %v927_v35, %v923_v25 }
 0x195   : > { %v942_v47 = vmax.f32 %v798_v44, 0.0  ;;  %v9296_v48 = vpop.f32.mrb[16].mxu0  ;;  %7781 = vmatprep.subr.msk.bf16.mxu1 %vm9166_vm4, %v7779_v61 }
 0x196   : > { %v957_v49 = vpack.c.bf16 %v941_v46, %v937_v41  ;;  %v9298_v56 = vpop.f32.mrb[17].mxu0  ;;  %7784 = vmatpush1.bf16.msk.msra.mxu1 %vm9166_vm4, %v7782_v63  ;;  %v896_v41 = vpop.f32.mrb[10].mxu1  ;;  %v7957_v46 = vld [vmem:[#allocation4 + $0x6c] ss:$16 sps:$4 sm:$0xff]  }
 0x197   : > { %v958_v57 = vpack.c.bf16 %v942_v47, %v938_v45  ;;  %7785 = vmatprep.subr.bf16.mxu1 %v8910_v1  ;;  %v897_v44 = vadd.f32 %v896_v41, %v9321_v8  ;;  %v898_v45 = vpop.f32.mrb[11].mxu1  ;;  %v9344_v47 = vpack.c.bf16 %v928_v39, %v924_v34  ;;  %1812 = vmatprep.subr.bf16.mxu0 %v7957_v46 }
 0x198   : > { %v902_v55 = vpop.f32.mrb[12].mxu1  ;;  %1813 = vmatpush1.bf16.msra.mxu0 %v7955_v60 }
 0x199   : > { %1481 = vmatprep.mubr.bf16.mxu0 %v958_v57  ;;  %v9300_v58 = vpop.f32.mrb[18].mxu0  ;;  %6780 = vmatmul.mubr.msk.f32.vlgmr.msra.gmra.mrb[18].mxu1 %vm977_vm5, %v8734_v2  ;;  %v899_v57 = vadd.f32 %v898_v45, %v9325_v9  ;;  %v935_v54 = vmax.f32 %v897_v44, 0.0  ;;  %v903_v63 = vadd.f32 %v902_v55, %v9321_v8  ;;  %v904_v2 = vpop.f32.mrb[13].mxu1 }
 0x19a   : > { %1482 = vmatmul.mubr.bf16.gmra.mrb[32].mxu0 %v957_v49  ;;  %v9302_v59 = vpop.f32.mrb[19].mxu0  ;;  %7699 = vmatprep.mubr.msk.f32.mxu1 %vm8911_vm6, %v8908_v0  ;;  %v932_v49 = vmax.f32 %v893_v40, 0.0  ;;  %v905_v7 = vadd.f32 %v904_v2, %v9325_v9 }
 0x19b   : > { %v936_v61 = vmax.f32 %v899_v57, 0.0  ;;  %v9347_v62 = vpack.c.bf16 %v935_v54, %v931_v43  ;;  %v908_v4 = vpop.f32.mrb[14].mxu1  ;;  %v939_v10 = vmax.f32 %v903_v63, 0.0  ;;  %1814 = vmatprep.subr.bf16.mxu0 %v7963_v20 }
 0x19c   : > { %v909_v11 = vadd.f32 %v908_v4, %v9321_v8  ;;  %v910_v12 = vpop.f32.mrb[15].mxu1  ;;  %v940_v13 = vmax.f32 %v905_v7, 0.0  ;;  %1815 = vmatpush1.bf16.msra.mxu0 %v7961_v51  ;;  %v7967_v8 = vld [vmem:[#allocation4 + $0xa8] ss:$16 sps:$4 sm:$0xff]  }
 0x19d   : > { %v9350_v5 = vpack.c.bf16 %v936_v61, %v932_v49  ;;  %v911_v14 = vadd.f32 %v910_v12, %v9325_v9  ;;  %1816 = vmatprep.subr.bf16.mxu0 %v7969_v21  ;;  %v7973_v9 = vld [vmem:[#allocation4 + $0xc8] ss:$16 sps:$4 sm:$0xff]  }
 0x19e   : > { %v943_v50 = vmax.f32 %v909_v11, 0.0 }
 0x19f   : > { %v944_v15 = vmax.f32 %v911_v14, 0.0  ;;  %v9355_v16 = vpop.f32.mrb[16].mxu1 }
 0x1a0   : > { %v9357_v17 = vpack.c.bf16 %v943_v50, %v939_v10  ;;  %v9359_v18 = vpop.f32.mrb[17].mxu1  ;;  %1817 = vmatpush1.bf16.msra.mxu0 %v7967_v8 }
 0x1a1   : > { %v9361_v19 = vpack.c.bf16 %v944_v15, %v940_v13  ;;  %1818 = vmatprep.subr.bf16.mxu0 %v7975_v22 }
 0x1a4   : > { %1819 = vmatpush1.bf16.msra.mxu0 %v7973_v9 }
 0x1a5   : > { %1820 = vmatprep.subr.bf16.mxu0 %v7981_v23 }
 0x1a8   : > { %1821 = vmatpush1.bf16.msra.mxu0 %v7979_v24 }
 0x255   : > { %v7451_v25 = vpop.f32.mrb[20].mxu0 }
 0x256   : > { %v7452_v27 = vpop.f32.mrb[21].mxu0 }
 0x257   : > { %v7453_v28 = vadd.f32 %v7452_v27, %v7451_v25  ;;  %v7454_v29 = vpop.f32.mrb[22].mxu0  ;;  %v7936_v25 = vld [vmem:[#allocation4 + $0x4] ss:$16 sps:$4 sm:$0xff]  }
 0x258   : > { %v7455_v32 = vpop.f32.mrb[23].mxu0 }
 0x259   : > { %v1460_v33 = vadd.f32 %v7453_v28, %v6781_v26  ;;  %v7456_v34 = vadd.f32 %v7455_v32, %v7454_v29  ;;  %v624_v28 = vld [vmem:[%s9657_s2] sm:$0xff] }
 0x25a   : > { %v7934_v29 = vld [vmem:[#allocation4] ss:$16 sps:$4 sm:$0xff]   ;;  %v7942_v32 = vld [vmem:[#allocation4 + $0x24] ss:$16 sps:$4 sm:$0xff]  }
 0x25b   : > { %v1463_v35 = vadd.f32 %v7456_v34, %v6781_v26  ;;  %v1490_v36 = vmax.f32 %v1460_v33, 0.0  ;;  %v7940_v33 = vld [vmem:[#allocation4 + $0x20] ss:$16 sps:$4 sm:$0xff]   ;;  %v7948_v34 = vld [vmem:[#allocation4 + $0x44] ss:$16 sps:$4 sm:$0xff]  }
 0x25d   : > { %v1491_v37 = vmax.f32 %v1463_v35, 0.0  ;;  %v7457_v38 = vpop.f32.mrb[24].mxu0  ;;  %v7954_v35 = vld [vmem:[#allocation4 + $0x64] ss:$16 sps:$4 sm:$0xff]  }
 0x25e   : > { %v7458_v39 = vpop.f32.mrb[25].mxu0 }
 0x25f   : > { %v7786_v40 = vpack.c.bf16 %v1491_v37, %v1490_v36  ;;  %v7459_v41 = vadd.f32 %v7458_v39, %v7457_v38  ;;  %v7460_v43 = vpop.f32.mrb[26].mxu0  ;;  %v7952_v36 = vld [vmem:[#allocation4 + $0x60] ss:$16 sps:$4 sm:$0xff]   ;;  %v7960_v37 = vld [vmem:[#allocation4 + $0x84] ss:$16 sps:$4 sm:$0xff]  }
 0x260   : > { %v7461_v44 = vpop.f32.mrb[27].mxu0  ;;  %v7958_v38 = vld [vmem:[#allocation4 + $0x80] ss:$16 sps:$4 sm:$0xff]   ;;  %v7966_v39 = vld [vmem:[#allocation4 + $0xa4] ss:$16 sps:$4 sm:$0xff]  }
 0x261   : > { %v1468_v45 = vadd.f32 %v7459_v41, %v6781_v26  ;;  %v7462_v46 = vadd.f32 %v7461_v44, %v7460_v43  ;;  %7787 = vmatpush3.bf16.msra.mxu1 %v7786_v40  ;;  %v7964_v40 = vld [vmem:[#allocation4 + $0xa0] ss:$16 sps:$4 sm:$0xff]   ;;  %v7972_v41 = vld [vmem:[#allocation4 + $0xc4] ss:$16 sps:$4 sm:$0xff]  }
 0x262   : > { %7788 = vmatprep.subr.bf16.mxu1 %v8910_v1  ;;  %v7970_v43 = vld [vmem:[#allocation4 + $0xc0] ss:$16 sps:$4 sm:$0xff]   ;;  %v7978_v44 = vld [vmem:[#allocation4 + $0xe4] ss:$16 sps:$4 sm:$0xff]  }
 0x263   : > { %v1471_v49 = vadd.f32 %v7462_v46, %v6781_v26  ;;  %v1492_v57 = vmax.f32 %v1468_v45, 0.0  ;;  %v7976_v45 = vld [vmem:[#allocation4 + $0xe0] ss:$16 sps:$4 sm:$0xff]  }
 0x265   : > { %v1493_v54 = vmax.f32 %v1471_v49, 0.0  ;;  %v7463_v60 = vpop.f32.mrb[28].mxu0 }
 0x266   : > { %v7464_v61 = vpop.f32.mrb[29].mxu0 }
 0x267   : > { %v7789_v55 = vpack.c.bf16 %v1493_v54, %v1492_v57  ;;  %v7465_v63 = vadd.f32 %v7464_v61, %v7463_v60  ;;  %v7466_v2 = vpop.f32.mrb[30].mxu0  ;;  %v8912_v57 = vmov 0   ;;  %v7984_v54 = vld [vmem:[#allocation7 + $0x4] ss:$16 sps:$4 sm:$0xff]   ;;  %v7987_v60 = vld [vmem:[#allocation7 + $0xc] ss:$16 sps:$4 sm:$0xff]  }
 0x268   : > { %v7467_v7 = vpop.f32.mrb[31].mxu0  ;;  %1838 = vmatprep.mubr.bf16.mxu0 %v8912_v57  ;;  %2753 = vmatprep.subr.bf16.mxu0 %v7987_v60  ;;  %v8039_v60 = vld [vmem:[#allocation7 + $0x128] ss:$16 sps:$4 sm:$0xff]  }
 0x269   : > { %v1476_v4 = vadd.f32 %v7465_v63, %v6781_v26  ;;  %v7468_v10 = vadd.f32 %v7467_v7, %v7466_v2  ;;  %7790 = vmatpush3.bf16.msra.mxu1 %v7789_v55  ;;  %v7982_v55 = vld [vmem:[#allocation7] ss:$16 sps:$4 sm:$0xff]   ;;  %v7985_v63 = vld [vmem:[#allocation7 + $0x8] ss:$16 sps:$4 sm:$0xff]  }
 0x26a   : > { %7791 = vmatprep.subr.bf16.mxu1 %v8910_v1 }
 0x26b   : > { %v1479_v11 = vadd.f32 %v7468_v10, %v6781_v26  ;;  %v1494_v12 = vmax.f32 %v1476_v4, 0.0  ;;  %v7990_v4 = vld [vmem:[#allocation7 + $0x24] ss:$16 sps:$4 sm:$0xff]   ;;  %v7993_v10 = vld [vmem:[#allocation7 + $0x2c] ss:$16 sps:$4 sm:$0xff]  }
 0x26c   : > { %v9373_v46 = vpop.f32.mrb[18].mxu1 }
 0x26d   : > { %v1495_v13 = vmax.f32 %v1479_v11, 0.0  ;;  %v7469_v14 = vpop.f32.mrb[32].mxu0  ;;  %v9375_v49 = vpop.f32.mrb[19].mxu1  ;;  %v7988_v11 = vld [vmem:[#allocation7 + $0x20] ss:$16 sps:$4 sm:$0xff]  }
 0x26e   : > { %v7470_v50 = vpop.f32.mrb[33].mxu0 }
 0x26f   : > { %v7792_v15 = vpack.c.bf16 %v1495_v13, %v1494_v12  ;;  %v7471_v51 = vadd.f32 %v7470_v50, %v7469_v14  ;;  %v7472_v20 = vpop.f32.mrb[34].mxu0  ;;  %v7991_v12 = vld [vmem:[#allocation7 + $0x28] ss:$16 sps:$4 sm:$0xff]   ;;  %v7996_v13 = vld [vmem:[#allocation7 + $0x44] ss:$16 sps:$4 sm:$0xff]  }
 0x270   : > { %v7473_v21 = vpop.f32.mrb[35].mxu0  ;;  %v7999_v14 = vld [vmem:[#allocation7 + $0x4c] ss:$16 sps:$4 sm:$0xff]   ;;  %v7994_v50 = vld [vmem:[#allocation7 + $0x40] ss:$16 sps:$4 sm:$0xff]  }
 0x271   : > { %v1484_v8 = vadd.f32 %v7471_v51, %v6781_v26  ;;  %v7474_v22 = vadd.f32 %v7473_v21, %v7472_v20  ;;  %7793 = vmatpush3.bf16.msra.mxu1 %v7792_v15  ;;  %v7997_v15 = vld [vmem:[#allocation7 + $0x48] ss:$16 sps:$4 sm:$0xff]   ;;  %v8002_v51 = vld [vmem:[#allocation7 + $0x64] ss:$16 sps:$4 sm:$0xff]   ;;  %v8005_v20 = vld [vmem:[#allocation7 + $0x6c] ss:$16 sps:$4 sm:$0xff]  }
 0x272   : > { %7794 = vmatprep.subr.bf16.mxu1 %v8910_v1  ;;  %v8000_v21 = vld [vmem:[#allocation7 + $0x60] ss:$16 sps:$4 sm:$0xff]  }
 0x273   : > { %v1487_v9 = vadd.f32 %v7474_v22, %v6781_v26  ;;  %v1496_v23 = vmax.f32 %v1484_v8, 0.0  ;;  %v7946_v26 = vld [vmem:[#allocation4 + $0x40] ss:$16 sps:$4 sm:$0xff]   ;;  %v8003_v8 = vld [vmem:[#allocation7 + $0x68] ss:$16 sps:$4 sm:$0xff]  }
 0x274   : > { %v8008_v22 = vld [vmem:[#allocation7 + $0x84] ss:$16 sps:$4 sm:$0xff]  }
 0x275   : > { %v1497_v24 = vmax.f32 %v1487_v9, 0.0  ;;  %v8011_v9 = vld [vmem:[#allocation7 + $0x8c] ss:$16 sps:$4 sm:$0xff]  }
 0x277   : > { %v7795_v27 = vpack.c.bf16 %v1497_v24, %v1496_v23  ;;  %v8006_v23 = vld [vmem:[#allocation7 + $0x80] ss:$16 sps:$4 sm:$0xff]   ;;  %v8009_v24 = vld [vmem:[#allocation7 + $0x88] ss:$16 sps:$4 sm:$0xff]  }
 0x279   : > { %7796 = vmatpush3.bf16.msra.mxu1 %v7795_v27  ;;  %v8017_v27 = vld [vmem:[#allocation7 + $0xac] ss:$16 sps:$4 sm:$0xff]  }
 0x27a   : > { %1765 = vmatprep.subr.bf16.mxu1 %v7936_v25  ;;  %v8014_v25 = vld [vmem:[#allocation7 + $0xa4] ss:$16 sps:$4 sm:$0xff]  }
 0x27c   : > { %7700 = vmatmul.mubr.msk.f32.vlgmr.msra.gmra.mrb[20].mxu1 %vm1498_vm7, %v624_v28  ;;  %v8012_v28 = vld [vmem:[#allocation7 + $0xa0] ss:$16 sps:$4 sm:$0xff]  }
 0x27d   : > { %1766 = vmatpush1.bf16.msra.mxu1 %v7934_v29  ;;  %1797 = vmatprep.mubr.bf16.mxu1 %v8912_v57  ;;  %v8015_v29 = vld [vmem:[#allocation7 + $0xa8] ss:$16 sps:$4 sm:$0xff]  }
 0x27e   : > { %1767 = vmatprep.subr.bf16.mxu1 %v7942_v32  ;;  %v8020_v32 = vld [vmem:[#allocation7 + $0xc4] ss:$16 sps:$4 sm:$0xff]  }
 0x281   : > { %1768 = vmatpush1.bf16.msra.mxu1 %v7940_v33  ;;  %v8023_v33 = vld [vmem:[#allocation7 + $0xcc] ss:$16 sps:$4 sm:$0xff]  }
 0x282   : > { %1769 = vmatprep.subr.bf16.mxu1 %v7948_v34  ;;  %v8018_v34 = vld [vmem:[#allocation7 + $0xc0] ss:$16 sps:$4 sm:$0xff]  }
 0x285   : > { %1770 = vmatpush1.bf16.msra.mxu1 %v7946_v26  ;;  %v8021_v26 = vld [vmem:[#allocation7 + $0xc8] ss:$16 sps:$4 sm:$0xff]  }
 0x286   : > { %1771 = vmatprep.subr.bf16.mxu1 %v7954_v35  ;;  %v8026_v35 = vld [vmem:[#allocation7 + $0xe4] ss:$16 sps:$4 sm:$0xff]  }
 0x289   : > { %1772 = vmatpush1.bf16.msra.mxu1 %v7952_v36  ;;  %v8029_v36 = vld [vmem:[#allocation7 + $0xec] ss:$16 sps:$4 sm:$0xff]  }
 0x28a   : > { %1773 = vmatprep.subr.bf16.mxu1 %v7960_v37  ;;  %v8024_v37 = vld [vmem:[#allocation7 + $0xe0] ss:$16 sps:$4 sm:$0xff]  }
 0x28d   : > { %1774 = vmatpush1.bf16.msra.mxu1 %v7958_v38  ;;  %v8027_v38 = vld [vmem:[#allocation7 + $0xe8] ss:$16 sps:$4 sm:$0xff]  }
 0x28e   : > { %1775 = vmatprep.subr.bf16.mxu1 %v7966_v39  ;;  %v8032_v39 = vld [vmem:[#allocation7 + $0x104] ss:$16 sps:$4 sm:$0xff]  }
 0x291   : > { %1776 = vmatpush1.bf16.msra.mxu1 %v7964_v40  ;;  %v8035_v40 = vld [vmem:[#allocation7 + $0x10c] ss:$16 sps:$4 sm:$0xff]  }
 0x292   : > { %1777 = vmatprep.subr.bf16.mxu1 %v7972_v41  ;;  %v8030_v41 = vld [vmem:[#allocation7 + $0x100] ss:$16 sps:$4 sm:$0xff]  }
 0x295   : > { %1778 = vmatpush1.bf16.msra.mxu1 %v7970_v43  ;;  %v8033_v43 = vld [vmem:[#allocation7 + $0x108] ss:$16 sps:$4 sm:$0xff]  }
 0x296   : > { %1779 = vmatprep.subr.bf16.mxu1 %v7978_v44  ;;  %v8038_v44 = vld [vmem:[#allocation7 + $0x124] ss:$16 sps:$4 sm:$0xff]  }
 0x299   : > { %1780 = vmatpush1.bf16.msra.mxu1 %v7976_v45  ;;  %v8041_v45 = vld [vmem:[#allocation7 + $0x12c] ss:$16 sps:$4 sm:$0xff]  }
 0x29a   : > { %2671 = vmatprep.subr.bf16.mxu1 %v7984_v54  ;;  %v8036_v54 = vld [vmem:[#allocation7 + $0x120] ss:$16 sps:$4 sm:$0xff]  }
 0x34f   : > { %v1568_v61 = vpop.f32.mrb[20].mxu1 }
 0x350   : > { %v1604_v2 = vpack.c.bf16 %v1568_v61, %v1568_v61  ;;  %v7701_v7 = vpop.f32.mrb[21].mxu1  ;;  %v8044_v61 = vld [vmem:[#allocation7 + $0x144] ss:$16 sps:$4 sm:$0xff]  }
 0x351   : > { %v8050_v7 = vld [vmem:[#allocation7 + $0x164] ss:$16 sps:$4 sm:$0xff]  }
 0x352   : > { %1798 = vmatmul.mubr.bf16.vlgmr.msra.gmra.mrb[24].mxu1 %v1604_v2  ;;  %1839 = vmatmul.mubr.bf16.vlgmr.msra.gmra.mrb[36].mxu0 %v1604_v2  ;;  %v8045_v2 = vld [vmem:[#allocation7 + $0x148] ss:$16 sps:$4 sm:$0xff]  }
 0x353   : > { %2672 = vmatpush1.bf16.msra.mxu1 %v7982_v55  ;;  %2754 = vmatpush1.bf16.msra.mxu0 %v7985_v63  ;;  %v8047_v55 = vld [vmem:[#allocation7 + $0x14c] ss:$16 sps:$4 sm:$0xff]   ;;  %v8042_v63 = vld [vmem:[#allocation7 + $0x140] ss:$16 sps:$4 sm:$0xff]  }
 0x354   : > { %2673 = vmatprep.subr.bf16.mxu1 %v7990_v4  ;;  %2755 = vmatprep.subr.bf16.mxu0 %v7993_v10  ;;  %v8053_v4 = vld [vmem:[#allocation7 + $0x16c] ss:$16 sps:$4 sm:$0xff]   ;;  %v8048_v10 = vld [vmem:[#allocation7 + $0x160] ss:$16 sps:$4 sm:$0xff]  }
 0x357   : > { %2674 = vmatpush1.bf16.msra.mxu1 %v7988_v11  ;;  %2756 = vmatpush1.bf16.msra.mxu0 %v7991_v12  ;;  %v8051_v11 = vld [vmem:[#allocation7 + $0x168] ss:$16 sps:$4 sm:$0xff]   ;;  %v8056_v12 = vld [vmem:[#allocation7 + $0x184] ss:$16 sps:$4 sm:$0xff]  }
 0x358   : > { %2675 = vmatprep.subr.bf16.mxu1 %v7996_v13  ;;  %2757 = vmatprep.subr.bf16.mxu0 %v7999_v14  ;;  %v8059_v13 = vld [vmem:[#allocation7 + $0x18c] ss:$16 sps:$4 sm:$0xff]   ;;  %v8054_v14 = vld [vmem:[#allocation7 + $0x180] ss:$16 sps:$4 sm:$0xff]  }
 0x35b   : > { %2676 = vmatpush1.bf16.msra.mxu1 %v7994_v50  ;;  %2758 = vmatpush1.bf16.msra.mxu0 %v7997_v15  ;;  %v8057_v50 = vld [vmem:[#allocation7 + $0x188] ss:$16 sps:$4 sm:$0xff]   ;;  %v8062_v15 = vld [vmem:[#allocation7 + $0x1a4] ss:$16 sps:$4 sm:$0xff]  }
 0x35c   : > { %2677 = vmatprep.subr.bf16.mxu1 %v8002_v51  ;;  %2759 = vmatprep.subr.bf16.mxu0 %v8005_v20  ;;  %v8065_v51 = vld [vmem:[#allocation7 + $0x1ac] ss:$16 sps:$4 sm:$0xff]   ;;  %v8060_v20 = vld [vmem:[#allocation7 + $0x1a0] ss:$16 sps:$4 sm:$0xff]  }
 0x35f   : > { %2678 = vmatpush1.bf16.msra.mxu1 %v8000_v21  ;;  %2760 = vmatpush1.bf16.msra.mxu0 %v8003_v8  ;;  %v8063_v21 = vld [vmem:[#allocation7 + $0x1a8] ss:$16 sps:$4 sm:$0xff]   ;;  %v8068_v8 = vld [vmem:[#allocation7 + $0x1c4] ss:$16 sps:$4 sm:$0xff]  }
 0x360   : > { %2679 = vmatprep.subr.bf16.mxu1 %v8008_v22  ;;  %2761 = vmatprep.subr.bf16.mxu0 %v8011_v9  ;;  %v8071_v22 = vld [vmem:[#allocation7 + $0x1cc] ss:$16 sps:$4 sm:$0xff]   ;;  %v8066_v9 = vld [vmem:[#allocation7 + $0x1c0] ss:$16 sps:$4 sm:$0xff]  }
 0x363   : > { %2680 = vmatpush1.bf16.msra.mxu1 %v8006_v23  ;;  %2762 = vmatpush1.bf16.msra.mxu0 %v8009_v24  ;;  %v8069_v23 = vld [vmem:[#allocation7 + $0x1c8] ss:$16 sps:$4 sm:$0xff]   ;;  %v8074_v24 = vld [vmem:[#allocation7 + $0x1e4] ss:$16 sps:$4 sm:$0xff]  }
 0x364   : > { %2681 = vmatprep.subr.bf16.mxu1 %v8014_v25  ;;  %2763 = vmatprep.subr.bf16.mxu0 %v8017_v27  ;;  %v8077_v25 = vld [vmem:[#allocation7 + $0x1ec] ss:$16 sps:$4 sm:$0xff]   ;;  %v8072_v27 = vld [vmem:[#allocation7 + $0x1e0] ss:$16 sps:$4 sm:$0xff]  }
 0x367   : > { %2682 = vmatpush1.bf16.msra.mxu1 %v8012_v28  ;;  %2764 = vmatpush1.bf16.msra.mxu0 %v8015_v29  ;;  %v8075_v28 = vld [vmem:[#allocation7 + $0x1e8] ss:$16 sps:$4 sm:$0xff]   ;;  %v8080_v29 = vld [vmem:[#allocation7 + $0x204] ss:$16 sps:$4 sm:$0xff]  }
 0x368   : > { %2683 = vmatprep.subr.bf16.mxu1 %v8020_v32  ;;  %2765 = vmatprep.subr.bf16.mxu0 %v8023_v33  ;;  %v8083_v32 = vld [vmem:[#allocation7 + $0x20c] ss:$16 sps:$4 sm:$0xff]   ;;  %v1847_v33 = vld [vmem:[%s9663_s8] sm:$0xf] }
 0x36b   : > { %2684 = vmatpush1.bf16.msra.mxu1 %v8018_v34  ;;  %2766 = vmatpush1.bf16.msra.mxu0 %v8021_v26  ;;  %v1852_v34 = vrot.slane %v1847_v33, %v9287_v52  ;;  %v1860_v26 = vrot.slane %v1847_v33, %v9314_v3 }
 0x36c   : > { %2685 = vmatprep.subr.bf16.mxu1 %v8026_v35  ;;  %2767 = vmatprep.subr.bf16.mxu0 %v8029_v36 }
 0x36f   : > { %2686 = vmatpush1.bf16.msra.mxu1 %v8024_v37  ;;  %2768 = vmatpush1.bf16.msra.mxu0 %v8027_v38  ;;  %v1856_v37 = vrot.slane %v1847_v33, %v9290_v53  ;;  %v1864_v38 = vrot.slane %v1847_v33, %v9317_v6  ;;  %v8110_v33 = vld [vmem:[#allocation7 + $0x2a4] ss:$16 sps:$4 sm:$0xff]  }
 0x370   : > { %2687 = vmatprep.subr.bf16.mxu1 %v8032_v39  ;;  %2769 = vmatprep.subr.bf16.mxu0 %v8035_v40 }
 0x373   : > { %2688 = vmatpush1.bf16.msra.mxu1 %v8030_v41  ;;  %2770 = vmatpush1.bf16.msra.mxu0 %v8033_v43 }
 0x374   : > { %2689 = vmatprep.subr.bf16.mxu1 %v8038_v44  ;;  %2771 = vmatprep.subr.bf16.mxu0 %v8041_v45 }
 0x377   : > { %2690 = vmatpush1.bf16.msra.mxu1 %v8036_v54  ;;  %2772 = vmatpush1.bf16.msra.mxu0 %v8039_v60 }
 0x378   : > { %2691 = vmatprep.subr.bf16.mxu1 %v8044_v61  ;;  %2773 = vmatprep.subr.bf16.mxu0 %v8047_v55 }
 0x37b   : > { %2692 = vmatpush1.bf16.msra.mxu1 %v8042_v63  ;;  %2774 = vmatpush1.bf16.msra.mxu0 %v8045_v2 }
 0x37c   : > { %2693 = vmatprep.subr.bf16.mxu1 %v8050_v7  ;;  %2775 = vmatprep.subr.bf16.mxu0 %v8053_v4 }
 0x37f   : > { %2694 = vmatpush1.bf16.msra.mxu1 %v8048_v10  ;;  %2776 = vmatpush1.bf16.msra.mxu0 %v8051_v11 }
 0x380   : > { %2695 = vmatprep.subr.bf16.mxu1 %v8056_v12  ;;  %2777 = vmatprep.subr.bf16.mxu0 %v8059_v13  ;;  %v8081_v13 = vld [vmem:[#allocation7 + $0x208] ss:$16 sps:$4 sm:$0xff]  }
 0x383   : > { %2696 = vmatpush1.bf16.msra.mxu1 %v8054_v14  ;;  %2778 = vmatpush1.bf16.msra.mxu0 %v8057_v50 }
 0x384   : > { %2697 = vmatprep.subr.bf16.mxu1 %v8062_v15  ;;  %2779 = vmatprep.subr.bf16.mxu0 %v8065_v51  ;;  %v8084_v15 = vld [vmem:[#allocation7 + $0x220] ss:$16 sps:$4 sm:$0xff]   ;;  %v8087_v51 = vld [vmem:[#allocation7 + $0x228] ss:$16 sps:$4 sm:$0xff]  }
 0x387   : > { %2698 = vmatpush1.bf16.msra.mxu1 %v8060_v20  ;;  %2780 = vmatpush1.bf16.msra.mxu0 %v8063_v21  ;;  %v8092_v20 = vld [vmem:[#allocation7 + $0x244] ss:$16 sps:$4 sm:$0xff]   ;;  %v8095_v21 = vld [vmem:[#allocation7 + $0x24c] ss:$16 sps:$4 sm:$0xff]  }
 0x388   : > { %2699 = vmatprep.subr.bf16.mxu1 %v8068_v8  ;;  %2781 = vmatprep.subr.bf16.mxu0 %v8071_v22  ;;  %v8090_v8 = vld [vmem:[#allocation7 + $0x240] ss:$16 sps:$4 sm:$0xff]   ;;  %v8093_v22 = vld [vmem:[#allocation7 + $0x248] ss:$16 sps:$4 sm:$0xff]  }
 0x38b   : > { %2700 = vmatpush1.bf16.msra.mxu1 %v8066_v9  ;;  %2782 = vmatpush1.bf16.msra.mxu0 %v8069_v23  ;;  %v8098_v9 = vld [vmem:[#allocation7 + $0x264] ss:$16 sps:$4 sm:$0xff]   ;;  %v8101_v23 = vld [vmem:[#allocation7 + $0x26c] ss:$16 sps:$4 sm:$0xff]  }
 0x38c   : > { %2701 = vmatprep.subr.bf16.mxu1 %v8074_v24  ;;  %2783 = vmatprep.subr.bf16.mxu0 %v8077_v25  ;;  %v8096_v24 = vld [vmem:[#allocation7 + $0x260] ss:$16 sps:$4 sm:$0xff]   ;;  %v8099_v25 = vld [vmem:[#allocation7 + $0x268] ss:$16 sps:$4 sm:$0xff]  }
 0x38f   : > { %2702 = vmatpush1.bf16.msra.mxu1 %v8072_v27  ;;  %2784 = vmatpush1.bf16.msra.mxu0 %v8075_v28  ;;  %v8104_v27 = vld [vmem:[#allocation7 + $0x284] ss:$16 sps:$4 sm:$0xff]   ;;  %v8107_v28 = vld [vmem:[#allocation7 + $0x28c] ss:$16 sps:$4 sm:$0xff]  }
 0x390   : > { %2712 = vmatprep.subr.bf16.mxu1 %v8080_v29  ;;  %2794 = vmatprep.subr.bf16.mxu0 %v8083_v32  ;;  %v8102_v29 = vld [vmem:[#allocation7 + $0x280] ss:$16 sps:$4 sm:$0xff]   ;;  %v8105_v32 = vld [vmem:[#allocation7 + $0x288] ss:$16 sps:$4 sm:$0xff]  }
 0x425   : > { %v1799_v35 = vpop.f32.mrb[24].mxu1  ;;  %v1840_v36 = vpop.f32.mrb[36].mxu0 }
 0x426   : > { %v1800_v39 = vadd.f32 %v1799_v35, %v9296_v48  ;;  %v1841_v40 = vadd.f32 %v1840_v36, %v9355_v16  ;;  %v1801_v41 = vpop.f32.mrb[25].mxu1  ;;  %v1842_v43 = vpop.f32.mrb[37].mxu0  ;;  %v8078_v16 = vld [vmem:[#allocation7 + $0x200] ss:$16 sps:$4 sm:$0xff]   ;;  %v8111_v35 = vld [vmem:[#allocation7 + $0x2a8] ss:$16 sps:$4 sm:$0xff]  }
 0x427   : > { %v1802_v44 = vadd.f32 %v1801_v41, %v9298_v56  ;;  %v1843_v45 = vadd.f32 %v1842_v43, %v9359_v18  ;;  %v1803_v54 = vpop.f32.mrb[26].mxu1  ;;  %v1844_v60 = vpop.f32.mrb[38].mxu0  ;;  %v8086_v56 = vld [vmem:[#allocation7 + $0x224] ss:$16 sps:$4 sm:$0xff]   ;;  %v8089_v18 = vld [vmem:[#allocation7 + $0x22c] ss:$16 sps:$4 sm:$0xff]  }
 0x428   : > { %v1869_v61 = vadd.f32 %v1852_v34, %v1800_v39  ;;  %v9390_v55 = vadd.f32 %v1860_v26, %v1841_v40  ;;  %v1804_v63 = vpop.f32.mrb[27].mxu1  ;;  %v1845_v2 = vpop.f32.mrb[39].mxu0  ;;  %v8113_v34 = vld [vmem:[#allocation7 + $0x2ac] ss:$16 sps:$4 sm:$0xff]   ;;  %v8108_v26 = vld [vmem:[#allocation7 + $0x2a0] ss:$16 sps:$4 sm:$0xff]  }
 0x429   : > { %v1870_v7 = vadd.f32 %v1856_v37, %v1802_v44  ;;  %v1872_v4 = vadd.f32 %v1864_v38, %v1843_v45  ;;  %v8116_v36 = vld [vmem:[#allocation7 + $0x2c4] ss:$16 sps:$4 sm:$0xff]   ;;  %v8119_v37 = vld [vmem:[#allocation7 + $0x2cc] ss:$16 sps:$4 sm:$0xff]   ;;  %v8114_v38 = vld [vmem:[#allocation7 + $0x2c0] ss:$16 sps:$4 sm:$0xff]  }
 0x42a   : > { %v1873_v10 = vmax.f32 %v1869_v61, 0.0  ;;  %v8117_v39 = vld [vmem:[#allocation7 + $0x2c8] ss:$16 sps:$4 sm:$0xff]   ;;  %v8122_v40 = vld [vmem:[#allocation7 + $0x2e4] ss:$16 sps:$4 sm:$0xff]  }
 0x42b   : > { %v1874_v11 = vmax.f32 %v1870_v7, 0.0  ;;  %v1876_v48 = vmax.f32 %v1872_v4, 0.0  ;;  %v8125_v41 = vld [vmem:[#allocation7 + $0x2ec] ss:$16 sps:$4 sm:$0xff]   ;;  %v8120_v43 = vld [vmem:[#allocation7 + $0x2e0] ss:$16 sps:$4 sm:$0xff]  }
 0x42c   : > { %v2005_v14 = vpack.c.bf16 %v1873_v10, %v1873_v10  ;;  %v8123_v44 = vld [vmem:[#allocation7 + $0x2e8] ss:$16 sps:$4 sm:$0xff]   ;;  %v8128_v45 = vld [vmem:[#allocation7 + $0x304] ss:$16 sps:$4 sm:$0xff]   ;;  %v8131_v54 = vld [vmem:[#allocation7 + $0x30c] ss:$16 sps:$4 sm:$0xff]  }
 0x42d   : > { %v2006_v12 = vpack.c.bf16 %v1874_v11, %v1874_v11  ;;  %v2008_v50 = vpack.c.bf16 %v1876_v48, %v1876_v48  ;;  %v8126_v60 = vld [vmem:[#allocation7 + $0x300] ss:$16 sps:$4 sm:$0xff]   ;;  %v8129_v61 = vld [vmem:[#allocation7 + $0x308] ss:$16 sps:$4 sm:$0xff]   ;;  %v8134_v63 = vld [vmem:[#allocation7 + $0x324] ss:$16 sps:$4 sm:$0xff]  }
 0x42e   : > { %v8137_v2 = vld [vmem:[#allocation7 + $0x32c] ss:$16 sps:$4 sm:$0xff]   ;;  %v8132_v7 = vld [vmem:[#allocation7 + $0x320] ss:$16 sps:$4 sm:$0xff]   ;;  %v8135_v4 = vld [vmem:[#allocation7 + $0x328] ss:$16 sps:$4 sm:$0xff]  }
 0x42f   : > { %2703 = vmatprep.mubr.bf16.mxu1 %v2006_v12  ;;  %2785 = vmatprep.mubr.bf16.mxu0 %v2006_v12  ;;  %v8140_v10 = vld [vmem:[#allocation7 + $0x344] ss:$16 sps:$4 sm:$0xff]   ;;  %v8143_v11 = vld [vmem:[#allocation7 + $0x34c] ss:$16 sps:$4 sm:$0xff]   ;;  %v8138_v48 = vld [vmem:[#allocation7 + $0x340] ss:$16 sps:$4 sm:$0xff]  }
 0x430   : > { %2704 = vmatmul.mubr.bf16.vlgmr.msra.gmra.mrb[28].mxu1 %v2005_v14  ;;  %2786 = vmatmul.mubr.bf16.vlgmr.msra.gmra.mrb[40].mxu0 %v2005_v14  ;;  %v8141_v12 = vld [vmem:[#allocation7 + $0x348] ss:$16 sps:$4 sm:$0xff]   ;;  %v8144_v14 = vld [vmem:[#allocation7 + $0x360] ss:$16 sps:$4 sm:$0xff]  }
 0x431   : > { %2713 = vmatpush1.bf16.msra.mxu1 %v8078_v16  ;;  %2795 = vmatpush1.bf16.msra.mxu0 %v8081_v13  ;;  %v8146_v16 = vld [vmem:[#allocation7 + $0x364] ss:$16 sps:$4 sm:$0xff]   ;;  %v8149_v13 = vld [vmem:[#allocation7 + $0x36c] ss:$16 sps:$4 sm:$0xff]  }
 0x432   : > { %2744 = vmatprep.mubr.bf16.mxu1 %v2008_v50  ;;  %2826 = vmatprep.mubr.bf16.mxu0 %v2008_v50  ;;  %v8155_v50 = vld [vmem:[#allocation7 + $0x38c] ss:$16 sps:$4 sm:$0xff]  }
 0x433   : > { %2714 = vmatprep.subr.bf16.mxu1 %v8086_v56  ;;  %2796 = vmatprep.subr.bf16.mxu0 %v8089_v18  ;;  %v8147_v56 = vld [vmem:[#allocation7 + $0x368] ss:$16 sps:$4 sm:$0xff]   ;;  %v8152_v18 = vld [vmem:[#allocation7 + $0x384] ss:$16 sps:$4 sm:$0xff]  }
 0x435   : > { %2715 = vmatpush1.bf16.msra.mxu1 %v8084_v15  ;;  %2797 = vmatpush1.bf16.msra.mxu0 %v8087_v51  ;;  %v8150_v15 = vld [vmem:[#allocation7 + $0x380] ss:$16 sps:$4 sm:$0xff]   ;;  %v8153_v51 = vld [vmem:[#allocation7 + $0x388] ss:$16 sps:$4 sm:$0xff]  }
 0x436   : > { %2716 = vmatprep.subr.bf16.mxu1 %v8092_v20  ;;  %2798 = vmatprep.subr.bf16.mxu0 %v8095_v21  ;;  %v8158_v20 = vld [vmem:[#allocation7 + $0x3a4] ss:$16 sps:$4 sm:$0xff]   ;;  %v8161_v21 = vld [vmem:[#allocation7 + $0x3ac] ss:$16 sps:$4 sm:$0xff]  }
 0x439   : > { %2717 = vmatpush1.bf16.msra.mxu1 %v8090_v8  ;;  %2799 = vmatpush1.bf16.msra.mxu0 %v8093_v22  ;;  %v8156_v8 = vld [vmem:[#allocation7 + $0x3a0] ss:$16 sps:$4 sm:$0xff]   ;;  %v8159_v22 = vld [vmem:[#allocation7 + $0x3a8] ss:$16 sps:$4 sm:$0xff]  }
 0x43a   : > { %2718 = vmatprep.subr.bf16.mxu1 %v8098_v9  ;;  %2800 = vmatprep.subr.bf16.mxu0 %v8101_v23  ;;  %v8164_v9 = vld [vmem:[#allocation7 + $0x3c4] ss:$16 sps:$4 sm:$0xff]   ;;  %v8167_v23 = vld [vmem:[#allocation7 + $0x3cc] ss:$16 sps:$4 sm:$0xff]  }
 0x43d   : > { %2719 = vmatpush1.bf16.msra.mxu1 %v8096_v24  ;;  %2801 = vmatpush1.bf16.msra.mxu0 %v8099_v25  ;;  %v8162_v24 = vld [vmem:[#allocation7 + $0x3c0] ss:$16 sps:$4 sm:$0xff]   ;;  %v8165_v25 = vld [vmem:[#allocation7 + $0x3c8] ss:$16 sps:$4 sm:$0xff]  }
 0x43e   : > { %2720 = vmatprep.subr.bf16.mxu1 %v8104_v27  ;;  %2802 = vmatprep.subr.bf16.mxu0 %v8107_v28  ;;  %v8170_v27 = vld [vmem:[#allocation7 + $0x3e4] ss:$16 sps:$4 sm:$0xff]   ;;  %v8173_v28 = vld [vmem:[#allocation7 + $0x3ec] ss:$16 sps:$4 sm:$0xff]  }
 0x441   : > { %2721 = vmatpush1.bf16.msra.mxu1 %v8102_v29  ;;  %2803 = vmatpush1.bf16.msra.mxu0 %v8105_v32  ;;  %v8168_v29 = vld [vmem:[#allocation7 + $0x3e0] ss:$16 sps:$4 sm:$0xff]   ;;  %v8171_v32 = vld [vmem:[#allocation7 + $0x3e8] ss:$16 sps:$4 sm:$0xff]  }
 0x442   : > { %2722 = vmatprep.subr.bf16.mxu1 %v8110_v33  ;;  %2804 = vmatprep.subr.bf16.mxu0 %v8113_v34  ;;  %v1875_v33 = vmax.f32 %v9390_v55, 0.0  ;;  %v8176_v34 = vld [vmem:[#allocation9 + $0x4] ss:$12 sps:$4 sm:$0xff]   ;;  %v8182_v55 = vld [vmem:[#allocation9 + $0x34] ss:$12 sps:$4 sm:$0xff]  }
 0x445   : > { %2723 = vmatpush1.bf16.msra.mxu1 %v8108_v26  ;;  %2805 = vmatpush1.bf16.msra.mxu0 %v8111_v35  ;;  %v8201_v26 = vld [vmem:[#allocation9 + $0xc8] ss:$12 sps:$4 sm:$0xff]   ;;  %v8174_v35 = vld [vmem:[#allocation9] ss:$12 sps:$4 sm:$0xff]  }
 0x446   : > { %2724 = vmatprep.subr.bf16.mxu1 %v8116_v36  ;;  %2806 = vmatprep.subr.bf16.mxu0 %v8119_v37  ;;  %v8202_v36 = vld [vmem:[#allocation9 + $0x8] ss:$12 sps:$4 sm:$0xff]   ;;  %v2007_v37 = vpack.c.bf16 %v1875_v33, %v1875_v33  ;;  %v8232_v33 = vld [vmem:[#allocation9 + $0x98] ss:$12 sps:$4 sm:$0xff]  }
 0x449   : > { %2725 = vmatpush1.bf16.msra.mxu1 %v8114_v38  ;;  %2807 = vmatpush1.bf16.msra.mxu0 %v8117_v39  ;;  %v8179_v38 = vld [vmem:[#allocation9 + $0x1c] ss:$12 sps:$4 sm:$0xff]   ;;  %v8206_v39 = vld [vmem:[#allocation9 + $0xe0] ss:$12 sps:$4 sm:$0xff]  }
 0x44a   : > { %2726 = vmatprep.subr.bf16.mxu1 %v8122_v40  ;;  %2808 = vmatprep.subr.bf16.mxu0 %v8125_v41  ;;  %v8177_v40 = vld [vmem:[#allocation9 + $0x18] ss:$12 sps:$4 sm:$0xff]   ;;  %v8207_v41 = vld [vmem:[#allocation9 + $0x20] ss:$12 sps:$4 sm:$0xff]  }
 0x44d   : > { %2727 = vmatpush1.bf16.msra.mxu1 %v8120_v43  ;;  %2809 = vmatpush1.bf16.msra.mxu0 %v8123_v44  ;;  %v8211_v43 = vld [vmem:[#allocation9 + $0xf8] ss:$12 sps:$4 sm:$0xff]   ;;  %v8180_v44 = vld [vmem:[#allocation9 + $0x30] ss:$12 sps:$4 sm:$0xff]  }
 0x44e   : > { %2728 = vmatprep.subr.bf16.mxu1 %v8128_v45  ;;  %2810 = vmatprep.subr.bf16.mxu0 %v8131_v54  ;;  %v8212_v45 = vld [vmem:[#allocation9 + $0x38] ss:$12 sps:$4 sm:$0xff]  }
 0x44f   : > { %v8185_v54 = vld [vmem:[#allocation9 + $0x4c] ss:$12 sps:$4 sm:$0xff]  }
 0x451   : > { %2729 = vmatpush1.bf16.msra.mxu1 %v8126_v60  ;;  %2811 = vmatpush1.bf16.msra.mxu0 %v8129_v61  ;;  %v8216_v60 = vld [vmem:[#allocation9 + $0x110] ss:$12 sps:$4 sm:$0xff]   ;;  %v8183_v61 = vld [vmem:[#allocation9 + $0x48] ss:$12 sps:$4 sm:$0xff]  }
 0x452   : > { %2730 = vmatprep.subr.bf16.mxu1 %v8134_v63  ;;  %2812 = vmatprep.subr.bf16.mxu0 %v8137_v2  ;;  %v8217_v63 = vld [vmem:[#allocation9 + $0x50] ss:$12 sps:$4 sm:$0xff]  }
 0x453   : > { %v8188_v2 = vld [vmem:[#allocation9 + $0x64] ss:$12 sps:$4 sm:$0xff]  }
 0x455   : > { %2731 = vmatpush1.bf16.msra.mxu1 %v8132_v7  ;;  %2813 = vmatpush1.bf16.msra.mxu0 %v8135_v4  ;;  %v8221_v7 = vld [vmem:[#allocation9 + $0x128] ss:$12 sps:$4 sm:$0xff]   ;;  %v8186_v4 = vld [vmem:[#allocation9 + $0x60] ss:$12 sps:$4 sm:$0xff]  }
 0x456   : > { %2732 = vmatprep.subr.bf16.mxu1 %v8140_v10  ;;  %2814 = vmatprep.subr.bf16.mxu0 %v8143_v11  ;;  %v8222_v10 = vld [vmem:[#allocation9 + $0x68] ss:$12 sps:$4 sm:$0xff]  }
 0x457   : > { %v8191_v11 = vld [vmem:[#allocation9 + $0x7c] ss:$12 sps:$4 sm:$0xff]  }
 0x459   : > { %2733 = vmatpush1.bf16.msra.mxu1 %v8138_v48  ;;  %2815 = vmatpush1.bf16.msra.mxu0 %v8141_v12  ;;  %v8226_v48 = vld [vmem:[#allocation9 + $0x140] ss:$12 sps:$4 sm:$0xff]   ;;  %v8189_v12 = vld [vmem:[#allocation9 + $0x78] ss:$12 sps:$4 sm:$0xff]  }
 0x45a   : > { %2734 = vmatprep.subr.bf16.mxu1 %v8146_v16  ;;  %2816 = vmatprep.subr.bf16.mxu0 %v8149_v13  ;;  %v8227_v16 = vld [vmem:[#allocation9 + $0x80] ss:$12 sps:$4 sm:$0xff]  }
 0x45b   : > { %v8194_v13 = vld [vmem:[#allocation9 + $0x94] ss:$12 sps:$4 sm:$0xff]  }
 0x45d   : > { %2735 = vmatpush1.bf16.msra.mxu1 %v8144_v14  ;;  %2817 = vmatpush1.bf16.msra.mxu0 %v8147_v56  ;;  %v8192_v14 = vld [vmem:[#allocation9 + $0x90] ss:$12 sps:$4 sm:$0xff]   ;;  %v8197_v56 = vld [vmem:[#allocation9 + $0xac] ss:$12 sps:$4 sm:$0xff]  }
 0x45e   : > { %2736 = vmatprep.subr.bf16.mxu1 %v8152_v18  ;;  %2818 = vmatprep.subr.bf16.mxu0 %v8155_v50  ;;  %v8195_v18 = vld [vmem:[#allocation9 + $0xa8] ss:$12 sps:$4 sm:$0xff]   ;;  %v8200_v50 = vld [vmem:[#allocation9 + $0xc4] ss:$12 sps:$4 sm:$0xff]  }
 0x461   : > { %2737 = vmatpush1.bf16.msra.mxu1 %v8150_v15  ;;  %2819 = vmatpush1.bf16.msra.mxu0 %v8153_v51  ;;  %v8198_v15 = vld [vmem:[#allocation9 + $0xc0] ss:$12 sps:$4 sm:$0xff]   ;;  %v8205_v51 = vld [vmem:[#allocation9 + $0xdc] ss:$12 sps:$4 sm:$0xff]  }
 0x462   : > { %2738 = vmatprep.subr.bf16.mxu1 %v8158_v20  ;;  %2820 = vmatprep.subr.bf16.mxu0 %v8161_v21  ;;  %v8203_v20 = vld [vmem:[#allocation9 + $0xd8] ss:$12 sps:$4 sm:$0xff]   ;;  %v8210_v21 = vld [vmem:[#allocation9 + $0xf4] ss:$12 sps:$4 sm:$0xff]  }
 0x465   : > { %2739 = vmatpush1.bf16.msra.mxu1 %v8156_v8  ;;  %2821 = vmatpush1.bf16.msra.mxu0 %v8159_v22  ;;  %v8208_v8 = vld [vmem:[#allocation9 + $0xf0] ss:$12 sps:$4 sm:$0xff]   ;;  %v8215_v22 = vld [vmem:[#allocation9 + $0x10c] ss:$12 sps:$4 sm:$0xff]  }
 0x466   : > { %2740 = vmatprep.subr.bf16.mxu1 %v8164_v9  ;;  %2822 = vmatprep.subr.bf16.mxu0 %v8167_v23  ;;  %v8213_v9 = vld [vmem:[#allocation9 + $0x108] ss:$12 sps:$4 sm:$0xff]   ;;  %v8220_v23 = vld [vmem:[#allocation9 + $0x124] ss:$12 sps:$4 sm:$0xff]  }
 0x469   : > { %2741 = vmatpush1.bf16.msra.mxu1 %v8162_v24  ;;  %2823 = vmatpush1.bf16.msra.mxu0 %v8165_v25  ;;  %v8218_v24 = vld [vmem:[#allocation9 + $0x120] ss:$12 sps:$4 sm:$0xff]   ;;  %v8225_v25 = vld [vmem:[#allocation9 + $0x13c] ss:$12 sps:$4 sm:$0xff]  }
 0x46a   : > { %2742 = vmatprep.subr.bf16.mxu1 %v8170_v27  ;;  %2824 = vmatprep.subr.bf16.mxu0 %v8173_v28  ;;  %v8223_v27 = vld [vmem:[#allocation9 + $0x138] ss:$12 sps:$4 sm:$0xff]   ;;  %v8230_v28 = vld [vmem:[#allocation9 + $0x154] ss:$12 sps:$4 sm:$0xff]  }
 0x46d   : > { %2743 = vmatpush1.bf16.msra.mxu1 %v8168_v29  ;;  %2825 = vmatpush1.bf16.msra.mxu0 %v8171_v32  ;;  %v8231_v29 = vld [vmem:[#allocation9 + $0x158] ss:$12 sps:$4 sm:$0xff]   ;;  %v8228_v32 = vld [vmem:[#allocation9 + $0x150] ss:$12 sps:$4 sm:$0xff]  }
 0x46e   : > { %3500 = vmatprep.subr.bf16.mxu1 %v8176_v34  ;;  %7484 = vmatprep.subr.bf16.mxu0 %v8201_v26  ;;  %v8235_v34 = vld [vmem:[#allocation9 + $0x16c] ss:$12 sps:$4 sm:$0xff]   ;;  %v8236_v26 = vld [vmem:[#allocation9 + $0x170] ss:$12 sps:$4 sm:$0xff]  }
 0x470   : > { %2745 = vmatmul.mubr.bf16.vlgmr.msra.gmra.mrb[28].mxu1 %v2007_v37  ;;  %2827 = vmatmul.mubr.bf16.vlgmr.msra.gmra.mrb[40].mxu0 %v2007_v37  ;;  %v8240_v37 = vld [vmem:[#allocation9 + $0x184] ss:$12 sps:$4 sm:$0xff]  }
 0x471   : > { %3501 = vmatpush1.bf16.msra.mxu1 %v8174_v35  ;;  %7485 = vmatpush3.bf16.msra.mxu0 %v8202_v36  ;;  %v8233_v35 = vld [vmem:[#allocation9 + $0x168] ss:$12 sps:$4 sm:$0xff]   ;;  %v8237_v36 = vld [vmem:[#allocation9 + $0xb0] ss:$12 sps:$4 sm:$0xff]  }
 0x472   : > { %3502 = vmatprep.subr.bf16.mxu1 %v8179_v38  ;;  %7486 = vmatprep.subr.bf16.mxu0 %v8206_v39  ;;  %v8241_v38 = vld [vmem:[#allocation9 + $0x248] ss:$12 sps:$4 sm:$0xff]   ;;  %v9396_v39 = vld [vmem:[%s9666_s11] sm:$0xf] }
 0x475   : > { %3503 = vmatpush1.bf16.msra.mxu1 %v8177_v40  ;;  %7487 = vmatpush3.bf16.msra.mxu0 %v8207_v41  ;;  %v2014_v40 = vrot.slane %v9396_v39, %v9287_v52  ;;  %v2018_v41 = vrot.slane %v9396_v39, %v9290_v53 }
 0x476   : > { %3504 = vmatprep.subr.bf16.mxu1 %v8182_v55  ;;  %7488 = vmatprep.subr.bf16.mxu0 %v8211_v43  ;;  %v2026_v55 = vrot.slane %v9396_v39, %v9317_v6 }
 0x479   : > { %3505 = vmatpush1.bf16.msra.mxu1 %v8180_v44  ;;  %7489 = vmatpush3.bf16.msra.mxu0 %v8212_v45 }
 0x47a   : > { %3506 = vmatprep.subr.bf16.mxu1 %v8185_v54  ;;  %7490 = vmatprep.subr.bf16.mxu0 %v8216_v60 }
 0x47d   : > { %3507 = vmatpush1.bf16.msra.mxu1 %v8183_v61  ;;  %7491 = vmatpush3.bf16.msra.mxu0 %v8217_v63 }
 0x47e   : > { %3508 = vmatprep.subr.bf16.mxu1 %v8188_v2  ;;  %7492 = vmatprep.subr.bf16.mxu0 %v8221_v7 }
 0x481   : > { %3509 = vmatpush1.bf16.msra.mxu1 %v8186_v4  ;;  %7493 = vmatpush3.bf16.msra.mxu0 %v8222_v10 }
 0x482   : > { %3510 = vmatprep.subr.bf16.mxu1 %v8191_v11  ;;  %7494 = vmatprep.subr.bf16.mxu0 %v8226_v48 }
 0x485   : > { %3511 = vmatpush1.bf16.msra.mxu1 %v8189_v12  ;;  %7495 = vmatpush3.bf16.msra.mxu0 %v8227_v16 }
 0x486   : > { %3512 = vmatprep.subr.bf16.mxu1 %v8194_v13  ;;  %7496 = vmatprep.subr.bf16.mxu0 %v8231_v29  ;;  %v8238_v13 = vld [vmem:[#allocation9 + $0x180] ss:$12 sps:$4 sm:$0xff]   ;;  %v8261_v29 = vld [vmem:[#allocation9 + $0x2a8] ss:$12 sps:$4 sm:$0xff]  }
 0x489   : > { %3513 = vmatpush1.bf16.msra.mxu1 %v8192_v14  ;;  %7497 = vmatpush3.bf16.msra.mxu0 %v8232_v33  ;;  %v8242_v14 = vld [vmem:[#allocation9 + $0x188] ss:$12 sps:$4 sm:$0xff]  }
 0x48a   : > { %3514 = vmatprep.subr.bf16.mxu1 %v8197_v56  ;;  %7498 = vmatprep.subr.bf16.mxu0 %v8236_v26  ;;  %v8262_v33 = vld [vmem:[#allocation9 + $0x1e8] ss:$12 sps:$4 sm:$0xff]   ;;  %v8266_v26 = vld [vmem:[#allocation9 + $0x2c0] ss:$12 sps:$4 sm:$0xff]  }
 0x48d   : > { %3515 = vmatpush1.bf16.msra.mxu1 %v8195_v18  ;;  %7499 = vmatpush3.bf16.msra.mxu0 %v8237_v36  ;;  %v8245_v18 = vld [vmem:[#allocation9 + $0x19c] ss:$12 sps:$4 sm:$0xff]   ;;  %v8267_v36 = vld [vmem:[#allocation9 + $0x200] ss:$12 sps:$4 sm:$0xff]  }
 0x48e   : > { %3516 = vmatprep.subr.bf16.mxu1 %v8200_v50  ;;  %7506 = vmatprep.subr.bf16.mxu0 %v8241_v38  ;;  %v8246_v50 = vld [vmem:[#allocation9 + $0x260] ss:$12 sps:$4 sm:$0xff]  }
 0x48f   : > { %v8270_v38 = vld [vmem:[#allocation9 + $0x214] ss:$12 sps:$4 sm:$0xff]  }
 0x491   : > { %3517 = vmatpush1.bf16.msra.mxu1 %v8198_v15 }
 0x492   : > { %3518 = vmatprep.subr.bf16.mxu1 %v8205_v51  ;;  %v8243_v51 = vld [vmem:[#allocation9 + $0x198] ss:$12 sps:$4 sm:$0xff]  }
 0x495   : > { %3519 = vmatpush1.bf16.msra.mxu1 %v8203_v20  ;;  %v8247_v20 = vld [vmem:[#allocation9 + $0x1a0] ss:$12 sps:$4 sm:$0xff]  }
 0x496   : > { %3520 = vmatprep.subr.bf16.mxu1 %v8210_v21  ;;  %v8250_v21 = vld [vmem:[#allocation9 + $0x1b4] ss:$12 sps:$4 sm:$0xff]  }
 0x499   : > { %3521 = vmatpush1.bf16.msra.mxu1 %v8208_v8  ;;  %v8251_v8 = vld [vmem:[#allocation9 + $0x278] ss:$12 sps:$4 sm:$0xff]  }
 0x49a   : > { %3522 = vmatprep.subr.bf16.mxu1 %v8215_v22  ;;  %v8248_v22 = vld [vmem:[#allocation9 + $0x1b0] ss:$12 sps:$4 sm:$0xff]  }
 0x49d   : > { %3523 = vmatpush1.bf16.msra.mxu1 %v8213_v9  ;;  %v8252_v9 = vld [vmem:[#allocation9 + $0x1b8] ss:$12 sps:$4 sm:$0xff]  }
 0x49e   : > { %3524 = vmatprep.subr.bf16.mxu1 %v8220_v23  ;;  %v8255_v23 = vld [vmem:[#allocation9 + $0x1cc] ss:$12 sps:$4 sm:$0xff]  }
 0x4a1   : > { %3525 = vmatpush1.bf16.msra.mxu1 %v8218_v24  ;;  %v8256_v24 = vld [vmem:[#allocation9 + $0x290] ss:$12 sps:$4 sm:$0xff]  }
 0x4a2   : > { %3526 = vmatprep.subr.bf16.mxu1 %v8225_v25  ;;  %v8253_v25 = vld [vmem:[#allocation9 + $0x1c8] ss:$12 sps:$4 sm:$0xff]  }
 0x4a5   : > { %3527 = vmatpush1.bf16.msra.mxu1 %v8223_v27  ;;  %v8257_v27 = vld [vmem:[#allocation9 + $0x1d0] ss:$12 sps:$4 sm:$0xff]  }
 0x4a6   : > { %3528 = vmatprep.subr.bf16.mxu1 %v8230_v28  ;;  %v8260_v28 = vld [vmem:[#allocation9 + $0x1e4] ss:$12 sps:$4 sm:$0xff]  }
 0x4a9   : > { %3529 = vmatpush1.bf16.msra.mxu1 %v8228_v32  ;;  %v8258_v32 = vld [vmem:[#allocation9 + $0x1e0] ss:$12 sps:$4 sm:$0xff]  }
 0x4aa   : > { %3530 = vmatprep.subr.bf16.mxu1 %v8235_v34  ;;  %v8265_v34 = vld [vmem:[#allocation9 + $0x1fc] ss:$12 sps:$4 sm:$0xff]  }
 0x4ad   : > { %3531 = vmatpush1.bf16.msra.mxu1 %v8233_v35  ;;  %v8263_v35 = vld [vmem:[#allocation9 + $0x1f8] ss:$12 sps:$4 sm:$0xff]  }
 0x4ae   : > { %3541 = vmatprep.subr.bf16.mxu1 %v8240_v37  ;;  %v2022_v37 = vrot.slane %v9396_v39, %v9314_v3  ;;  %v8280_v39 = vld [vmem:[#allocation9 + $0x244] ss:$12 sps:$4 sm:$0xff]  }
 0x543   : > { %v2746_v43 = vpop.f32.mrb[28].mxu1  ;;  %v9404_v44 = vpop.f32.mrb[40].mxu0 }
 0x544   : > { %v7809_v45 = vadd.f32 %v2746_v43, %v2014_v40  ;;  %v2748_v54 = vpop.f32.mrb[29].mxu1  ;;  %v2830_v60 = vpop.f32.mrb[41].mxu0  ;;  %v8271_v40 = vld [vmem:[#allocation9 + $0x2d8] ss:$12 sps:$4 sm:$0xff]   ;;  %v7811_v43 = vadd.f32 %v9404_v44, %v2022_v37 }
 0x545   : > { %v7810_v61 = vadd.f32 %v2748_v54, %v2018_v41  ;;  %v7812_v63 = vadd.f32 %v2830_v60, %v2026_v55  ;;  %v2750_v2 = vpop.f32.mrb[30].mxu1  ;;  %v2832_v7 = vpop.f32.mrb[42].mxu0  ;;  %v8268_v41 = vld [vmem:[#allocation9 + $0x210] ss:$12 sps:$4 sm:$0xff]   ;;  %v8272_v55 = vld [vmem:[#allocation9 + $0x218] ss:$12 sps:$4 sm:$0xff]  }
 0x546   : > { %v2835_v4 = vmax.f32 %v7809_v45, 0.0  ;;  %v2751_v10 = vpop.f32.mrb[31].mxu1  ;;  %v2833_v11 = vpop.f32.mrb[43].mxu0  ;;  %v8275_v45 = vld [vmem:[#allocation9 + $0x22c] ss:$12 sps:$4 sm:$0xff]   ;;  %v8327_v37 = vld [vmem:[%s9669_s14 + $0x20] sm:$0xff]  }
 0x547   : > { %v2836_v48 = vmax.f32 %v7810_v61, 0.0  ;;  %v2838_v12 = vmax.f32 %v7812_v63, 0.0  ;;  %v8276_v54 = vld [vmem:[#allocation9 + $0x2f0] ss:$12 sps:$4 sm:$0xff]   ;;  %v8273_v60 = vld [vmem:[#allocation9 + $0x228] ss:$12 sps:$4 sm:$0xff]  }
 0x548   : > { %v2967_v56 = vpack.c.bf16 %v2835_v4, %v2835_v4  ;;  %v8277_v61 = vld [vmem:[#allocation9 + $0x230] ss:$12 sps:$4 sm:$0xff]   ;;  %v2837_v63 = vmax.f32 %v7811_v43, 0.0  ;;  %v8278_v2 = vld [vmem:[#allocation9 + $0x240] ss:$12 sps:$4 sm:$0xff]  }
 0x549   : > { %v2968_v16 = vpack.c.bf16 %v2836_v48, %v2836_v48  ;;  %v2970_v15 = vpack.c.bf16 %v2838_v12, %v2838_v12  ;;  %v8283_v4 = vld [vmem:[#allocation9 + $0x25c] ss:$12 sps:$4 sm:$0xff]   ;;  %v8281_v44 = vld [vmem:[#allocation9 + $0x258] ss:$12 sps:$4 sm:$0xff]   ;;  %v8286_v10 = vld [vmem:[#allocation9 + $0x274] ss:$12 sps:$4 sm:$0xff]  }
 0x54a   : > { %v2969_v7 = vpack.c.bf16 %v2837_v63, %v2837_v63  ;;  %v8284_v11 = vld [vmem:[#allocation9 + $0x270] ss:$12 sps:$4 sm:$0xff]   ;;  %v8289_v48 = vld [vmem:[#allocation9 + $0x28c] ss:$12 sps:$4 sm:$0xff]   ;;  %v8287_v12 = vld [vmem:[#allocation9 + $0x288] ss:$12 sps:$4 sm:$0xff]  }
 0x54b   : > { %3532 = vmatprep.mubr.bf16.mxu1 %v2968_v16  ;;  %3614 = vmatprep.mubr.bf16.mxu0 %v2968_v16  ;;  %v8292_v16 = vld [vmem:[#allocation9 + $0x2a4] ss:$12 sps:$4 sm:$0xff]   ;;  %v8332_v43 = vld [vmem:[%s9669_s14 + $0x78] sm:$0xff]  }
 0x54c   : > { %3533 = vmatmul.mubr.bf16.vlgmr.msra.gmra.mrb[32].mxu1 %v2967_v56  ;;  %3615 = vmatmul.mubr.bf16.vlgmr.msra.gmra.mrb[44].mxu0 %v2967_v56  ;;  %v8293_v56 = vld [vmem:[#allocation9 + $0x2b8] ss:$12 sps:$4 sm:$0xff]  }
 0x54d   : > { %3542 = vmatpush1.bf16.msra.mxu1 %v8238_v13  ;;  %7507 = vmatpush3.bf16.msra.mxu0 %v8242_v14  ;;  %v8290_v13 = vld [vmem:[#allocation9 + $0x2a0] ss:$12 sps:$4 sm:$0xff]   ;;  %v8295_v14 = vld [vmem:[#allocation9 + $0x2bc] ss:$12 sps:$4 sm:$0xff]  }
 0x54e   : > { %3573 = vmatprep.mubr.bf16.mxu1 %v2970_v15  ;;  %3654 = vmatprep.mubr.bf16.mxu0 %v2970_v15  ;;  %v8301_v15 = vld [vmem:[#allocation9 + $0x2ec] ss:$12 sps:$4 sm:$0xff]  }
 0x54f   : > { %3543 = vmatprep.subr.bf16.mxu1 %v8245_v18  ;;  %7508 = vmatprep.subr.bf16.mxu0 %v8246_v50  ;;  %v8298_v18 = vld [vmem:[#allocation9 + $0x2d4] ss:$12 sps:$4 sm:$0xff]   ;;  %v8296_v50 = vld [vmem:[#allocation9 + $0x2d0] ss:$12 sps:$4 sm:$0xff]  }
 0x551   : > { %3544 = vmatpush1.bf16.msra.mxu1 %v8243_v51  ;;  %7509 = vmatpush3.bf16.msra.mxu0 %v8247_v20  ;;  %v8299_v51 = vld [vmem:[#allocation9 + $0x2e8] ss:$12 sps:$4 sm:$0xff]   ;;  %v8302_v20 = vld [vmem:[#allocation2 + $0xc0] sm:$0xff]  }
 0x552   : > { %3545 = vmatprep.subr.bf16.mxu1 %v8250_v21  ;;  %7510 = vmatprep.subr.bf16.mxu0 %v8251_v8  ;;  %v8303_v21 = vld [vmem:[#allocation2 + $0x80] sm:$0xff]   ;;  %v8304_v8 = vld [vmem:[#allocation2 + $0xc8] sm:$0xff]  }
 0x555   : > { %3546 = vmatpush1.bf16.msra.mxu1 %v8248_v22  ;;  %7511 = vmatpush3.bf16.msra.mxu0 %v8252_v9  ;;  %v8305_v22 = vld [vmem:[#allocation2 + $0x88] sm:$0xff]   ;;  %v8306_v9 = vld [vmem:[#allocation2 + $0xd0] sm:$0xff]  }
 0x556   : > { %3547 = vmatprep.subr.bf16.mxu1 %v8255_v23  ;;  %7512 = vmatprep.subr.bf16.mxu0 %v8256_v24  ;;  %v8307_v23 = vld [vmem:[#allocation2 + $0x90] sm:$0xff]   ;;  %v8308_v24 = vld [vmem:[#allocation2 + $0xd8] sm:$0xff]  }
 0x559   : > { %3548 = vmatpush1.bf16.msra.mxu1 %v8253_v25  ;;  %7513 = vmatpush3.bf16.msra.mxu0 %v8257_v27  ;;  %v8309_v25 = vld [vmem:[#allocation2 + $0x98] sm:$0xff]   ;;  %v8310_v27 = vld [vmem:[#allocation2 + $0xe0] sm:$0xff]  }
 0x55a   : > { %3549 = vmatprep.subr.bf16.mxu1 %v8260_v28  ;;  %7514 = vmatprep.subr.bf16.mxu0 %v8261_v29  ;;  %v8311_v28 = vld [vmem:[#allocation2 + $0xa0] sm:$0xff]   ;;  %v8312_v29 = vld [vmem:[#allocation2 + $0xe8] sm:$0xff]  }
 0x55d   : > { %3550 = vmatpush1.bf16.msra.mxu1 %v8258_v32  ;;  %7515 = vmatpush3.bf16.msra.mxu0 %v8262_v33  ;;  %v8313_v32 = vld [vmem:[#allocation2 + $0xa8] sm:$0xff]   ;;  %v8314_v33 = vld [vmem:[#allocation2 + $0xf0] sm:$0xff]  }
 0x55e   : > { %3551 = vmatprep.subr.bf16.mxu1 %v8265_v34  ;;  %7516 = vmatprep.subr.bf16.mxu0 %v8266_v26  ;;  %v8316_v34 = vld [vmem:[#allocation2 + $0xf8] sm:$0xff]  }
 0x55f   : > { %v8317_v26 = vld [vmem:[#allocation2 + $0xb8] sm:$0xff]  }
 0x561   : > { %3552 = vmatpush1.bf16.msra.mxu1 %v8263_v35  ;;  %7517 = vmatpush3.bf16.msra.mxu0 %v8267_v36  ;;  %v8318_v35 = vld [vmem:[%s9669_s14 + $0x40] sm:$0xff]  }
 0x562   : > { %3553 = vmatprep.subr.bf16.mxu1 %v8270_v38  ;;  %7518 = vmatprep.subr.bf16.mxu0 %v8271_v40  ;;  %v8326_v36 = vld [vmem:[%s9669_s14 + $0x60] sm:$0xff]   ;;  %v8328_v38 = vld [vmem:[%s9669_s14 + $0x68] sm:$0xff]  }
 0x563   : > { %v8329_v40 = vld [vmem:[%s9669_s14 + $0x28] sm:$0xff]  }
 0x565   : > { %3554 = vmatpush1.bf16.msra.mxu1 %v8268_v41  ;;  %7519 = vmatpush3.bf16.msra.mxu0 %v8272_v55  ;;  %v8330_v41 = vld [vmem:[%s9669_s14 + $0x70] sm:$0xff]  }
 0x566   : > { %3555 = vmatprep.subr.bf16.mxu1 %v8275_v45  ;;  %7520 = vmatprep.subr.bf16.mxu0 %v8276_v54  ;;  %v8331_v55 = vld [vmem:[%s9669_s14 + $0x30] sm:$0xff]   ;;  %v8333_v45 = vld [vmem:[%s9669_s14 + $0x38] sm:$0xff]  }
 0x569   : > { %3556 = vmatpush1.bf16.msra.mxu1 %v8273_v60  ;;  %7521 = vmatpush3.bf16.msra.mxu0 %v8277_v61 }
 0x56a   : > { %3557 = vmatprep.subr.bf16.mxu1 %v8280_v39  ;;  %7528 = vmatprep.subr.bf16.mxu0 %v8318_v35 }
 0x56c   : > { %3655 = vmatmul.mubr.bf16.vlgmr.msra.gmra.mrb[48].mxu0 %v2969_v7 }
 0x56d   : > { %3558 = vmatpush1.bf16.msra.mxu1 %v8278_v2  ;;  %v2971_v2 = vld [vmem:[%s9699_s28] sm:$0x7] }
 0x56e   : > { %3559 = vmatprep.subr.bf16.mxu1 %v8283_v4 }
 0x571   : > { %3560 = vmatpush1.bf16.msra.mxu1 %v8281_v44 }
 0x572   : > { %3561 = vmatprep.subr.bf16.mxu1 %v8286_v10 }
 0x575   : > { %3562 = vmatpush1.bf16.msra.mxu1 %v8284_v11 }
 0x576   : > { %3563 = vmatprep.subr.bf16.mxu1 %v8289_v48 }
 0x579   : > { %3564 = vmatpush1.bf16.msra.mxu1 %v8287_v12 }
 0x57a   : > { %3565 = vmatprep.subr.bf16.mxu1 %v8292_v16 }
 0x57d   : > { %3566 = vmatpush1.bf16.msra.mxu1 %v8290_v13  ;;  %v2976_v13 = vrot.slane %v2971_v2, %v9287_v52 }
 0x57e   : > { %3567 = vmatprep.subr.bf16.mxu1 %v8295_v14  ;;  %v2980_v14 = vrot.slane %v2971_v2, %v9290_v53 }
 0x581   : > { %3568 = vmatpush1.bf16.msra.mxu1 %v8293_v56 }
 0x582   : > { %3569 = vmatprep.subr.bf16.mxu1 %v8298_v18 }
 0x585   : > { %3570 = vmatpush1.bf16.msra.mxu1 %v8296_v50 }
 0x586   : > { %3571 = vmatprep.subr.bf16.mxu1 %v8301_v15 }
 0x589   : > { %3572 = vmatpush1.bf16.msra.mxu1 %v8299_v51 }
 0x58a   : > { %7559 = vmatprep.subr.bf16.mxu1 %v8302_v20 }
 0x58c   : > { %3574 = vmatmul.mubr.bf16.vlgmr.msra.gmra.mrb[32].mxu1 %v2969_v7  ;;  %v2984_v7 = vrot.slane %v2971_v2, %v9314_v3 }
 0x58d   : > { %7560 = vmatpush3.bf16.msra.mxu1 %v8303_v21  ;;  %4117 = vmatprep.mubr.bf16.mxu1 %v9336_v31  ;;  %v8315_v31 = vld [vmem:[#allocation2 + $0xb0] sm:$0xff]  }
 0x58e   : > { %7561 = vmatprep.subr.bf16.mxu1 %v8304_v8 }
 0x591   : > { %7562 = vmatpush3.bf16.msra.mxu1 %v8305_v22 }
 0x592   : > { %7563 = vmatprep.subr.bf16.mxu1 %v8306_v9  ;;  %v8334_v9 = vld [vmem:[%s9669_s14 + $0x80] sm:$0xff]  }
 0x595   : > { %7564 = vmatpush3.bf16.msra.mxu1 %v8307_v23 }
 0x596   : > { %7565 = vmatprep.subr.bf16.mxu1 %v8308_v24  ;;  %v8335_v24 = vld [vmem:[%s9669_s14 + $0x88] sm:$0xff]  }
 0x599   : > { %7566 = vmatpush3.bf16.msra.mxu1 %v8309_v25  ;;  %v8336_v25 = vld [vmem:[%s9669_s14 + $0x90] sm:$0xff]  }
 0x59a   : > { %7567 = vmatprep.subr.bf16.mxu1 %v8310_v27  ;;  %v8337_v27 = vld [vmem:[%s9669_s14 + $0x98] sm:$0xff]  }
 0x59d   : > { %7568 = vmatpush3.bf16.msra.mxu1 %v8311_v28  ;;  %v8338_v28 = vld [vmem:[%s9669_s14 + $0xa0] sm:$0xff]  }
 0x59e   : > { %7569 = vmatprep.subr.bf16.mxu1 %v8312_v29  ;;  %v8339_v29 = vld [vmem:[%s9669_s14 + $0xa8] sm:$0xff]  }
 0x5a1   : > { %7570 = vmatpush3.bf16.msra.mxu1 %v8313_v32  ;;  %v8340_v32 = vld [vmem:[%s9669_s14 + $0xb0] sm:$0xff]  }
 0x5a2   : > { %7571 = vmatprep.subr.bf16.mxu1 %v8314_v33 }
 0x5a5   : > { %7572 = vmatpush3.bf16.msra.mxu1 %v8315_v31  ;;  %v7081_v31 = vld [vmem:[%s9661_s6 + $0x1] ss:$0 sm:$0xff] }
 0x5a6   : > { %7573 = vmatprep.subr.bf16.mxu1 %v8316_v34 }
 0x5a9   : > { %7574 = vmatpush3.bf16.msra.mxu1 %v8317_v26 }
 0x5ac   : > { %4118 = vmatmul.mubr.bf16.vlgmr.msra.gmra.mrb[36].mxu1 %v9334_v30  ;;  %v8319_v30 = vld [vmem:[%s9669_s14] sm:$0xff]  }
 0x5ad   : > { %4125 = vmatprep.mubr.bf16.mxu1 %v9344_v47  ;;  %7529 = vmatpush3.bf16.msra.mxu0 %v8319_v30  ;;  %v8321_v47 = vld [vmem:[%s9669_s14 + $0x8] sm:$0xff]   ;;  %v8341_v30 = vld [vmem:[%s9669_s14 + $0xb8] sm:$0xff]  }
 0x5b4   : > { %4126 = vmatmul.mubr.bf16.gmra.mrb[40].mxu1 %v9341_v42  ;;  %v8320_v42 = vld [vmem:[%s9669_s14 + $0x48] sm:$0xff]  }
 0x5b5   : > { %4133 = vmatprep.mubr.bf16.mxu1 %v9350_v5  ;;  %7530 = vmatprep.subr.bf16.mxu0 %v8320_v42  ;;  %v8323_v5 = vld [vmem:[%s9669_s14 + $0x10] sm:$0xff]  }
 0x5b6   : > { %7531 = vmatpush3.bf16.msra.mxu0 %v8321_v47 }
 0x5bc   : > { %4134 = vmatmul.mubr.bf16.gmra.mrb[44].mxu1 %v9347_v62  ;;  %v8322_v62 = vld [vmem:[%s9669_s14 + $0x50] sm:$0xff]  }
 0x5bd   : > { %4141 = vmatprep.mubr.bf16.mxu1 %v9361_v19  ;;  %7532 = vmatprep.subr.bf16.mxu0 %v8322_v62  ;;  %v8325_v19 = vld [vmem:[%s9669_s14 + $0x18] sm:$0xff]  }
 0x5be   : > { %7533 = vmatpush3.bf16.msra.mxu0 %v8323_v5 }
 0x5c4   : > { %4142 = vmatmul.mubr.bf16.gmra.mrb[48].mxu1 %v9357_v17  ;;  %v8324_v17 = vld [vmem:[%s9669_s14 + $0x58] sm:$0xff]  }
 0x5c5   : > { %4495 = vmatprep.mubr.bf16.mxu1 %v8912_v57  ;;  %7534 = vmatprep.subr.bf16.mxu0 %v8324_v17 }
 0x5c6   : > { %7535 = vmatpush3.bf16.msra.mxu0 %v8325_v19 }
 0x5c7   : > { %7536 = vmatprep.subr.bf16.mxu0 %v8326_v36 }
 0x5ca   : > { %7537 = vmatpush3.bf16.msra.mxu0 %v8327_v37 }
 0x5cb   : > { %7538 = vmatprep.subr.bf16.mxu0 %v8328_v38 }
 0x5ce   : > { %7539 = vmatpush3.bf16.msra.mxu0 %v8329_v40 }
 0x5cf   : > { %7540 = vmatprep.subr.bf16.mxu0 %v8330_v41 }
 0x5d2   : > { %7541 = vmatpush3.bf16.msra.mxu0 %v8331_v55 }
 0x5d3   : > { %7542 = vmatprep.subr.bf16.mxu0 %v8332_v43 }
 0x5d6   : > { %7543 = vmatpush3.bf16.msra.mxu0 %v8333_v45 }
 0x5d7   : > { %7702 = vmatprep.subr.bf16.mxu0 %v8908_v0 }
 0x61f   : > { %v7500_v54 = vpop.f32.mrb[44].mxu0 }
 0x620   : > { %v7501_v60 = vpop.f32.mrb[45].mxu0 }
 0x621   : > { %v7502_v61 = vadd.f32 %v7501_v60, %v7500_v54  ;;  %v7503_v63 = vpop.f32.mrb[46].mxu0 }
 0x622   : > { %v7504_v39 = vpop.f32.mrb[47].mxu0 }
 0x623   : > { %v3617_v10 = vadd.f32 %v7502_v61, %v2984_v7 }
 0x63f   : > { %v7522_v4 = vpop.f32.mrb[48].mxu0 }
 0x640   : > { %v7523_v44 = vpop.f32.mrb[49].mxu0 }
 0x641   : > { %v7524_v11 = vadd.f32 %v7523_v44, %v7522_v4  ;;  %v7525_v48 = vpop.f32.mrb[50].mxu0 }
 0x642   : > { %v7526_v12 = vpop.f32.mrb[51].mxu0 }
 0x643   : > { %v3657_v16 = vadd.f32 %v7524_v11, %v3617_v10 }
 0x645   : > { %v3664_v42 = vmax.f32 %v3657_v16, 0.0 }
 0x647   : > { %v3715_v19 = vpack.c.bf16 %v3664_v42, %v3664_v42  ;;  %v8362_v42 = vld [vmem:[#allocation4 + $0x164] ss:$16 sps:$4 sm:$0xff]  }
 0x65f   : > { %v3575_v56 = vpop.f32.mrb[32].mxu1 }
 0x660   : > { %v7813_v18 = vadd.f32 %v3575_v56, %v2976_v13  ;;  %v3577_v50 = vpop.f32.mrb[33].mxu1 }
 0x661   : > { %v7814_v15 = vadd.f32 %v3577_v50, %v2980_v14  ;;  %v3579_v51 = vpop.f32.mrb[34].mxu1 }
 0x662   : > { %v3662_v20 = vmax.f32 %v7813_v18, 0.0  ;;  %v3580_v21 = vpop.f32.mrb[35].mxu1 }
 0x663   : > { %v3663_v8 = vmax.f32 %v7814_v15, 0.0 }
 0x664   : > { %v3713_v23 = vpack.c.bf16 %v3662_v20, %v3662_v20 }
 0x665   : > { %v3714_v22 = vpack.c.bf16 %v3663_v8, %v3663_v8 }
 0x667   : > { %3899 = vmatprep.mubr.bf16.mxu0 %v3714_v22 }
 0x668   : > { %3900 = vmatmul.mubr.bf16.vlgmr.msra.gmra.mrb[52].mxu0 %v3713_v23 }
 0x669   : > { %7703 = vmatpush3.bf16.msra.mxu0 %v8334_v9  ;;  %7718 = vmatprep.mubr.msk.bf16.mxu0 %vm8911_vm6, %v8908_v0 }
 0x66a   : > { %7704 = vmatprep.subr.bf16.mxu0 %v8908_v0 }
 0x66d   : > { %7705 = vmatpush3.bf16.msra.mxu0 %v8335_v24 }
 0x66e   : > { %7706 = vmatprep.subr.bf16.mxu0 %v8908_v0 }
 0x671   : > { %7707 = vmatpush3.bf16.msra.mxu0 %v8336_v25  ;;  %v8735_v25 = vld [vmem:[%s9657_s2] sm:$0xff] }
 0x672   : > { %7708 = vmatprep.subr.bf16.mxu0 %v8908_v0 }
 0x675   : > { %7709 = vmatpush3.bf16.msra.mxu0 %v8337_v27  ;;  %v8344_v27 = vld [vmem:[#allocation4 + $0x104] ss:$16 sps:$4 sm:$0xff]  }
 0x676   : > { %7710 = vmatprep.subr.bf16.mxu0 %v8908_v0 }
 0x679   : > { %7711 = vmatpush3.bf16.msra.mxu0 %v8338_v28  ;;  %v8347_v28 = vld [vmem:[#allocation4 + $0x10c] ss:$16 sps:$4 sm:$0xff]  }
 0x67a   : > { %7712 = vmatprep.subr.bf16.mxu0 %v8908_v0  ;;  %4463 = vmatprep.subr.bf16.mxu1 %v8347_v28  ;;  %v8407_v28 = vld [vmem:[#allocation7 + $0x44c] ss:$16 sps:$4 sm:$0xff]  }
 0x67d   : > { %7713 = vmatpush3.bf16.msra.mxu0 %v8339_v29  ;;  %v8342_v29 = vld [vmem:[#allocation4 + $0x100] ss:$16 sps:$4 sm:$0xff]  }
 0x67e   : > { %7714 = vmatprep.subr.bf16.mxu0 %v8908_v0 }
 0x67f   : > { %v7575_v33 = vpop.f32.mrb[36].mxu1 }
 0x680   : > { %v7576_v34 = vpop.f32.mrb[37].mxu1 }
 0x681   : > { %7715 = vmatpush3.bf16.msra.mxu0 %v8340_v32  ;;  %v7577_v26 = vadd.f32 %v7576_v34, %v7575_v33  ;;  %v7578_v35 = vpop.f32.mrb[38].mxu1  ;;  %v8345_v32 = vld [vmem:[#allocation4 + $0x108] ss:$16 sps:$4 sm:$0xff]   ;;  %v8350_v33 = vld [vmem:[#allocation4 + $0x124] ss:$16 sps:$4 sm:$0xff]  }
 0x682   : > { %v7579_v47 = vpop.f32.mrb[39].mxu1  ;;  %7716 = vmatprep.subr.bf16.mxu0 %v8908_v0  ;;  %4464 = vmatpush1.bf16.msra.mxu1 %v8345_v32  ;;  %v8353_v34 = vld [vmem:[#allocation4 + $0x12c] ss:$16 sps:$4 sm:$0xff]   ;;  %v8405_v32 = vld [vmem:[#allocation7 + $0x448] ss:$16 sps:$4 sm:$0xff]  }
 0x683   : > { %v4120_v62 = vadd.f32 %v7577_v26, %v7081_v31  ;;  %v7580_v5 = vadd.f32 %v7579_v47, %v7578_v35  ;;  %v8356_v26 = vld [vmem:[#allocation4 + $0x144] ss:$16 sps:$4 sm:$0xff]   ;;  %v8359_v35 = vld [vmem:[#allocation4 + $0x14c] ss:$16 sps:$4 sm:$0xff]   ;;  %4465 = vmatprep.subr.bf16.mxu1 %v8353_v34  ;;  %v8411_v34 = vld [vmem:[#allocation7 + $0x468] ss:$16 sps:$4 sm:$0xff]  }
 0x684   : > { %v8365_v47 = vld [vmem:[#allocation4 + $0x16c] ss:$16 sps:$4 sm:$0xff]  }
 0x685   : > { %v4123_v17 = vadd.f32 %v7580_v5, %v7081_v31  ;;  %7717 = vmatpush3.bf16.msra.mxu0 %v8341_v30  ;;  %v4150_v36 = vmax.f32 %v4120_v62, 0.0  ;;  %v8354_v30 = vld [vmem:[#allocation4 + $0x140] ss:$16 sps:$4 sm:$0xff]   ;;  %v8363_v5 = vld [vmem:[#allocation4 + $0x168] ss:$16 sps:$4 sm:$0xff]  }
 0x686   : > { %7797 = vmatprep.subr.bf16.mxu0 %v8910_v1  ;;  %v8360_v62 = vld [vmem:[#allocation4 + $0x160] ss:$16 sps:$4 sm:$0xff]  }
 0x687   : > { %v4151_v37 = vmax.f32 %v4123_v17, 0.0  ;;  %v7581_v38 = vpop.f32.mrb[40].mxu1  ;;  %v8368_v17 = vld [vmem:[#allocation4 + $0x184] ss:$16 sps:$4 sm:$0xff]  }
 0x688   : > { %7719 = vmatmul.mubr.bf16.vlgmr.msra.gmra.mrb[56].mxu0 %v3715_v19  ;;  %v7582_v40 = vpop.f32.mrb[41].mxu1  ;;  %v8371_v19 = vld [vmem:[#allocation4 + $0x18c] ss:$16 sps:$4 sm:$0xff]  }
 0x689   : > { %v7798_v41 = vpack.c.bf16 %v4151_v37, %v4150_v36  ;;  %v7583_v55 = vadd.f32 %v7582_v40, %v7581_v38  ;;  %v7584_v43 = vpop.f32.mrb[42].mxu1  ;;  %7738 = vmatprep.mubr.msk.f32.mxu0 %vm8911_vm6, %v8908_v0  ;;  %v8366_v36 = vld [vmem:[#allocation4 + $0x180] ss:$16 sps:$4 sm:$0xff]   ;;  %v8369_v37 = vld [vmem:[#allocation4 + $0x188] ss:$16 sps:$4 sm:$0xff]  }
 0x68a   : > { %v7585_v45 = vpop.f32.mrb[43].mxu1  ;;  %v8374_v38 = vld [vmem:[#allocation4 + $0x1a4] ss:$16 sps:$4 sm:$0xff]   ;;  %v8377_v40 = vld [vmem:[#allocation4 + $0x1ac] ss:$16 sps:$4 sm:$0xff]  }
 0x68b   : > { %v4128_v54 = vadd.f32 %v7583_v55, %v7081_v31  ;;  %v7586_v60 = vadd.f32 %v7585_v45, %v7584_v43  ;;  %7799 = vmatpush3.bf16.msra.mxu0 %v7798_v41  ;;  %v8372_v41 = vld [vmem:[#allocation4 + $0x1a0] ss:$16 sps:$4 sm:$0xff]   ;;  %v8375_v55 = vld [vmem:[#allocation4 + $0x1a8] ss:$16 sps:$4 sm:$0xff]   ;;  %v8380_v43 = vld [vmem:[#allocation4 + $0x1c4] ss:$16 sps:$4 sm:$0xff]  }
 0x68c   : > { %7800 = vmatprep.subr.bf16.mxu0 %v8910_v1  ;;  %v8383_v45 = vld [vmem:[#allocation4 + $0x1cc] ss:$16 sps:$4 sm:$0xff]  }
 0x68d   : > { %v4131_v61 = vadd.f32 %v7586_v60, %v7081_v31  ;;  %v4152_v63 = vmax.f32 %v4128_v54, 0.0  ;;  %v8378_v54 = vld [vmem:[#allocation4 + $0x1c0] ss:$16 sps:$4 sm:$0xff]   ;;  %v8381_v60 = vld [vmem:[#allocation4 + $0x1c8] ss:$16 sps:$4 sm:$0xff]  }
 0x68f   : > { %v4153_v39 = vmax.f32 %v4131_v61, 0.0  ;;  %v7587_v2 = vpop.f32.mrb[44].mxu1  ;;  %v8386_v61 = vld [vmem:[#allocation4 + $0x1e4] ss:$16 sps:$4 sm:$0xff]  }
 0x690   : > { %v7588_v7 = vpop.f32.mrb[45].mxu1 }
 0x691   : > { %v7801_v4 = vpack.c.bf16 %v4153_v39, %v4152_v63  ;;  %v7589_v44 = vadd.f32 %v7588_v7, %v7587_v2  ;;  %v7590_v10 = vpop.f32.mrb[46].mxu1  ;;  %v8389_v63 = vld [vmem:[#allocation4 + $0x1ec] ss:$16 sps:$4 sm:$0xff]   ;;  %v8384_v39 = vld [vmem:[#allocation4 + $0x1e0] ss:$16 sps:$4 sm:$0xff]  }
 0x692   : > { %v7591_v11 = vpop.f32.mrb[47].mxu1  ;;  %v8387_v2 = vld [vmem:[#allocation4 + $0x1e8] ss:$16 sps:$4 sm:$0xff]   ;;  %v8392_v7 = vld [vmem:[#allocation7 + $0x404] ss:$16 sps:$4 sm:$0xff]  }
 0x693   : > { %v4136_v48 = vadd.f32 %v7589_v44, %v7081_v31  ;;  %v7592_v12 = vadd.f32 %v7591_v11, %v7590_v10  ;;  %7802 = vmatpush3.bf16.msra.mxu0 %v7801_v4  ;;  %v8395_v4 = vld [vmem:[#allocation7 + $0x40c] ss:$16 sps:$4 sm:$0xff]  }
 0x694   : > { %7803 = vmatprep.subr.bf16.mxu0 %v8910_v1 }
 0x695   : > { %v4139_v16 = vadd.f32 %v7592_v12, %v7081_v31  ;;  %v4154_v13 = vmax.f32 %v4136_v48, 0.0 }
 0x697   : > { %v4155_v14 = vmax.f32 %v4139_v16, 0.0  ;;  %v7593_v56 = vpop.f32.mrb[48].mxu1  ;;  %v7055_v16 = vld [vmem:[%s9700_s13] ss:$0 sm:$0xff] }
 0x698   : > { %v7594_v18 = vpop.f32.mrb[49].mxu1 }
 0x699   : > { %v7804_v50 = vpack.c.bf16 %v4155_v14, %v4154_v13  ;;  %v7595_v15 = vadd.f32 %v7594_v18, %v7593_v56  ;;  %v7596_v51 = vpop.f32.mrb[50].mxu1 }
 0x69a   : > { %v7597_v20 = vpop.f32.mrb[51].mxu1 }
 0x69b   : > { %v4144_v21 = vadd.f32 %v7595_v15, %v7081_v31  ;;  %v7598_v8 = vadd.f32 %v7597_v20, %v7596_v51  ;;  %7805 = vmatpush3.bf16.msra.mxu0 %v7804_v50  ;;  %v8390_v20 = vld [vmem:[#allocation7 + $0x400] ss:$16 sps:$4 sm:$0xff]  }
 0x69c   : > { %7806 = vmatprep.subr.bf16.mxu0 %v8910_v1  ;;  %v8348_v1 = vld [vmem:[#allocation4 + $0x120] ss:$16 sps:$4 sm:$0xff]  }
 0x69d   : > { %v4147_v22 = vadd.f32 %v7598_v8, %v7081_v31  ;;  %v4156_v9 = vmax.f32 %v4144_v21, 0.0  ;;  %v8351_v31 = vld [vmem:[#allocation4 + $0x128] ss:$16 sps:$4 sm:$0xff]  }
 0x69e   : > { %4466 = vmatpush1.bf16.msra.mxu1 %v8351_v31  ;;  %v8393_v21 = vld [vmem:[#allocation7 + $0x408] ss:$16 sps:$4 sm:$0xff]   ;;  %v8408_v31 = vld [vmem:[#allocation7 + $0x460] ss:$16 sps:$4 sm:$0xff]  }
 0x69f   : > { %v4157_v23 = vmax.f32 %v4147_v22, 0.0  ;;  %4467 = vmatprep.subr.bf16.mxu1 %v8359_v35  ;;  %v8419_v35 = vld [vmem:[#allocation7 + $0x48c] ss:$16 sps:$4 sm:$0xff]  }
 0x6a1   : > { %v7807_v24 = vpack.c.bf16 %v4157_v23, %v4156_v9  ;;  %v8398_v9 = vld [vmem:[#allocation7 + $0x424] ss:$16 sps:$4 sm:$0xff]   ;;  %v8401_v23 = vld [vmem:[#allocation7 + $0x42c] ss:$16 sps:$4 sm:$0xff]  }
 0x6a3   : > { %7808 = vmatpush3.bf16.msra.mxu0 %v7807_v24  ;;  %v8396_v24 = vld [vmem:[#allocation7 + $0x420] ss:$16 sps:$4 sm:$0xff]  }
 0x6a4   : > { %4422 = vmatprep.subr.bf16.mxu0 %v8344_v27  ;;  %v8404_v27 = vld [vmem:[#allocation7 + $0x444] ss:$16 sps:$4 sm:$0xff]  }
 0x6a6   : > { %7739 = vmatmul.mubr.msk.f32.vlgmr.msra.gmra.mrb[60].mxu0 %vm1498_vm7, %v8735_v25  ;;  %v8399_v25 = vld [vmem:[#allocation7 + $0x428] ss:$16 sps:$4 sm:$0xff]  }
 0x6a7   : > { %4454 = vmatprep.mubr.bf16.mxu0 %v8912_v57  ;;  %4423 = vmatpush1.bf16.msra.mxu0 %v8342_v29  ;;  %v8357_v57 = vld [vmem:[#allocation4 + $0x148] ss:$16 sps:$4 sm:$0xff]   ;;  %v8402_v29 = vld [vmem:[#allocation7 + $0x440] ss:$16 sps:$4 sm:$0xff]  }
 0x6a8   : > { %4424 = vmatprep.subr.bf16.mxu0 %v8350_v33  ;;  %4468 = vmatpush1.bf16.msra.mxu1 %v8357_v57  ;;  %v8413_v33 = vld [vmem:[#allocation7 + $0x46c] ss:$16 sps:$4 sm:$0xff]   ;;  %v8417_v57 = vld [vmem:[#allocation7 + $0x488] ss:$16 sps:$4 sm:$0xff]  }
 0x6a9   : > { %4469 = vmatprep.subr.bf16.mxu1 %v8365_v47  ;;  %v8425_v47 = vld [vmem:[#allocation7 + $0x4ac] ss:$16 sps:$4 sm:$0xff]  }
 0x6ab   : > { %4425 = vmatpush1.bf16.msra.mxu0 %v8348_v1  ;;  %v8410_v1 = vld [vmem:[#allocation7 + $0x464] ss:$16 sps:$4 sm:$0xff]  }
 0x6ac   : > { %4426 = vmatprep.subr.bf16.mxu0 %v8356_v26  ;;  %4470 = vmatpush1.bf16.msra.mxu1 %v8363_v5  ;;  %v8416_v26 = vld [vmem:[#allocation7 + $0x484] ss:$16 sps:$4 sm:$0xff]   ;;  %v8423_v5 = vld [vmem:[#allocation7 + $0x4a8] ss:$16 sps:$4 sm:$0xff]  }
 0x6ad   : > { %4471 = vmatprep.subr.bf16.mxu1 %v8371_v19  ;;  %v8431_v19 = vld [vmem:[#allocation7 + $0x4cc] ss:$16 sps:$4 sm:$0xff]  }
 0x6af   : > { %4427 = vmatpush1.bf16.msra.mxu0 %v8354_v30  ;;  %v8414_v30 = vld [vmem:[#allocation7 + $0x480] ss:$16 sps:$4 sm:$0xff]  }
 0x6b0   : > { %4428 = vmatprep.subr.bf16.mxu0 %v8362_v42  ;;  %4472 = vmatpush1.bf16.msra.mxu1 %v8369_v37  ;;  %v8422_v42 = vld [vmem:[#allocation7 + $0x4a4] ss:$16 sps:$4 sm:$0xff]   ;;  %v8429_v37 = vld [vmem:[#allocation7 + $0x4c8] ss:$16 sps:$4 sm:$0xff]  }
 0x6b1   : > { %4473 = vmatprep.subr.bf16.mxu1 %v8377_v40  ;;  %v8437_v40 = vld [vmem:[#allocation7 + $0x4ec] ss:$16 sps:$4 sm:$0xff]  }
 0x6b3   : > { %4429 = vmatpush1.bf16.msra.mxu0 %v8360_v62  ;;  %v8420_v62 = vld [vmem:[#allocation7 + $0x4a0] ss:$16 sps:$4 sm:$0xff]  }
 0x6b4   : > { %4430 = vmatprep.subr.bf16.mxu0 %v8368_v17  ;;  %4474 = vmatpush1.bf16.msra.mxu1 %v8375_v55  ;;  %v8428_v17 = vld [vmem:[#allocation7 + $0x4c4] ss:$16 sps:$4 sm:$0xff]   ;;  %v8435_v55 = vld [vmem:[#allocation7 + $0x4e8] ss:$16 sps:$4 sm:$0xff]  }
 0x6b5   : > { %4475 = vmatprep.subr.bf16.mxu1 %v8383_v45  ;;  %v8443_v45 = vld [vmem:[#allocation7 + $0x50c] ss:$16 sps:$4 sm:$0xff]  }
 0x6b7   : > { %4431 = vmatpush1.bf16.msra.mxu0 %v8366_v36  ;;  %v8426_v36 = vld [vmem:[#allocation7 + $0x4c0] ss:$16 sps:$4 sm:$0xff]  }
 0x6b8   : > { %4432 = vmatprep.subr.bf16.mxu0 %v8374_v38  ;;  %4476 = vmatpush1.bf16.msra.mxu1 %v8381_v60  ;;  %v8434_v38 = vld [vmem:[#allocation7 + $0x4e4] ss:$16 sps:$4 sm:$0xff]   ;;  %v8441_v60 = vld [vmem:[#allocation7 + $0x508] ss:$16 sps:$4 sm:$0xff]  }
 0x6b9   : > { %4477 = vmatprep.subr.bf16.mxu1 %v8389_v63  ;;  %v8449_v63 = vld [vmem:[#allocation7 + $0x52c] ss:$16 sps:$4 sm:$0xff]  }
 0x6bb   : > { %4433 = vmatpush1.bf16.msra.mxu0 %v8372_v41  ;;  %v8432_v41 = vld [vmem:[#allocation7 + $0x4e0] ss:$16 sps:$4 sm:$0xff]  }
 0x6bc   : > { %4434 = vmatprep.subr.bf16.mxu0 %v8380_v43  ;;  %4478 = vmatpush1.bf16.msra.mxu1 %v8387_v2  ;;  %v8440_v43 = vld [vmem:[#allocation7 + $0x504] ss:$16 sps:$4 sm:$0xff]   ;;  %v8447_v2 = vld [vmem:[#allocation7 + $0x528] ss:$16 sps:$4 sm:$0xff]  }
 0x6bd   : > { %5413 = vmatprep.subr.bf16.mxu1 %v8395_v4  ;;  %v8455_v4 = vld [vmem:[#allocation7 + $0x54c] ss:$16 sps:$4 sm:$0xff]  }
 0x6bf   : > { %4435 = vmatpush1.bf16.msra.mxu0 %v8378_v54  ;;  %v8438_v54 = vld [vmem:[#allocation7 + $0x500] ss:$16 sps:$4 sm:$0xff]  }
 0x6c0   : > { %4436 = vmatprep.subr.bf16.mxu0 %v8386_v61  ;;  %v8446_v61 = vld [vmem:[#allocation7 + $0x524] ss:$16 sps:$4 sm:$0xff]  }
 0x6c3   : > { %4437 = vmatpush1.bf16.msra.mxu0 %v8384_v39  ;;  %v8444_v39 = vld [vmem:[#allocation7 + $0x520] ss:$16 sps:$4 sm:$0xff]  }
 0x6c4   : > { %5331 = vmatprep.subr.bf16.mxu0 %v8392_v7  ;;  %v8452_v7 = vld [vmem:[#allocation7 + $0x544] ss:$16 sps:$4 sm:$0xff]  }
 0x73b   : > { %v7544_v44 = vpop.f32.mrb[52].mxu0 }
 0x73c   : > { %v7545_v10 = vpop.f32.mrb[53].mxu0 }
 0x73d   : > { %v7546_v11 = vadd.f32 %v7545_v10, %v7544_v44  ;;  %v7547_v48 = vpop.f32.mrb[54].mxu0  ;;  %v8450_v44 = vld [vmem:[#allocation7 + $0x540] ss:$16 sps:$4 sm:$0xff]   ;;  %v8453_v10 = vld [vmem:[#allocation7 + $0x548] ss:$16 sps:$4 sm:$0xff]  }
 0x73e   : > { %v7548_v12 = vpop.f32.mrb[55].mxu0  ;;  %v8461_v48 = vld [vmem:[#allocation7 + $0x56c] ss:$16 sps:$4 sm:$0xff]  }
 0x73f   : > { %v3902_v13 = vadd.f32 %v7546_v11, %v7055_v16  ;;  %v8458_v11 = vld [vmem:[#allocation7 + $0x564] ss:$16 sps:$4 sm:$0xff]   ;;  %v8456_v12 = vld [vmem:[#allocation7 + $0x560] ss:$16 sps:$4 sm:$0xff]   ;;  %v8459_v16 = vld [vmem:[#allocation7 + $0x568] ss:$16 sps:$4 sm:$0xff]  }
 0x75b   : > { %v3941_v14 = vpop.f32.mrb[56].mxu0 }
 0x75c   : > { %v3942_v56 = vadd.f32 %v3941_v14, %v3902_v13  ;;  %v7720_v18 = vpop.f32.mrb[57].mxu0  ;;  %v8464_v13 = vld [vmem:[#allocation7 + $0x584] ss:$16 sps:$4 sm:$0xff]   ;;  %v8467_v14 = vld [vmem:[#allocation7 + $0x58c] ss:$16 sps:$4 sm:$0xff]  }
 0x75d   : > { %v3944_v50 = vpop.f32.mrb[58].mxu0  ;;  %v8465_v18 = vld [vmem:[#allocation7 + $0x588] ss:$16 sps:$4 sm:$0xff]  }
 0x75e   : > { %3947 = vst [vmem:[%s9527_s20] sm:$0xff] %v3942_v56  ;;  %v7721_v15 = vpop.f32.mrb[59].mxu0  ;;  %v8462_v56 = vld [vmem:[#allocation7 + $0x580] ss:$16 sps:$4 sm:$0xff]   ;;  %v8470_v50 = vld [vmem:[#allocation7 + $0x5a4] ss:$16 sps:$4 sm:$0xff]  }
 0x75f   : > { %v8473_v15 = vld [vmem:[#allocation7 + $0x5ac] ss:$16 sps:$4 sm:$0xff]  }
 0x779   : > { %v4224_v51 = vpop.f32.mrb[60].mxu0 }
 0x77a   : > { %v4261_v8 = vpack.c.bf16 %v4224_v51, %v4224_v51  ;;  %v7740_v22 = vpop.f32.mrb[61].mxu0  ;;  %v8468_v51 = vld [vmem:[#allocation7 + $0x5a0] ss:$16 sps:$4 sm:$0xff]  }
 0x77b   : > { %v8474_v22 = vld [vmem:[#allocation7 + $0x5c0] ss:$16 sps:$4 sm:$0xff]  }
 0x77c   : > { %4455 = vmatmul.mubr.bf16.vlgmr.msra.gmra.mrb[64].mxu0 %v4261_v8  ;;  %4496 = vmatmul.mubr.bf16.vlgmr.msra.gmra.mrb[52].mxu1 %v4261_v8  ;;  %v8479_v8 = vld [vmem:[#allocation7 + $0x5cc] ss:$16 sps:$4 sm:$0xff]  }
 0x77d   : > { %5332 = vmatpush1.bf16.msra.mxu0 %v8390_v20  ;;  %5414 = vmatpush1.bf16.msra.mxu1 %v8393_v21  ;;  %v8471_v20 = vld [vmem:[#allocation7 + $0x5a8] ss:$16 sps:$4 sm:$0xff]   ;;  %v8476_v21 = vld [vmem:[#allocation7 + $0x5c4] ss:$16 sps:$4 sm:$0xff]  }
 0x77e   : > { %5333 = vmatprep.subr.bf16.mxu0 %v8398_v9  ;;  %5415 = vmatprep.subr.bf16.mxu1 %v8401_v23  ;;  %v8477_v9 = vld [vmem:[#allocation7 + $0x5c8] ss:$16 sps:$4 sm:$0xff]   ;;  %v8482_v23 = vld [vmem:[#allocation7 + $0x5e4] ss:$16 sps:$4 sm:$0xff]  }
 0x781   : > { %5334 = vmatpush1.bf16.msra.mxu0 %v8396_v24  ;;  %5416 = vmatpush1.bf16.msra.mxu1 %v8399_v25  ;;  %v8485_v24 = vld [vmem:[#allocation7 + $0x5ec] ss:$16 sps:$4 sm:$0xff]   ;;  %v8480_v25 = vld [vmem:[#allocation7 + $0x5e0] ss:$16 sps:$4 sm:$0xff]  }
 0x782   : > { %5335 = vmatprep.subr.bf16.mxu0 %v8404_v27  ;;  %5417 = vmatprep.subr.bf16.mxu1 %v8407_v28  ;;  %v8483_v27 = vld [vmem:[#allocation7 + $0x5e8] ss:$16 sps:$4 sm:$0xff]   ;;  %v8488_v28 = vld [vmem:[#allocation7 + $0x604] ss:$16 sps:$4 sm:$0xff]  }
 0x785   : > { %5336 = vmatpush1.bf16.msra.mxu0 %v8402_v29  ;;  %5418 = vmatpush1.bf16.msra.mxu1 %v8405_v32  ;;  %v8491_v29 = vld [vmem:[#allocation7 + $0x60c] ss:$16 sps:$4 sm:$0xff]   ;;  %v7131_v32 = vld [vmem:[%s9663_s8 + $0x4] sm:$0xf] }
 0x786   : > { %5337 = vmatprep.subr.bf16.mxu0 %v8410_v1  ;;  %5419 = vmatprep.subr.bf16.mxu1 %v8413_v33  ;;  %v4510_v1 = vrot.slane %v7131_v32, %v9287_v52  ;;  %v4518_v33 = vrot.slane %v7131_v32, %v9314_v3 }
 0x789   : > { %5338 = vmatpush1.bf16.msra.mxu0 %v8408_v31  ;;  %5420 = vmatpush1.bf16.msra.mxu1 %v8411_v34 }
 0x78a   : > { %5339 = vmatprep.subr.bf16.mxu0 %v8416_v26  ;;  %5421 = vmatprep.subr.bf16.mxu1 %v8419_v35  ;;  %v4514_v26 = vrot.slane %v7131_v32, %v9290_v53  ;;  %v4522_v35 = vrot.slane %v7131_v32, %v9317_v6  ;;  %v8534_v32 = vld [vmem:[#allocation7 + $0x700] ss:$16 sps:$4 sm:$0xff]  }
 0x78d   : > { %5340 = vmatpush1.bf16.msra.mxu0 %v8414_v30  ;;  %5422 = vmatpush1.bf16.msra.mxu1 %v8417_v57 }
 0x78e   : > { %5341 = vmatprep.subr.bf16.mxu0 %v8422_v42  ;;  %5423 = vmatprep.subr.bf16.mxu1 %v8425_v47 }
 0x791   : > { %5342 = vmatpush1.bf16.msra.mxu0 %v8420_v62  ;;  %5424 = vmatpush1.bf16.msra.mxu1 %v8423_v5 }
 0x792   : > { %5343 = vmatprep.subr.bf16.mxu0 %v8428_v17  ;;  %5425 = vmatprep.subr.bf16.mxu1 %v8431_v19 }
 0x795   : > { %5344 = vmatpush1.bf16.msra.mxu0 %v8426_v36  ;;  %5426 = vmatpush1.bf16.msra.mxu1 %v8429_v37 }
 0x796   : > { %5345 = vmatprep.subr.bf16.mxu0 %v8434_v38  ;;  %5427 = vmatprep.subr.bf16.mxu1 %v8437_v40 }
 0x799   : > { %5346 = vmatpush1.bf16.msra.mxu0 %v8432_v41  ;;  %5428 = vmatpush1.bf16.msra.mxu1 %v8435_v55 }
 0x79a   : > { %5347 = vmatprep.subr.bf16.mxu0 %v8440_v43  ;;  %5429 = vmatprep.subr.bf16.mxu1 %v8443_v45 }
 0x79d   : > { %5348 = vmatpush1.bf16.msra.mxu0 %v8438_v54  ;;  %5430 = vmatpush1.bf16.msra.mxu1 %v8441_v60  ;;  %v8489_v60 = vld [vmem:[#allocation7 + $0x608] ss:$16 sps:$4 sm:$0xff]  }
 0x79e   : > { %5349 = vmatprep.subr.bf16.mxu0 %v8446_v61  ;;  %5431 = vmatprep.subr.bf16.mxu1 %v8449_v63 }
 0x7a1   : > { %5350 = vmatpush1.bf16.msra.mxu0 %v8444_v39  ;;  %5432 = vmatpush1.bf16.msra.mxu1 %v8447_v2  ;;  %v8492_v39 = vld [vmem:[#allocation7 + $0x620] ss:$16 sps:$4 sm:$0xff]   ;;  %v8495_v2 = vld [vmem:[#allocation7 + $0x628] ss:$16 sps:$4 sm:$0xff]  }
 0x7a2   : > { %5351 = vmatprep.subr.bf16.mxu0 %v8452_v7  ;;  %5433 = vmatprep.subr.bf16.mxu1 %v8455_v4  ;;  %v8500_v7 = vld [vmem:[#allocation7 + $0x644] ss:$16 sps:$4 sm:$0xff]   ;;  %v8503_v4 = vld [vmem:[#allocation7 + $0x64c] ss:$16 sps:$4 sm:$0xff]  }
 0x7a5   : > { %5352 = vmatpush1.bf16.msra.mxu0 %v8450_v44  ;;  %5434 = vmatpush1.bf16.msra.mxu1 %v8453_v10  ;;  %v8498_v44 = vld [vmem:[#allocation7 + $0x640] ss:$16 sps:$4 sm:$0xff]   ;;  %v8501_v10 = vld [vmem:[#allocation7 + $0x648] ss:$16 sps:$4 sm:$0xff]  }
 0x7a6   : > { %5353 = vmatprep.subr.bf16.mxu0 %v8458_v11  ;;  %5435 = vmatprep.subr.bf16.mxu1 %v8461_v48  ;;  %v8506_v11 = vld [vmem:[#allocation7 + $0x664] ss:$16 sps:$4 sm:$0xff]   ;;  %v8509_v48 = vld [vmem:[#allocation7 + $0x66c] ss:$16 sps:$4 sm:$0xff]  }
 0x7a9   : > { %5354 = vmatpush1.bf16.msra.mxu0 %v8456_v12  ;;  %5436 = vmatpush1.bf16.msra.mxu1 %v8459_v16  ;;  %v8504_v12 = vld [vmem:[#allocation7 + $0x660] ss:$16 sps:$4 sm:$0xff]   ;;  %v8507_v16 = vld [vmem:[#allocation7 + $0x668] ss:$16 sps:$4 sm:$0xff]  }
 0x7aa   : > { %5355 = vmatprep.subr.bf16.mxu0 %v8464_v13  ;;  %5437 = vmatprep.subr.bf16.mxu1 %v8467_v14  ;;  %v8512_v13 = vld [vmem:[#allocation7 + $0x684] ss:$16 sps:$4 sm:$0xff]   ;;  %v8515_v14 = vld [vmem:[#allocation7 + $0x68c] ss:$16 sps:$4 sm:$0xff]  }
 0x7ad   : > { %5356 = vmatpush1.bf16.msra.mxu0 %v8462_v56  ;;  %5438 = vmatpush1.bf16.msra.mxu1 %v8465_v18  ;;  %v8510_v56 = vld [vmem:[#allocation7 + $0x680] ss:$16 sps:$4 sm:$0xff]   ;;  %v8513_v18 = vld [vmem:[#allocation7 + $0x688] ss:$16 sps:$4 sm:$0xff]  }
 0x7ae   : > { %5357 = vmatprep.subr.bf16.mxu0 %v8470_v50  ;;  %5439 = vmatprep.subr.bf16.mxu1 %v8473_v15  ;;  %v8518_v50 = vld [vmem:[#allocation7 + $0x6a4] ss:$16 sps:$4 sm:$0xff]   ;;  %v8521_v15 = vld [vmem:[#allocation7 + $0x6ac] ss:$16 sps:$4 sm:$0xff]  }
 0x7b1   : > { %5358 = vmatpush1.bf16.msra.mxu0 %v8468_v51  ;;  %5440 = vmatpush1.bf16.msra.mxu1 %v8471_v20  ;;  %v8516_v51 = vld [vmem:[#allocation7 + $0x6a0] ss:$16 sps:$4 sm:$0xff]   ;;  %v8519_v20 = vld [vmem:[#allocation7 + $0x6a8] ss:$16 sps:$4 sm:$0xff]  }
 0x7b2   : > { %5359 = vmatprep.subr.bf16.mxu0 %v8476_v21  ;;  %5441 = vmatprep.subr.bf16.mxu1 %v8479_v8  ;;  %v8524_v21 = vld [vmem:[#allocation7 + $0x6c4] ss:$16 sps:$4 sm:$0xff]   ;;  %v8527_v8 = vld [vmem:[#allocation7 + $0x6cc] ss:$16 sps:$4 sm:$0xff]  }
 0x7b5   : > { %5360 = vmatpush1.bf16.msra.mxu0 %v8474_v22  ;;  %5442 = vmatpush1.bf16.msra.mxu1 %v8477_v9  ;;  %v8522_v22 = vld [vmem:[#allocation7 + $0x6c0] ss:$16 sps:$4 sm:$0xff]   ;;  %v8525_v9 = vld [vmem:[#allocation7 + $0x6c8] ss:$16 sps:$4 sm:$0xff]  }
 0x7b6   : > { %5361 = vmatprep.subr.bf16.mxu0 %v8482_v23  ;;  %5443 = vmatprep.subr.bf16.mxu1 %v8485_v24  ;;  %v8530_v23 = vld [vmem:[#allocation7 + $0x6e4] ss:$16 sps:$4 sm:$0xff]   ;;  %v8533_v24 = vld [vmem:[#allocation7 + $0x6ec] ss:$16 sps:$4 sm:$0xff]  }
 0x7b9   : > { %5362 = vmatpush1.bf16.msra.mxu0 %v8480_v25  ;;  %5444 = vmatpush1.bf16.msra.mxu1 %v8483_v27  ;;  %v8528_v25 = vld [vmem:[#allocation7 + $0x6e0] ss:$16 sps:$4 sm:$0xff]   ;;  %v8531_v27 = vld [vmem:[#allocation7 + $0x6e8] ss:$16 sps:$4 sm:$0xff]  }
 0x7ba   : > { %5372 = vmatprep.subr.bf16.mxu0 %v8488_v28  ;;  %5454 = vmatprep.subr.bf16.mxu1 %v8491_v29  ;;  %v8536_v28 = vld [vmem:[#allocation7 + $0x704] ss:$16 sps:$4 sm:$0xff]   ;;  %v8539_v29 = vld [vmem:[#allocation7 + $0x70c] ss:$16 sps:$4 sm:$0xff]  }
 0x84f   : > { %v4456_v31 = vpop.f32.mrb[64].mxu0  ;;  %v4497_v34 = vpop.f32.mrb[52].mxu1 }
 0x850   : > { %v4457_v30 = vadd.f32 %v4456_v31, %v9300_v58  ;;  %v4498_v57 = vadd.f32 %v4497_v34, %v9373_v46  ;;  %v4458_v42 = vpop.f32.mrb[65].mxu0  ;;  %v4499_v47 = vpop.f32.mrb[53].mxu1  ;;  %v8486_v46 = vld [vmem:[#allocation7 + $0x600] ss:$16 sps:$4 sm:$0xff]   ;;  %v8545_v31 = vld [vmem:[#allocation7 + $0x72c] ss:$16 sps:$4 sm:$0xff]  }
 0x851   : > { %v4459_v62 = vadd.f32 %v4458_v42, %v9302_v59  ;;  %v4500_v5 = vadd.f32 %v4499_v47, %v9375_v49  ;;  %v4460_v17 = vpop.f32.mrb[66].mxu0  ;;  %v4501_v19 = vpop.f32.mrb[54].mxu1  ;;  %v8494_v59 = vld [vmem:[#allocation7 + $0x624] ss:$16 sps:$4 sm:$0xff]   ;;  %v8497_v49 = vld [vmem:[#allocation7 + $0x62c] ss:$16 sps:$4 sm:$0xff]  }
 0x852   : > { %v4527_v36 = vadd.f32 %v4510_v1, %v4457_v30  ;;  %v9541_v37 = vadd.f32 %v4518_v33, %v4498_v57  ;;  %v4461_v38 = vpop.f32.mrb[67].mxu0  ;;  %v4502_v40 = vpop.f32.mrb[55].mxu1  ;;  %v8537_v1 = vld [vmem:[#allocation7 + $0x708] ss:$16 sps:$4 sm:$0xff]   ;;  %v8542_v33 = vld [vmem:[#allocation7 + $0x724] ss:$16 sps:$4 sm:$0xff]  }
 0x853   : > { %v4528_v41 = vadd.f32 %v4514_v26, %v4459_v62  ;;  %v4530_v55 = vadd.f32 %v4522_v35, %v4500_v5  ;;  %v8540_v34 = vld [vmem:[#allocation7 + $0x720] ss:$16 sps:$4 sm:$0xff]   ;;  %v8543_v26 = vld [vmem:[#allocation7 + $0x728] ss:$16 sps:$4 sm:$0xff]   ;;  %v8548_v35 = vld [vmem:[#allocation7 + $0x744] ss:$16 sps:$4 sm:$0xff]  }
 0x854   : > { %v4531_v43 = vmax.f32 %v4527_v36, 0.0  ;;  %v8551_v30 = vld [vmem:[#allocation7 + $0x74c] ss:$16 sps:$4 sm:$0xff]   ;;  %v8546_v57 = vld [vmem:[#allocation7 + $0x740] ss:$16 sps:$4 sm:$0xff]  }
 0x855   : > { %v4532_v45 = vmax.f32 %v4528_v41, 0.0  ;;  %v4534_v58 = vmax.f32 %v4530_v55, 0.0  ;;  %v8549_v42 = vld [vmem:[#allocation7 + $0x748] ss:$16 sps:$4 sm:$0xff]   ;;  %v8554_v47 = vld [vmem:[#allocation7 + $0x764] ss:$16 sps:$4 sm:$0xff]  }
 0x856   : > { %v4664_v61 = vpack.c.bf16 %v4531_v43, %v4531_v43  ;;  %v8557_v62 = vld [vmem:[#allocation7 + $0x76c] ss:$16 sps:$4 sm:$0xff]   ;;  %v8552_v5 = vld [vmem:[#allocation7 + $0x760] ss:$16 sps:$4 sm:$0xff]   ;;  %v8555_v17 = vld [vmem:[#allocation7 + $0x768] ss:$16 sps:$4 sm:$0xff]  }
 0x857   : > { %v4665_v54 = vpack.c.bf16 %v4532_v45, %v4532_v45  ;;  %v4667_v63 = vpack.c.bf16 %v4534_v58, %v4534_v58  ;;  %v8560_v19 = vld [vmem:[#allocation7 + $0x784] ss:$16 sps:$4 sm:$0xff]   ;;  %v8563_v36 = vld [vmem:[#allocation7 + $0x78c] ss:$16 sps:$4 sm:$0xff]   ;;  %v8558_v38 = vld [vmem:[#allocation7 + $0x780] ss:$16 sps:$4 sm:$0xff]  }
 0x858   : > { %v8561_v40 = vld [vmem:[#allocation7 + $0x788] ss:$16 sps:$4 sm:$0xff]   ;;  %v8566_v41 = vld [vmem:[#allocation7 + $0x7a4] ss:$16 sps:$4 sm:$0xff]   ;;  %v8569_v55 = vld [vmem:[#allocation7 + $0x7ac] ss:$16 sps:$4 sm:$0xff]  }
 0x859   : > { %5363 = vmatprep.mubr.bf16.mxu0 %v4665_v54  ;;  %5445 = vmatprep.mubr.bf16.mxu1 %v4665_v54  ;;  %v8564_v43 = vld [vmem:[#allocation7 + $0x7a0] ss:$16 sps:$4 sm:$0xff]   ;;  %v8567_v45 = vld [vmem:[#allocation7 + $0x7a8] ss:$16 sps:$4 sm:$0xff]   ;;  %v8572_v58 = vld [vmem:[#allocation7 + $0x7c4] ss:$16 sps:$4 sm:$0xff]  }
 0x85a   : > { %5364 = vmatmul.mubr.bf16.vlgmr.msra.gmra.mrb[68].mxu0 %v4664_v61  ;;  %5446 = vmatmul.mubr.bf16.vlgmr.msra.gmra.mrb[56].mxu1 %v4664_v61  ;;  %v8575_v54 = vld [vmem:[#allocation7 + $0x7cc] ss:$16 sps:$4 sm:$0xff]   ;;  %v8578_v61 = vld [vmem:[#allocation7 + $0x7e4] ss:$16 sps:$4 sm:$0xff]  }
 0x85b   : > { %5373 = vmatpush1.bf16.msra.mxu0 %v8486_v46  ;;  %5455 = vmatpush1.bf16.msra.mxu1 %v8489_v60  ;;  %v8570_v46 = vld [vmem:[#allocation7 + $0x7c0] ss:$16 sps:$4 sm:$0xff]   ;;  %v8573_v60 = vld [vmem:[#allocation7 + $0x7c8] ss:$16 sps:$4 sm:$0xff]  }
 0x85c   : > { %5404 = vmatprep.mubr.bf16.mxu0 %v4667_v63  ;;  %5486 = vmatprep.mubr.bf16.mxu1 %v4667_v63  ;;  %v8579_v63 = vld [vmem:[#allocation7 + $0x7e8] ss:$16 sps:$4 sm:$0xff]  }
 0x85d   : > { %5374 = vmatprep.subr.bf16.mxu0 %v8494_v59  ;;  %5456 = vmatprep.subr.bf16.mxu1 %v8497_v49  ;;  %v8581_v59 = vld [vmem:[#allocation7 + $0x7ec] ss:$16 sps:$4 sm:$0xff]   ;;  %v8576_v49 = vld [vmem:[#allocation7 + $0x7e0] ss:$16 sps:$4 sm:$0xff]  }
 0x85f   : > { %5375 = vmatpush1.bf16.msra.mxu0 %v8492_v39  ;;  %5457 = vmatpush1.bf16.msra.mxu1 %v8495_v2  ;;  %v4533_v39 = vmax.f32 %v9541_v37, 0.0  ;;  %v8584_v2 = vld [vmem:[#allocation9 + $0x304] ss:$12 sps:$4 sm:$0xff]   ;;  %v8590_v37 = vld [vmem:[#allocation9 + $0x334] ss:$12 sps:$4 sm:$0xff]  }
 0x860   : > { %5376 = vmatprep.subr.bf16.mxu0 %v8500_v7  ;;  %5458 = vmatprep.subr.bf16.mxu1 %v8503_v4  ;;  %v8609_v7 = vld [vmem:[#allocation9 + $0x3c8] ss:$12 sps:$4 sm:$0xff]   ;;  %v8582_v4 = vld [vmem:[#allocation9 + $0x300] ss:$12 sps:$4 sm:$0xff]  }
 0x863   : > { %5377 = vmatpush1.bf16.msra.mxu0 %v8498_v44  ;;  %5459 = vmatpush1.bf16.msra.mxu1 %v8501_v10  ;;  %v8610_v44 = vld [vmem:[#allocation9 + $0x308] ss:$12 sps:$4 sm:$0xff]   ;;  %v4666_v10 = vpack.c.bf16 %v4533_v39, %v4533_v39 }
 0x864   : > { %5378 = vmatprep.subr.bf16.mxu0 %v8506_v11  ;;  %5460 = vmatprep.subr.bf16.mxu1 %v8509_v48  ;;  %v8587_v11 = vld [vmem:[#allocation9 + $0x31c] ss:$12 sps:$4 sm:$0xff]   ;;  %v8614_v48 = vld [vmem:[#allocation9 + $0x3e0] ss:$12 sps:$4 sm:$0xff]  }
 0x867   : > { %5379 = vmatpush1.bf16.msra.mxu0 %v8504_v12  ;;  %5461 = vmatpush1.bf16.msra.mxu1 %v8507_v16  ;;  %v8585_v12 = vld [vmem:[#allocation9 + $0x318] ss:$12 sps:$4 sm:$0xff]   ;;  %v8615_v16 = vld [vmem:[#allocation9 + $0x320] ss:$12 sps:$4 sm:$0xff]  }
 0x868   : > { %5380 = vmatprep.subr.bf16.mxu0 %v8512_v13  ;;  %5462 = vmatprep.subr.bf16.mxu1 %v8515_v14  ;;  %v8619_v13 = vld [vmem:[#allocation9 + $0x3f8] ss:$12 sps:$4 sm:$0xff]   ;;  %v8588_v14 = vld [vmem:[#allocation9 + $0x330] ss:$12 sps:$4 sm:$0xff]  }
 0x86b   : > { %5381 = vmatpush1.bf16.msra.mxu0 %v8510_v56  ;;  %5463 = vmatpush1.bf16.msra.mxu1 %v8513_v18  ;;  %v8620_v56 = vld [vmem:[#allocation9 + $0x338] ss:$12 sps:$4 sm:$0xff]  }
 0x86c   : > { %5382 = vmatprep.subr.bf16.mxu0 %v8518_v50  ;;  %5464 = vmatprep.subr.bf16.mxu1 %v8521_v15  ;;  %v8593_v18 = vld [vmem:[#allocation9 + $0x34c] ss:$12 sps:$4 sm:$0xff]   ;;  %v8624_v50 = vld [vmem:[#allocation9 + $0x410] ss:$12 sps:$4 sm:$0xff]   ;;  %v8591_v15 = vld [vmem:[#allocation9 + $0x348] ss:$12 sps:$4 sm:$0xff]  }
 0x86f   : > { %5383 = vmatpush1.bf16.msra.mxu0 %v8516_v51  ;;  %5465 = vmatpush1.bf16.msra.mxu1 %v8519_v20  ;;  %v8625_v51 = vld [vmem:[#allocation9 + $0x350] ss:$12 sps:$4 sm:$0xff]  }
 0x870   : > { %5384 = vmatprep.subr.bf16.mxu0 %v8524_v21  ;;  %5466 = vmatprep.subr.bf16.mxu1 %v8527_v8  ;;  %v8596_v20 = vld [vmem:[#allocation9 + $0x364] ss:$12 sps:$4 sm:$0xff]   ;;  %v8629_v21 = vld [vmem:[#allocation9 + $0x428] ss:$12 sps:$4 sm:$0xff]   ;;  %v8594_v8 = vld [vmem:[#allocation9 + $0x360] ss:$12 sps:$4 sm:$0xff]  }
 0x873   : > { %5385 = vmatpush1.bf16.msra.mxu0 %v8522_v22  ;;  %5467 = vmatpush1.bf16.msra.mxu1 %v8525_v9  ;;  %v8630_v22 = vld [vmem:[#allocation9 + $0x368] ss:$12 sps:$4 sm:$0xff]  }
 0x874   : > { %5386 = vmatprep.subr.bf16.mxu0 %v8530_v23  ;;  %5468 = vmatprep.subr.bf16.mxu1 %v8533_v24  ;;  %v8599_v9 = vld [vmem:[#allocation9 + $0x37c] ss:$12 sps:$4 sm:$0xff]   ;;  %v8634_v23 = vld [vmem:[#allocation9 + $0x440] ss:$12 sps:$4 sm:$0xff]   ;;  %v8597_v24 = vld [vmem:[#allocation9 + $0x378] ss:$12 sps:$4 sm:$0xff]  }
 0x877   : > { %5387 = vmatpush1.bf16.msra.mxu0 %v8528_v25  ;;  %5469 = vmatpush1.bf16.msra.mxu1 %v8531_v27  ;;  %v8635_v25 = vld [vmem:[#allocation9 + $0x380] ss:$12 sps:$4 sm:$0xff]  }
 0x878   : > { %5388 = vmatprep.subr.bf16.mxu0 %v8536_v28  ;;  %5470 = vmatprep.subr.bf16.mxu1 %v8539_v29  ;;  %v8602_v27 = vld [vmem:[#allocation9 + $0x394] ss:$12 sps:$4 sm:$0xff]   ;;  %v8600_v28 = vld [vmem:[#allocation9 + $0x390] ss:$12 sps:$4 sm:$0xff]   ;;  %v8605_v29 = vld [vmem:[#allocation9 + $0x3ac] ss:$12 sps:$4 sm:$0xff]  }
 0x87b   : > { %5389 = vmatpush1.bf16.msra.mxu0 %v8534_v32  ;;  %5471 = vmatpush1.bf16.msra.mxu1 %v8537_v1  ;;  %v8603_v32 = vld [vmem:[#allocation9 + $0x3a8] ss:$12 sps:$4 sm:$0xff]   ;;  %v8608_v1 = vld [vmem:[#allocation9 + $0x3c4] ss:$12 sps:$4 sm:$0xff]  }
 0x87c   : > { %5390 = vmatprep.subr.bf16.mxu0 %v8542_v33  ;;  %5472 = vmatprep.subr.bf16.mxu1 %v8545_v31  ;;  %v8606_v33 = vld [vmem:[#allocation9 + $0x3c0] ss:$12 sps:$4 sm:$0xff]   ;;  %v8613_v31 = vld [vmem:[#allocation9 + $0x3dc] ss:$12 sps:$4 sm:$0xff]  }
 0x87f   : > { %5391 = vmatpush1.bf16.msra.mxu0 %v8540_v34  ;;  %5473 = vmatpush1.bf16.msra.mxu1 %v8543_v26  ;;  %v8611_v34 = vld [vmem:[#allocation9 + $0x3d8] ss:$12 sps:$4 sm:$0xff]   ;;  %v8618_v26 = vld [vmem:[#allocation9 + $0x3f4] ss:$12 sps:$4 sm:$0xff]  }
 0x880   : > { %5392 = vmatprep.subr.bf16.mxu0 %v8548_v35  ;;  %5474 = vmatprep.subr.bf16.mxu1 %v8551_v30  ;;  %v8616_v35 = vld [vmem:[#allocation9 + $0x3f0] ss:$12 sps:$4 sm:$0xff]   ;;  %v8623_v30 = vld [vmem:[#allocation9 + $0x40c] ss:$12 sps:$4 sm:$0xff]  }
 0x883   : > { %5393 = vmatpush1.bf16.msra.mxu0 %v8546_v57  ;;  %5475 = vmatpush1.bf16.msra.mxu1 %v8549_v42  ;;  %v8621_v57 = vld [vmem:[#allocation9 + $0x408] ss:$12 sps:$4 sm:$0xff]   ;;  %v8628_v42 = vld [vmem:[#allocation9 + $0x424] ss:$12 sps:$4 sm:$0xff]  }
 0x884   : > { %5394 = vmatprep.subr.bf16.mxu0 %v8554_v47  ;;  %5476 = vmatprep.subr.bf16.mxu1 %v8557_v62  ;;  %v8626_v47 = vld [vmem:[#allocation9 + $0x420] ss:$12 sps:$4 sm:$0xff]   ;;  %v8633_v62 = vld [vmem:[#allocation9 + $0x43c] ss:$12 sps:$4 sm:$0xff]  }
 0x887   : > { %5395 = vmatpush1.bf16.msra.mxu0 %v8552_v5  ;;  %5477 = vmatpush1.bf16.msra.mxu1 %v8555_v17  ;;  %v8631_v5 = vld [vmem:[#allocation9 + $0x438] ss:$12 sps:$4 sm:$0xff]   ;;  %v8638_v17 = vld [vmem:[#allocation9 + $0x454] ss:$12 sps:$4 sm:$0xff]  }
 0x888   : > { %5396 = vmatprep.subr.bf16.mxu0 %v8560_v19  ;;  %5478 = vmatprep.subr.bf16.mxu1 %v8563_v36  ;;  %v8639_v19 = vld [vmem:[#allocation9 + $0x458] ss:$12 sps:$4 sm:$0xff]   ;;  %v8636_v36 = vld [vmem:[#allocation9 + $0x450] ss:$12 sps:$4 sm:$0xff]  }
 0x88b   : > { %5397 = vmatpush1.bf16.msra.mxu0 %v8558_v38  ;;  %5479 = vmatpush1.bf16.msra.mxu1 %v8561_v40  ;;  %v8640_v38 = vld [vmem:[#allocation9 + $0x398] ss:$12 sps:$4 sm:$0xff]  }
 0x88c   : > { %5398 = vmatprep.subr.bf16.mxu0 %v8566_v41  ;;  %5480 = vmatprep.subr.bf16.mxu1 %v8569_v55  ;;  %v8643_v40 = vld [vmem:[#allocation9 + $0x46c] ss:$12 sps:$4 sm:$0xff]   ;;  %v8644_v41 = vld [vmem:[#allocation9 + $0x470] ss:$12 sps:$4 sm:$0xff]   ;;  %v8641_v55 = vld [vmem:[#allocation9 + $0x468] ss:$12 sps:$4 sm:$0xff]  }
 0x88f   : > { %5399 = vmatpush1.bf16.msra.mxu0 %v8564_v43  ;;  %5481 = vmatpush1.bf16.msra.mxu1 %v8567_v45  ;;  %v8645_v43 = vld [vmem:[#allocation9 + $0x3b0] ss:$12 sps:$4 sm:$0xff]  }
 0x890   : > { %5400 = vmatprep.subr.bf16.mxu0 %v8572_v58  ;;  %5482 = vmatprep.subr.bf16.mxu1 %v8575_v54  ;;  %v8648_v45 = vld [vmem:[#allocation9 + $0x484] ss:$12 sps:$4 sm:$0xff]   ;;  %v8649_v58 = vld [vmem:[#allocation9 + $0x548] ss:$12 sps:$4 sm:$0xff]  }
 0x891   : > { %v9547_v54 = vld [vmem:[%s9666_s11 + $0x4] sm:$0xf] }
 0x893   : > { %5401 = vmatpush1.bf16.msra.mxu0 %v8570_v46  ;;  %5483 = vmatpush1.bf16.msra.mxu1 %v8573_v60  ;;  %v4674_v46 = vrot.slane %v9547_v54, %v9287_v52  ;;  %v4678_v60 = vrot.slane %v9547_v54, %v9290_v53 }
 0x894   : > { %5402 = vmatprep.subr.bf16.mxu0 %v8578_v61  ;;  %5484 = vmatprep.subr.bf16.mxu1 %v8581_v59  ;;  %v4686_v61 = vrot.slane %v9547_v54, %v9317_v6  ;;  %v8653_v6 = vld [vmem:[#allocation9 + $0x49c] ss:$12 sps:$4 sm:$0xff]  }
 0x897   : > { %5403 = vmatpush1.bf16.msra.mxu0 %v8576_v49  ;;  %5485 = vmatpush1.bf16.msra.mxu1 %v8579_v63 }
 0x898   : > { %6162 = vmatprep.subr.bf16.mxu0 %v8584_v2  ;;  %7608 = vmatprep.subr.bf16.mxu1 %v8609_v7 }
 0x89a   : > { %5405 = vmatmul.mubr.bf16.vlgmr.msra.gmra.mrb[68].mxu0 %v4666_v10  ;;  %5487 = vmatmul.mubr.bf16.vlgmr.msra.gmra.mrb[56].mxu1 %v4666_v10 }
 0x89b   : > { %6163 = vmatpush1.bf16.msra.mxu0 %v8582_v4  ;;  %7609 = vmatpush3.bf16.msra.mxu1 %v8610_v44 }
 0x89c   : > { %6164 = vmatprep.subr.bf16.mxu0 %v8587_v11  ;;  %7610 = vmatprep.subr.bf16.mxu1 %v8614_v48 }
 0x89f   : > { %6165 = vmatpush1.bf16.msra.mxu0 %v8585_v12  ;;  %7611 = vmatpush3.bf16.msra.mxu1 %v8615_v16 }
 0x8a0   : > { %6166 = vmatprep.subr.bf16.mxu0 %v8590_v37  ;;  %7612 = vmatprep.subr.bf16.mxu1 %v8619_v13 }
 0x8a3   : > { %6167 = vmatpush1.bf16.msra.mxu0 %v8588_v14  ;;  %7613 = vmatpush3.bf16.msra.mxu1 %v8620_v56  ;;  %v8646_v14 = vld [vmem:[#allocation9 + $0x480] ss:$12 sps:$4 sm:$0xff]   ;;  %v8650_v56 = vld [vmem:[#allocation9 + $0x488] ss:$12 sps:$4 sm:$0xff]  }
 0x8a4   : > { %6168 = vmatprep.subr.bf16.mxu0 %v8593_v18  ;;  %7614 = vmatprep.subr.bf16.mxu1 %v8624_v50  ;;  %v8654_v50 = vld [vmem:[#allocation9 + $0x560] ss:$12 sps:$4 sm:$0xff]  }
 0x8a7   : > { %6169 = vmatpush1.bf16.msra.mxu0 %v8591_v15  ;;  %7615 = vmatpush3.bf16.msra.mxu1 %v8625_v51  ;;  %v8651_v51 = vld [vmem:[#allocation9 + $0x498] ss:$12 sps:$4 sm:$0xff]  }
 0x8a8   : > { %6170 = vmatprep.subr.bf16.mxu0 %v8596_v20  ;;  %7616 = vmatprep.subr.bf16.mxu1 %v8629_v21  ;;  %v8655_v20 = vld [vmem:[#allocation9 + $0x4a0] ss:$12 sps:$4 sm:$0xff]  }
 0x8a9   : > { %v8658_v21 = vld [vmem:[#allocation9 + $0x4b4] ss:$12 sps:$4 sm:$0xff]  }
 0x8ab   : > { %6171 = vmatpush1.bf16.msra.mxu0 %v8594_v8  ;;  %7617 = vmatpush3.bf16.msra.mxu1 %v8630_v22  ;;  %v8659_v8 = vld [vmem:[#allocation9 + $0x578] ss:$12 sps:$4 sm:$0xff]   ;;  %v8656_v22 = vld [vmem:[#allocation9 + $0x4b0] ss:$12 sps:$4 sm:$0xff]  }
 0x8ac   : > { %6172 = vmatprep.subr.bf16.mxu0 %v8599_v9  ;;  %7618 = vmatprep.subr.bf16.mxu1 %v8634_v23  ;;  %v8660_v9 = vld [vmem:[#allocation9 + $0x4b8] ss:$12 sps:$4 sm:$0xff]  }
 0x8ad   : > { %v8663_v23 = vld [vmem:[#allocation9 + $0x4cc] ss:$12 sps:$4 sm:$0xff]  }
 0x8af   : > { %6173 = vmatpush1.bf16.msra.mxu0 %v8597_v24  ;;  %7619 = vmatpush3.bf16.msra.mxu1 %v8635_v25  ;;  %v8664_v24 = vld [vmem:[#allocation9 + $0x590] ss:$12 sps:$4 sm:$0xff]   ;;  %v8661_v25 = vld [vmem:[#allocation9 + $0x4c8] ss:$12 sps:$4 sm:$0xff]  }
 0x8b0   : > { %6174 = vmatprep.subr.bf16.mxu0 %v8602_v27  ;;  %7620 = vmatprep.subr.bf16.mxu1 %v8639_v19  ;;  %v8665_v27 = vld [vmem:[#allocation9 + $0x4d0] ss:$12 sps:$4 sm:$0xff]   ;;  %v8681_v19 = vld [vmem:[#allocation9 + $0x528] ss:$12 sps:$4 sm:$0xff]  }
 0x8b3   : > { %6175 = vmatpush1.bf16.msra.mxu0 %v8600_v28  ;;  %7621 = vmatpush3.bf16.msra.mxu1 %v8640_v38  ;;  %v8668_v28 = vld [vmem:[#allocation9 + $0x4e4] ss:$12 sps:$4 sm:$0xff]  }
 0x8b4   : > { %6176 = vmatprep.subr.bf16.mxu0 %v8605_v29  ;;  %7622 = vmatprep.subr.bf16.mxu1 %v8644_v41  ;;  %v8669_v29 = vld [vmem:[#allocation9 + $0x5a8] ss:$12 sps:$4 sm:$0xff]   ;;  %v8686_v41 = vld [vmem:[#allocation9 + $0x540] ss:$12 sps:$4 sm:$0xff]  }
 0x8b7   : > { %6177 = vmatpush1.bf16.msra.mxu0 %v8603_v32  ;;  %7623 = vmatpush3.bf16.msra.mxu1 %v8645_v43  ;;  %v8666_v32 = vld [vmem:[#allocation9 + $0x4e0] ss:$12 sps:$4 sm:$0xff]   ;;  %v8691_v43 = vld [vmem:[#allocation9 + $0x55c] ss:$12 sps:$4 sm:$0xff]  }
 0x8b8   : > { %6178 = vmatprep.subr.bf16.mxu0 %v8608_v1  ;;  %7630 = vmatprep.subr.bf16.mxu1 %v8649_v58  ;;  %v8670_v1 = vld [vmem:[#allocation9 + $0x4e8] ss:$12 sps:$4 sm:$0xff]  }
 0x8b9   : > { %v8694_v58 = vld [vmem:[#allocation9 + $0x574] ss:$12 sps:$4 sm:$0xff]  }
 0x8bb   : > { %6179 = vmatpush1.bf16.msra.mxu0 %v8606_v33  ;;  %v8673_v33 = vld [vmem:[#allocation9 + $0x4fc] ss:$12 sps:$4 sm:$0xff]  }
 0x8bc   : > { %6180 = vmatprep.subr.bf16.mxu0 %v8613_v31  ;;  %v8674_v31 = vld [vmem:[#allocation9 + $0x5c0] ss:$12 sps:$4 sm:$0xff]  }
 0x8bf   : > { %6181 = vmatpush1.bf16.msra.mxu0 %v8611_v34  ;;  %v8671_v34 = vld [vmem:[#allocation9 + $0x4f8] ss:$12 sps:$4 sm:$0xff]  }
 0x8c0   : > { %6182 = vmatprep.subr.bf16.mxu0 %v8618_v26  ;;  %v8675_v26 = vld [vmem:[#allocation9 + $0x500] ss:$12 sps:$4 sm:$0xff]  }
 0x8c3   : > { %6183 = vmatpush1.bf16.msra.mxu0 %v8616_v35  ;;  %v4682_v35 = vrot.slane %v9547_v54, %v9314_v3  ;;  %v8692_v54 = vld [vmem:[#allocation9 + $0x570] ss:$12 sps:$4 sm:$0xff]  }
 0x8c4   : > { %6184 = vmatprep.subr.bf16.mxu0 %v8623_v30  ;;  %v8678_v30 = vld [vmem:[#allocation9 + $0x514] ss:$12 sps:$4 sm:$0xff]  }
 0x8c7   : > { %6185 = vmatpush1.bf16.msra.mxu0 %v8621_v57  ;;  %v8679_v57 = vld [vmem:[#allocation9 + $0x5d8] ss:$12 sps:$4 sm:$0xff]  }
 0x8c8   : > { %6186 = vmatprep.subr.bf16.mxu0 %v8628_v42  ;;  %v8676_v42 = vld [vmem:[#allocation9 + $0x510] ss:$12 sps:$4 sm:$0xff]  }
 0x8cb   : > { %6187 = vmatpush1.bf16.msra.mxu0 %v8626_v47  ;;  %v8680_v47 = vld [vmem:[#allocation9 + $0x518] ss:$12 sps:$4 sm:$0xff]  }
 0x8cc   : > { %6188 = vmatprep.subr.bf16.mxu0 %v8633_v62 }
 0x8cf   : > { %6189 = vmatpush1.bf16.msra.mxu0 %v8631_v5  ;;  %v8683_v5 = vld [vmem:[#allocation9 + $0x52c] ss:$12 sps:$4 sm:$0xff]  }
 0x8d0   : > { %6190 = vmatprep.subr.bf16.mxu0 %v8638_v17  ;;  %v8684_v17 = vld [vmem:[#allocation9 + $0x5f0] ss:$12 sps:$4 sm:$0xff]  }
 0x8d3   : > { %6191 = vmatpush1.bf16.msra.mxu0 %v8636_v36  ;;  %v8685_v36 = vld [vmem:[#allocation9 + $0x530] ss:$12 sps:$4 sm:$0xff]  }
 0x8d4   : > { %6192 = vmatprep.subr.bf16.mxu0 %v8643_v40  ;;  %v8688_v40 = vld [vmem:[#allocation9 + $0x544] ss:$12 sps:$4 sm:$0xff]  }
 0x8d7   : > { %6193 = vmatpush1.bf16.msra.mxu0 %v8641_v55 }
 0x8d8   : > { %6203 = vmatprep.subr.bf16.mxu0 %v8648_v45  ;;  %v8689_v45 = vld [vmem:[#allocation9 + $0x558] ss:$12 sps:$4 sm:$0xff]  }
 0x96d   : > { %v5406_v59 = vpop.f32.mrb[68].mxu0  ;;  %v9555_v49 = vpop.f32.mrb[56].mxu1 }
 0x96e   : > { %v7815_v63 = vadd.f32 %v5406_v59, %v4674_v46  ;;  %v5408_v39 = vpop.f32.mrb[69].mxu0  ;;  %v5490_v2 = vpop.f32.mrb[57].mxu1  ;;  %v7817_v62 = vadd.f32 %v9555_v49, %v4682_v35  ;;  %v8697_v46 = vld [vmem:[#allocation9 + $0x58c] ss:$12 sps:$4 sm:$0xff]   ;;  %v8703_v49 = vld [vmem:[#allocation9 + $0x5bc] ss:$12 sps:$4 sm:$0xff]  }
 0x96f   : > { %v7816_v7 = vadd.f32 %v5408_v39, %v4678_v60  ;;  %v7818_v4 = vadd.f32 %v5490_v2, %v4686_v61  ;;  %v5410_v44 = vpop.f32.mrb[70].mxu0  ;;  %v5492_v10 = vpop.f32.mrb[58].mxu1  ;;  %v8695_v60 = vld [vmem:[#allocation9 + $0x588] ss:$12 sps:$4 sm:$0xff]   ;;  %v8700_v61 = vld [vmem:[#allocation9 + $0x5a4] ss:$12 sps:$4 sm:$0xff]  }
 0x970   : > { %v5495_v11 = vmax.f32 %v7815_v63, 0.0  ;;  %v5411_v48 = vpop.f32.mrb[71].mxu0  ;;  %v5493_v12 = vpop.f32.mrb[59].mxu1  ;;  %v5497_v38 = vmax.f32 %v7817_v62, 0.0  ;;  %v8698_v59 = vld [vmem:[#allocation9 + $0x5a0] ss:$12 sps:$4 sm:$0xff]  }
 0x971   : > { %v5496_v16 = vmax.f32 %v7816_v7, 0.0  ;;  %v5498_v37 = vmax.f32 %v7818_v4, 0.0  ;;  %v8701_v63 = vld [vmem:[#allocation9 + $0x5b8] ss:$12 sps:$4 sm:$0xff]   ;;  %v8706_v39 = vld [vmem:[#allocation9 + $0x5d4] ss:$12 sps:$4 sm:$0xff]  }
 0x972   : > { %v5628_v18 = vpack.c.bf16 %v5495_v11, %v5495_v11  ;;  %v5630_v55 = vpack.c.bf16 %v5497_v38, %v5497_v38  ;;  %v8704_v2 = vld [vmem:[#allocation9 + $0x5d0] ss:$12 sps:$4 sm:$0xff]   ;;  %v8709_v7 = vld [vmem:[#allocation9 + $0x5ec] ss:$12 sps:$4 sm:$0xff]   ;;  %v8707_v4 = vld [vmem:[#allocation9 + $0x5e8] ss:$12 sps:$4 sm:$0xff]  }
 0x973   : > { %v5629_v13 = vpack.c.bf16 %v5496_v16, %v5496_v16  ;;  %v5631_v15 = vpack.c.bf16 %v5498_v37, %v5498_v37  ;;  %v8710_v44 = vld [vmem:[%s9669_s14 + $0x100] sm:$0xff]   ;;  %v8712_v11 = vld [vmem:[%s9669_s14 + $0x108] sm:$0xff]   ;;  %v8714_v12 = vld [vmem:[%s9669_s14 + $0x110] sm:$0xff]  }
 0x974   : > { %v8711_v10 = vld [vmem:[%s9669_s14 + $0xc0] sm:$0xff]   ;;  %v8713_v48 = vld [vmem:[%s9669_s14 + $0xc8] sm:$0xff]   ;;  %v8715_v16 = vld [vmem:[%s9669_s14 + $0xd0] sm:$0xff]  }
 0x975   : > { %6194 = vmatprep.mubr.bf16.mxu0 %v5629_v13  ;;  %6276 = vmatprep.mubr.bf16.mxu1 %v5629_v13  ;;  %v8716_v37 = vld [vmem:[%s9669_s14 + $0x118] sm:$0xff]  }
 0x976   : > { %6195 = vmatmul.mubr.bf16.vlgmr.msra.gmra.mrb[72].mxu0 %v5628_v18  ;;  %6277 = vmatmul.mubr.bf16.vlgmr.msra.gmra.mrb[60].mxu1 %v5628_v18  ;;  %v8717_v13 = vld [vmem:[%s9669_s14 + $0xd8] sm:$0xff]   ;;  %v8720_v18 = vld [vmem:[%s9669_s14 + $0x128] sm:$0xff]  }
 0x977   : > { %6204 = vmatpush1.bf16.msra.mxu0 %v8646_v14  ;;  %7631 = vmatpush3.bf16.msra.mxu1 %v8650_v56  ;;  %v8718_v14 = vld [vmem:[%s9669_s14 + $0x120] sm:$0xff]   ;;  %v8729_v38 = vld [vmem:[%s9669_s14 + $0x158] sm:$0xff]  }
 0x978   : > { %6235 = vmatprep.mubr.bf16.mxu0 %v5631_v15  ;;  %6316 = vmatprep.mubr.bf16.mxu1 %v5631_v15  ;;  %v8719_v56 = vld [vmem:[%s9669_s14 + $0xe0] sm:$0xff]   ;;  %v8723_v15 = vld [vmem:[%s9669_s14 + $0xf0] sm:$0xff]  }
 0x979   : > { %6205 = vmatprep.subr.bf16.mxu0 %v8653_v6  ;;  %7632 = vmatprep.subr.bf16.mxu1 %v8654_v50  ;;  %v8721_v6 = vld [vmem:[%s9669_s14 + $0xe8] sm:$0xff]   ;;  %v8722_v50 = vld [vmem:[%s9669_s14 + $0x130] sm:$0xff]  }
 0x97b   : > { %6206 = vmatpush1.bf16.msra.mxu0 %v8651_v51  ;;  %7633 = vmatpush3.bf16.msra.mxu1 %v8655_v20  ;;  %v8724_v51 = vld [vmem:[%s9669_s14 + $0x138] sm:$0xff]  }
 0x97c   : > { %6207 = vmatprep.subr.bf16.mxu0 %v8658_v21  ;;  %7634 = vmatprep.subr.bf16.mxu1 %v8659_v8  ;;  %v8725_v20 = vld [vmem:[%s9669_s14 + $0xf8] sm:$0xff]  }
 0x97f   : > { %6208 = vmatpush1.bf16.msra.mxu0 %v8656_v22  ;;  %7635 = vmatpush3.bf16.msra.mxu1 %v8660_v9 }
 0x980   : > { %6209 = vmatprep.subr.bf16.mxu0 %v8663_v23  ;;  %7636 = vmatprep.subr.bf16.mxu1 %v8664_v24  ;;  %v7261_v24 = vld [vmem:[%s9699_s28 + $0x3] sm:$0x7] }
 0x983   : > { %6210 = vmatpush1.bf16.msra.mxu0 %v8661_v25  ;;  %7637 = vmatpush3.bf16.msra.mxu1 %v8665_v27  ;;  %v5646_v25 = vrot.slane %v7261_v24, %v9314_v3 }
 0x984   : > { %6211 = vmatprep.subr.bf16.mxu0 %v8668_v28  ;;  %7638 = vmatprep.subr.bf16.mxu1 %v8669_v29 }
 0x987   : > { %6212 = vmatpush1.bf16.msra.mxu0 %v8666_v32  ;;  %7639 = vmatpush3.bf16.msra.mxu1 %v8670_v1 }
 0x988   : > { %6213 = vmatprep.subr.bf16.mxu0 %v8673_v33  ;;  %7640 = vmatprep.subr.bf16.mxu1 %v8674_v31 }
 0x98b   : > { %6214 = vmatpush1.bf16.msra.mxu0 %v8671_v34  ;;  %7641 = vmatpush3.bf16.msra.mxu1 %v8675_v26  ;;  %v5638_v34 = vrot.slane %v7261_v24, %v9287_v52  ;;  %v5642_v26 = vrot.slane %v7261_v24, %v9290_v53  ;;  %v8727_v52 = vld [vmem:[%s9669_s14 + $0x148] sm:$0xff]   ;;  %v8728_v53 = vld [vmem:[%s9669_s14 + $0x150] sm:$0xff]  }
 0x98c   : > { %6215 = vmatprep.subr.bf16.mxu0 %v8678_v30  ;;  %7642 = vmatprep.subr.bf16.mxu1 %v8679_v57 }
 0x98f   : > { %6216 = vmatpush1.bf16.msra.mxu0 %v8676_v42  ;;  %7643 = vmatpush3.bf16.msra.mxu1 %v8680_v47 }
 0x990   : > { %6217 = vmatprep.subr.bf16.mxu0 %v8683_v5  ;;  %7644 = vmatprep.subr.bf16.mxu1 %v8684_v17 }
 0x993   : > { %6218 = vmatpush1.bf16.msra.mxu0 %v8681_v19  ;;  %7645 = vmatpush3.bf16.msra.mxu1 %v8685_v36  ;;  %v8726_v19 = vld [vmem:[%s9669_s14 + $0x140] sm:$0xff]  }
 0x994   : > { %6219 = vmatprep.subr.bf16.mxu0 %v8688_v40  ;;  %7652 = vmatprep.subr.bf16.mxu1 %v8710_v44  ;;  %v8730_v40 = vld [vmem:[%s9669_s14 + $0x160] sm:$0xff]  }
 0x996   : > { %6317 = vmatmul.mubr.bf16.vlgmr.msra.gmra.mrb[64].mxu1 %v5630_v55 }
 0x997   : > { %6220 = vmatpush1.bf16.msra.mxu0 %v8686_v41  ;;  %7653 = vmatpush3.bf16.msra.mxu1 %v8711_v10  ;;  %v8731_v41 = vld [vmem:[%s9669_s14 + $0x168] sm:$0xff]  }
 0x998   : > { %6221 = vmatprep.subr.bf16.mxu0 %v8691_v43  ;;  %7654 = vmatprep.subr.bf16.mxu1 %v8712_v11  ;;  %v8733_v43 = vld [vmem:[%s9669_s14 + $0x178] sm:$0xff]  }
 0x99b   : > { %6222 = vmatpush1.bf16.msra.mxu0 %v8689_v45  ;;  %7655 = vmatpush3.bf16.msra.mxu1 %v8713_v48 }
 0x99c   : > { %6223 = vmatprep.subr.bf16.mxu0 %v8694_v58  ;;  %7656 = vmatprep.subr.bf16.mxu1 %v8714_v12 }
 0x99f   : > { %6224 = vmatpush1.bf16.msra.mxu0 %v8692_v54  ;;  %7657 = vmatpush3.bf16.msra.mxu1 %v8715_v16 }
 0x9a0   : > { %6225 = vmatprep.subr.bf16.mxu0 %v8697_v46  ;;  %7658 = vmatprep.subr.bf16.mxu1 %v8716_v37 }
 0x9a3   : > { %6226 = vmatpush1.bf16.msra.mxu0 %v8695_v60  ;;  %7659 = vmatpush3.bf16.msra.mxu1 %v8717_v13 }
 0x9a4   : > { %6227 = vmatprep.subr.bf16.mxu0 %v8700_v61  ;;  %7660 = vmatprep.subr.bf16.mxu1 %v8718_v14 }
 0x9a7   : > { %6228 = vmatpush1.bf16.msra.mxu0 %v8698_v59  ;;  %7661 = vmatpush3.bf16.msra.mxu1 %v8719_v56 }
 0x9a8   : > { %6229 = vmatprep.subr.bf16.mxu0 %v8703_v49  ;;  %7662 = vmatprep.subr.bf16.mxu1 %v8720_v18  ;;  %v7407_v49 = vld [vmem:[%s9700_s13 + $0x1] ss:$0 sm:$0xff] }
 0x9ab   : > { %6230 = vmatpush1.bf16.msra.mxu0 %v8701_v63  ;;  %7663 = vmatpush3.bf16.msra.mxu1 %v8721_v6 }
 0x9ac   : > { %6231 = vmatprep.subr.bf16.mxu0 %v8706_v39  ;;  %7664 = vmatprep.subr.bf16.mxu1 %v8722_v50 }
 0x9af   : > { %6232 = vmatpush1.bf16.msra.mxu0 %v8704_v2  ;;  %7665 = vmatpush3.bf16.msra.mxu1 %v8723_v15 }
 0x9b0   : > { %6233 = vmatprep.subr.bf16.mxu0 %v8709_v7  ;;  %7666 = vmatprep.subr.bf16.mxu1 %v8724_v51 }
 0x9b3   : > { %6234 = vmatpush1.bf16.msra.mxu0 %v8707_v4  ;;  %7667 = vmatpush3.bf16.msra.mxu1 %v8725_v20 }
 0x9b4   : > { %7741 = vmatprep.subr.bf16.mxu1 %v8908_v0 }
 0x9b6   : > { %6236 = vmatmul.mubr.bf16.vlgmr.msra.gmra.mrb[72].mxu0 %v5630_v55  ;;  %v8732_v55 = vld [vmem:[%s9669_s14 + $0x170] sm:$0xff]  }
 0xa49   : > { %v7624_v21 = vpop.f32.mrb[60].mxu1 }
 0xa4a   : > { %v7625_v8 = vpop.f32.mrb[61].mxu1 }
 0xa4b   : > { %v7626_v22 = vadd.f32 %v7625_v8, %v7624_v21  ;;  %v7627_v9 = vpop.f32.mrb[62].mxu1 }
 0xa4c   : > { %v7628_v23 = vpop.f32.mrb[63].mxu1 }
 0xa4d   : > { %v6279_v29 = vadd.f32 %v7626_v22, %v5646_v25 }
 0xa69   : > { %v7646_v27 = vpop.f32.mrb[64].mxu1 }
 0xa6a   : > { %v7647_v28 = vpop.f32.mrb[65].mxu1 }
 0xa6b   : > { %v7648_v32 = vadd.f32 %v7647_v28, %v7646_v27  ;;  %v7649_v1 = vpop.f32.mrb[66].mxu1 }
 0xa6c   : > { %v7650_v33 = vpop.f32.mrb[67].mxu1 }
 0xa6d   : > { %v6319_v31 = vadd.f32 %v7648_v32, %v6279_v29 }
 0xa6f   : > { %v6326_v45 = vmax.f32 %v6319_v31, 0.0 }
 0xa71   : > { %v6378_v58 = vpack.c.bf16 %v6326_v45, %v6326_v45 }
 0xa89   : > { %v6237_v35 = vpop.f32.mrb[72].mxu0 }
 0xa8a   : > { %v7819_v30 = vadd.f32 %v6237_v35, %v5638_v34  ;;  %v6239_v57 = vpop.f32.mrb[73].mxu0 }
 0xa8b   : > { %v7820_v42 = vadd.f32 %v6239_v57, %v5642_v26  ;;  %v6241_v47 = vpop.f32.mrb[74].mxu0 }
 0xa8c   : > { %v6324_v62 = vmax.f32 %v7819_v30, 0.0  ;;  %v6242_v5 = vpop.f32.mrb[75].mxu0 }
 0xa8d   : > { %v6325_v17 = vmax.f32 %v7820_v42, 0.0 }
 0xa8e   : > { %v6376_v36 = vpack.c.bf16 %v6324_v62, %v6324_v62 }
 0xa8f   : > { %v6377_v3 = vpack.c.bf16 %v6325_v17, %v6325_v17 }
 0xa91   : > { %6563 = vmatprep.mubr.bf16.mxu1 %v6377_v3 }
 0xa92   : > { %6564 = vmatmul.mubr.bf16.vlgmr.msra.gmra.mrb[68].mxu1 %v6376_v36 }
 0xa93   : > { %7742 = vmatpush3.bf16.msra.mxu1 %v8726_v19  ;;  %7757 = vmatprep.mubr.msk.bf16.mxu1 %vm8911_vm6, %v8908_v0 }
 0xa94   : > { %7743 = vmatprep.subr.bf16.mxu1 %v8908_v0 }
 0xa97   : > { %7744 = vmatpush3.bf16.msra.mxu1 %v8727_v52 }
 0xa98   : > { %7745 = vmatprep.subr.bf16.mxu1 %v8908_v0 }
 0xa9b   : > { %7746 = vmatpush3.bf16.msra.mxu1 %v8728_v53 }
 0xa9c   : > { %7747 = vmatprep.subr.bf16.mxu1 %v8908_v0 }
 0xa9f   : > { %7748 = vmatpush3.bf16.msra.mxu1 %v8729_v38 }
 0xaa0   : > { %7749 = vmatprep.subr.bf16.mxu1 %v8908_v0 }
 0xaa3   : > { %7750 = vmatpush3.bf16.msra.mxu1 %v8730_v40 }
 0xaa4   : > { %7751 = vmatprep.subr.bf16.mxu1 %v8908_v0 }
 0xaa7   : > { %7752 = vmatpush3.bf16.msra.mxu1 %v8731_v41 }
 0xaa8   : > { %7753 = vmatprep.subr.bf16.mxu1 %v8908_v0 }
 0xaab   : > { %7754 = vmatpush3.bf16.msra.mxu1 %v8732_v55 }
 0xaac   : > { %7755 = vmatprep.subr.bf16.mxu1 %v8908_v0 }
 0xaaf   : > { %7756 = vmatpush3.bf16.msra.mxu1 %v8733_v43 }
 0xab2   : > { %7758 = vmatmul.mubr.bf16.vlgmr.msra.gmra.mrb[72].mxu1 %v6378_v58 }
 0xb65   : > { %v7668_v54 = vpop.f32.mrb[68].mxu1 }
 0xb66   : > { %v7669_v46 = vpop.f32.mrb[69].mxu1 }
 0xb67   : > { %v7670_v60 = vadd.f32 %v7669_v46, %v7668_v54  ;;  %v7671_v61 = vpop.f32.mrb[70].mxu1 }
 0xb68   : > { %v7672_v59 = vpop.f32.mrb[71].mxu1 }
 0xb69   : > { %v6566_v63 = vadd.f32 %v7670_v60, %v7407_v49 }
 0xb85   : > { %v6605_v39 = vpop.f32.mrb[72].mxu1 }
 0xb86   : > { %v6606_v2 = vadd.f32 %v6605_v39, %v6566_v63  ;;  %v7759_v7 = vpop.f32.mrb[73].mxu1 }
 0xb87   : > { %v6608_v4 = vpop.f32.mrb[74].mxu1 }
 0xb88   : > { %6611 = vst [vmem:[%s9527_s20 + $0x8] sm:$0xff] %v6606_v2  ;;  %v7760_v44 = vpop.f32.mrb[75].mxu1 }
 0xb89 PF: > { %s9702_s16 = sld [smem:[#allocation13_spill]] }
 0xb8f   : > { %s29_s21 = sadd.s32 1, %s9702_s16  }
 0xb90   : > { %p26_p8 = scmp.ge.s32.totalorder %s29_s21, 4  }
 0xb92   :  { %28 = sbr.rel (!%p26_p8) target bundleno = 10 (0xa), region = 148 }
 0xb99   :  { %6633 = vsyncpa [#allocation3], 1 }
 0xb9a   :  { %6635 = vsyncpa [#allocation3 + $0x1], 1 }
 0xb9b   :  { %6636 = vsyncpa [#allocation5], 1 }
 0xb9c   :  { %6637 = vsyncpa [#allocation8], 1 }

</bundles_post_ra>
